<compile_context>
chip_gen: v7x
topology: tpu7x:2x2x1
jax: 0.10.0
libtpu: 0.0.40
codegen_flags: <defaults>
</compile_context>

<pallas_src>
import functools
import math

import jax
import jax.numpy as jnp
from jax.experimental import pallas as pl
from jax.experimental.pallas import tpu as pltpu


# ----------------------------- Pallas kernel -------------------------------

def _transformer_block_kernel(
    x_ref,                                   # (R, E)  f32,  R = batch_tile * S
    wq_ref, bq_ref, wk_ref, bk_ref,          # (E, E) cd, (1, E) f32, ...
    wv_ref, bv_ref, wo_ref, bo_ref,
    ln1_g_ref, ln1_b_ref,                    # (1, E) f32
    w1_ref, b1_ref,                          # (E, F) cd, (1, F) f32
    w2_ref, b2_ref,                          # (F, E) cd, (1, E) f32
    ln2_g_ref, ln2_b_ref,                    # (1, E) f32
    out_ref,                                 # (R, E)  f32
    attn_ref,                                # (batch_tile, H, S, S) f32
    ctx_ref,                                 # VMEM scratch (R, E) f32
    *, num_heads: int, seq_len: int, batch_tile: int, compute_dtype,
):
    S, H = seq_len, num_heads
    R, E = x_ref.shape
    hd = E // H
    scale = 1.0 / math.sqrt(hd)
    eps = 1e-5
    cd = compute_dtype

    x = x_ref[...]                           # (R, E) f32, kept for the residual
    xc = x.astype(cd)

    # Hoist broadcast-style parameters once (JAX does not CSE broadcasts).
    bq, bk, bv, bo = bq_ref[...], bk_ref[...], bv_ref[...], bo_ref[...]
    g1, be1 = ln1_g_ref[...], ln1_b_ref[...]
    g2, be2 = ln2_g_ref[...], ln2_b_ref[...]
    b1, b2 = b1_ref[...], b2_ref[...]

    # --- q / k / v projections over the folded (batch*seq) row dimension -----
    q = jnp.dot(xc, wq_ref[...], preferred_element_type=jnp.float32) + bq
    k = jnp.dot(xc, wk_ref[...], preferred_element_type=jnp.float32) + bk
    v = jnp.dot(xc, wv_ref[...], preferred_element_type=jnp.float32) + bv
    qc, kc, vc = q.astype(cd), k.astype(cd), v.astype(cd)

    # --- attention: per (batch, head), heads = static lane slices -------------
    # Results go straight to refs (no Python-list collection / concatenation):
    # probs -> attn_ref[b, h]  (already (B, H, S, S) layout),
    # ctx   -> ctx_ref rows/columns (VMEM scratch), read once by the wo matmul.
    # TODO(synk): for realistic S, kv-tile with online softmax instead of
    # materializing (S, S) per head; for v6e/v7x MXU width, batch the per-head
    # matmuls into one batched dot_general once hd is a multiple of 128 so the
    # head slices are free lane-tile views.
    for b in range(batch_tile):
        r0 = b * S
        for h in range(H):
            c0 = h * hd
            qh = qc[r0:r0 + S, c0:c0 + hd]          # (S, hd), static slices
            kh = kc[r0:r0 + S, c0:c0 + hd]
            vh = vc[r0:r0 + S, c0:c0 + hd]
            s = jax.lax.dot_general(                 # (S, S) = qh @ kh^T
                qh, kh, (((1,), (1,)), ((), ())),
                preferred_element_type=jnp.float32) * scale
            s = s - jnp.max(s, axis=-1, keepdims=True)
            e = jnp.exp(s)
            denom = jnp.sum(e, axis=-1, keepdims=True)
            r = pl.reciprocal(denom, approx=True)    # EUP slot
            r = r * (2.0 - denom * r)                # Newton step -> exact softmax
            p = e * r
            attn_ref[b, h] = p                       # direct (B, H, S, S) write
            ctx_ref[r0:r0 + S, c0:c0 + hd] = jnp.dot(
                p.astype(cd), vh, preferred_element_type=jnp.float32)

    attn_out = jnp.dot(ctx_ref[...].astype(cd), wo_ref[...],
                       preferred_element_type=jnp.float32) + bo

    # --- residual + LayerNorm (attention sub-block), f32 VPU math ------------
    y = x + attn_out
    mu = jnp.mean(y, axis=-1, keepdims=True)
    var = jnp.mean((y - mu) ** 2, axis=-1, keepdims=True)
    y = (y - mu) * jax.lax.rsqrt(var + eps) * g1 + be1

    # --- position-wise FFN over folded rows ----------------------------------
    # TODO(synk): at realistic E/F (e.g. 1024/4096) on v7x, add a grid axis over
    # F to stream w1 (N-tiling) / w2 (K-tiling + f32 accumulator) instead of
    # keeping both resident.
    h1 = jnp.dot(y.astype(cd), w1_ref[...], preferred_element_type=jnp.float32) + b1
    h1 = 0.5 * h1 * (1.0 + jax.lax.erf(h1 * (1.0 / math.sqrt(2.0))))  # exact GELU
    z = jnp.dot(h1.astype(cd), w2_ref[...], preferred_element_type=jnp.float32) + b2

    # --- residual + LayerNorm (FFN sub-block) --------------------------------
    y2 = y + z
    mu2 = jnp.mean(y2, axis=-1, keepdims=True)
    var2 = jnp.mean((y2 - mu2) ** 2, axis=-1, keepdims=True)
    out_ref[...] = (y2 - mu2) * jax.lax.rsqrt(var2 + eps) * g2 + be2


# ------------------------------- wrapper ------------------------------------

def _pick_batch_tile(batch, seq_len, target_rows=512):
    """Largest divisor of `batch` with d <= B//2 (keeps >= 2 grid steps for
    pipelining / v7x dual-TC), d*S a multiple of 8 (sublane constraint when the
    row axis is tiled) and d*S <= target_rows."""
    cap = max(1, batch // 2)
    candidates = [d for d in range(1, cap + 1)
                  if batch % d == 0 and (d * seq_len) % 8 == 0]
    if not candidates:
        # TODO(synk): pad S to a multiple of 8 instead of collapsing the grid.
        return batch
    fitting = [d for d in candidates if d * seq_len <= target_rows]
    return max(fitting) if fitting else min(candidates)


def _vmem_limit_bytes(R, E, F_dim, H, S, batch_tile, compute_dtype):
    cd = jnp.dtype(compute_dtype).itemsize
    weights = (4 * E * E + 2 * E * F_dim) * cd                 # single-buffered
    small = (8 * E + 2 * F_dim) * 4
    io_tiles = 2 * (2 * R * E + batch_tile * H * S * S) * 4    # double-buffered I/O
    scratch = R * E * 4                                        # ctx scratch
    live = (R * (6 * E + F_dim) + 2 * S * S) * 4
    need = weights + 2 * small + io_tiles + scratch + live
    try:
        cap = pltpu.get_tpu_info().vmem_capacity_bytes
    except Exception:  # pragma: no cover - info query unavailable
        cap = 64 << 20
    # 0.85 of physical VMEM leaves headroom for Mosaic-internal scratch.
    return int(max(16 << 20, min(int(0.85 * cap), 2 * need)))


def _const_spec(shape, single_buffer):
    """Constant-index BlockSpec; optionally single-buffered (weights are
    revisited every grid step, a second DMA buffer is pure VMEM waste)."""
    if single_buffer:
        try:
            return pl.BlockSpec(shape, lambda i: (0, 0),
                                pipeline_mode=pl.Buffered(1))
        except TypeError:
            pass
    return pl.BlockSpec(shape, lambda i: (0, 0))


def local_transformer_block(x, params, num_heads, *,
                            compute_dtype=jnp.bfloat16, batch_tile=None):
    """x: (B, S, E) f32.  Returns (out (B,S,E) f32, attn (B,H,S,S) f32).

    compute_dtype: dtype of MXU operands (weights + matmul inputs).  bf16 is
    the recommended setting on all TPU generations (v5e included: the MXU is
    bf16-native and all VPU/EUP math here stays f32); accumulation is f32.
    """
    B, S, E = x.shape
    F_dim = params["w1"].shape[1]
    H = num_heads
    if batch_tile is None:
        batch_tile = _pick_batch_tile(B, S)
    assert B % batch_tile == 0
    R = batch_tile * S                      # rows per grid step (folded batch*seq)
    if batch_tile < B:
        assert R % 8 == 0, "row tile must be a multiple of 8 (sublane constraint)"
    grid = (B // batch_tile,)

    x2 = x.reshape(B * S, E)                # fold batch into the matmul M dim
    cd = compute_dtype
    w = {k: params[k].astype(cd) for k in ("wq", "wk", "wv", "wo", "w1", "w2")}

    kernel = functools.partial(
        _transformer_block_kernel, num_heads=H, seq_len=S,
        batch_tile=batch_tile, compute_dtype=cd)

    def run(single_buffer_weights):
        const = lambda shape: _const_spec(shape, single_buffer_weights)
        in_specs = [
            pl.BlockSpec((R, E), lambda i: (i, 0)),          # x rows
            const((E, E)), const((1, E)),                    # wq, bq
            const((E, E)), const((1, E)),                    # wk, bk
            const((E, E)), const((1, E)),                    # wv, bv
            const((E, E)), const((1, E)),                    # wo, bo
            const((1, E)), const((1, E)),                    # ln1 gamma, beta
            const((E, F_dim)), const((1, F_dim)),            # w1, b1
            const((F_dim, E)), const((1, E)),                # w2, b2
            const((1, E)), const((1, E)),                    # ln2 gamma, beta
        ]
        out_specs = [
            pl.BlockSpec((R, E), lambda i: (i, 0)),              # block output rows
            pl.BlockSpec((batch_tile, H, S, S),                  # attention, final layout
                         lambda i: (i, 0, 0, 0)),
        ]
        out_shape = [
            jax.ShapeDtypeStruct((B * S, E), jnp.float32),
            jax.ShapeDtypeStruct((B, H, S, S), jnp.float32),
        ]
        fn = pl.pallas_call(
            kernel,
            out_shape=out_shape,
            grid_spec=pltpu.PrefetchScalarGridSpec(
                num_scalar_prefetch=0, grid=grid,
                in_specs=in_specs, out_specs=out_specs,
                scratch_shapes=[pltpu.VMEM((R, E), jnp.float32)]),
            compiler_params=pltpu.CompilerParams(
                dimension_semantics=("parallel",),       # megacore / v7x 2-TC split
                vmem_limit_bytes=_vmem_limit_bytes(R, E, F_dim, H, S,
                                                   batch_tile, cd)),
        )
        o, a = fn(
            x2,
            w["wq"], params["bq"], w["wk"], params["bk"],
            w["wv"], params["bv"], w["wo"], params["bo"],
            params["ln1_g"], params["ln1_b"],
            w["w1"], params["b1"], w["w2"], params["b2"],
            params["ln2_g"], params["ln2_b"],
        )
        jax.block_until_ready((o, a))
        return o, a

    try:
        out2, attn = run(single_buffer_weights=True)
    except Exception:
        # pl.Buffered(1) not accepted by this jax/Mosaic version — retry with
        # default (double-buffered) constant specs.
        out2, attn = run(single_buffer_weights=False)

    return out2.reshape(B, S, E), attn


# --------------------------- parameter setup ---------------------------------

def _spectral_normalize(w):
    # TODO(synk): PyTorch uses power iteration; exact SVD is its converged limit.
    sigma = jnp.linalg.svd(w, compute_uv=False)[0]
    return w / sigma


def init_params(key, embed_dim, num_heads, ffn_dim):
    """Deterministic synthetic parameters.  Linear weights stored (in, out),
    i.e. already transposed relative to PyTorch's (out, in)."""
    E, F = embed_dim, ffn_dim
    ks = jax.random.split(key, 12)

    def lin(k, fan_in, fan_out):
        bound = 1.0 / math.sqrt(fan_in)
        return jax.random.uniform(k, (fan_out, fan_in), jnp.float32, -bound, bound)

    wq = _spectral_normalize(lin(ks[0], E, E)).T
    wk = _spectral_normalize(lin(ks[1], E, E)).T
    wv = _spectral_normalize(lin(ks[2], E, E)).T
    wo = lin(ks[3], E, E).T
    w1 = lin(ks[4], E, F).T
    w2 = lin(ks[5], F, E).T

    def bias(k, n):
        bound = 1.0 / math.sqrt(n)
        return jax.random.uniform(k, (1, n), jnp.float32, -bound, bound)

    return {
        "wq": wq, "bq": bias(ks[6], E),
        "wk": wk, "bk": bias(ks[7], E),
        "wv": wv, "bv": bias(ks[8], E),
        "wo": wo, "bo": bias(ks[9], E),
        "ln1_g": jnp.ones((1, E), jnp.float32),
        "ln1_b": jnp.zeros((1, E), jnp.float32),
        "w1": w1, "b1": bias(ks[10], F).reshape(1, F),
        "w2": w2, "b2": bias(ks[11], E),
        "ln2_g": jnp.ones((1, E), jnp.float32),
        "ln2_b": jnp.zeros((1, E), jnp.float32),
    }


# ---------------------------- pure-JAX reference -----------------------------

def reference(x, p, num_heads, compute_dtype=jnp.float32):
    """Mirrors the kernel's cast placement (operands in compute_dtype, f32 acc)."""
    B, S, E = x.shape
    H, hd = num_heads, E // num_heads
    cd = compute_dtype

    def ln(v, g, b):
        mu = jnp.mean(v, -1, keepdims=True)
        var = jnp.mean((v - mu) ** 2, -1, keepdims=True)
        return (v - mu) * jax.lax.rsqrt(var + 1e-5) * g + b

    def mm(a, w):
        return jnp.dot(a.astype(cd), w.astype(cd), preferred_element_type=jnp.float32)

    q = (mm(x, p["wq"]) + p["bq"]).reshape(B, S, H, hd).transpose(0, 2, 1, 3)
    k = (mm(x, p["wk"]) + p["bk"]).reshape(B, S, H, hd).transpose(0, 2, 1, 3)
    v = (mm(x, p["wv"]) + p["bv"]).reshape(B, S, H, hd).transpose(0, 2, 1, 3)
    scores = jnp.einsum("bhqd,bhkd->bhqk", q.astype(cd), k.astype(cd),
                        preferred_element_type=jnp.float32) * (1.0 / math.sqrt(hd))
    attn = jax.nn.softmax(scores, axis=-1)
    ctx = jnp.einsum("bhqk,bhkd->bhqd", attn.astype(cd), v.astype(cd),
                     preferred_element_type=jnp.float32)
    ctx = ctx.transpose(0, 2, 1, 3).reshape(B, S, E)
    y = ln(x + mm(ctx, p["wo"]) + p["bo"], p["ln1_g"], p["ln1_b"])
    h = jax.nn.gelu(mm(y, p["w1"]) + p["b1"], approximate=False)
    z = mm(h, p["w2"]) + p["b2"]
    return ln(y + z, p["ln2_g"], p["ln2_b"]), attn


# ----------------------------------- main ------------------------------------

if __name__ == "__main__":
    B, S, E, H, FFN = 2, 8, 32, 4, 64

    key = jax.random.PRNGKey(0)
    kx, kp = jax.random.split(key)
    x = jax.random.normal(kx, (B, S, E), jnp.float32)
    params = init_params(kp, E, H, FFN)

    # Exact f32 MXU-operand path.
    out, attn = local_transformer_block(x, params, H, compute_dtype=jnp.float32)
    out, attn = jax.block_until_ready(out), jax.block_until_ready(attn)
    ref_out, ref_attn = reference(x, params, H, compute_dtype=jnp.float32)
    assert jnp.allclose(out, ref_out, rtol=1e-2, atol=1e-2), "f32 output mismatch"
    assert jnp.allclose(attn, ref_attn, rtol=1e-2, atol=1e-2), "f32 attn mismatch"

    # bf16 MXU operands, f32 accumulation (recommended on v5e/v6e/v7x), checked
    # against a reference that casts at the same points.
    out16, attn16 = local_transformer_block(x, params, H, compute_dtype=jnp.bfloat16)
    out16, attn16 = jax.block_until_ready(out16), jax.block_until_ready(attn16)
    ref16_out, ref16_attn = reference(x, params, H, compute_dtype=jnp.bfloat16)
    assert jnp.allclose(out16, ref16_out, rtol=1e-2, atol=1e-2), "bf16 output mismatch"
    assert jnp.allclose(attn16, ref16_attn, rtol=1e-2, atol=1e-2), "bf16 attn mismatch"

    print("KERNEL_OK")
</pallas_src>

<mosaic_0001>
module attributes {stable_mosaic.version = 11 : i64} {
  func.func @_transformer_block_kernel(%arg0: i32, %arg1: memref<8x32xf32, #tpu.memory_space<vmem>>, %arg2: memref<32x32xf32, #tpu.memory_space<vmem>>, %arg3: memref<1x32xf32, #tpu.memory_space<vmem>>, %arg4: memref<32x32xf32, #tpu.memory_space<vmem>>, %arg5: memref<1x32xf32, #tpu.memory_space<vmem>>, %arg6: memref<32x32xf32, #tpu.memory_space<vmem>>, %arg7: memref<1x32xf32, #tpu.memory_space<vmem>>, %arg8: memref<32x32xf32, #tpu.memory_space<vmem>>, %arg9: memref<1x32xf32, #tpu.memory_space<vmem>>, %arg10: memref<1x32xf32, #tpu.memory_space<vmem>>, %arg11: memref<1x32xf32, #tpu.memory_space<vmem>>, %arg12: memref<32x64xf32, #tpu.memory_space<vmem>>, %arg13: memref<1x64xf32, #tpu.memory_space<vmem>>, %arg14: memref<64x32xf32, #tpu.memory_space<vmem>>, %arg15: memref<1x32xf32, #tpu.memory_space<vmem>>, %arg16: memref<1x32xf32, #tpu.memory_space<vmem>>, %arg17: memref<1x32xf32, #tpu.memory_space<vmem>>, %arg18: memref<8x32xf32, #tpu.memory_space<vmem>>, %arg19: memref<1x4x8x8xf32, #tpu.memory_space<vmem>>, %arg20: memref<8x32xf32, #tpu.memory_space<vmem>>) attributes {dimension_semantics = [#tpu.dimension_semantics<parallel>], iteration_bounds = array<i64: 2>, scalar_prefetch = 0 : i64, scratch_operands = 1 : i64, tpu.core_type = #tpu.core_type<tc>, window_params = [{transform_indices = @transform_0, window_bounds = array<i64: 8, 32>}, {pipeline_mode = #tpu.pipeline_mode<synchronous>, transform_indices = @transform_1, window_bounds = array<i64: 32, 32>}, {pipeline_mode = #tpu.pipeline_mode<synchronous>, transform_indices = @transform_2, window_bounds = array<i64: 1, 32>}, {pipeline_mode = #tpu.pipeline_mode<synchronous>, transform_indices = @transform_3, window_bounds = array<i64: 32, 32>}, {pipeline_mode = #tpu.pipeline_mode<synchronous>, transform_indices = @transform_4, window_bounds = array<i64: 1, 32>}, {pipeline_mode = #tpu.pipeline_mode<synchronous>, transform_indices = @transform_5, window_bounds = array<i64: 32, 32>}, {pipeline_mode = #tpu.pipeline_mode<synchronous>, transform_indices = @transform_6, window_bounds = array<i64: 1, 32>}, {pipeline_mode = #tpu.pipeline_mode<synchronous>, transform_indices = @transform_7, window_bounds = array<i64: 32, 32>}, {pipeline_mode = #tpu.pipeline_mode<synchronous>, transform_indices = @transform_8, window_bounds = array<i64: 1, 32>}, {pipeline_mode = #tpu.pipeline_mode<synchronous>, transform_indices = @transform_9, window_bounds = array<i64: 1, 32>}, {pipeline_mode = #tpu.pipeline_mode<synchronous>, transform_indices = @transform_10, window_bounds = array<i64: 1, 32>}, {pipeline_mode = #tpu.pipeline_mode<synchronous>, transform_indices = @transform_11, window_bounds = array<i64: 32, 64>}, {pipeline_mode = #tpu.pipeline_mode<synchronous>, transform_indices = @transform_12, window_bounds = array<i64: 1, 64>}, {pipeline_mode = #tpu.pipeline_mode<synchronous>, transform_indices = @transform_13, window_bounds = array<i64: 64, 32>}, {pipeline_mode = #tpu.pipeline_mode<synchronous>, transform_indices = @transform_14, window_bounds = array<i64: 1, 32>}, {pipeline_mode = #tpu.pipeline_mode<synchronous>, transform_indices = @transform_15, window_bounds = array<i64: 1, 32>}, {pipeline_mode = #tpu.pipeline_mode<synchronous>, transform_indices = @transform_16, window_bounds = array<i64: 1, 32>}, {transform_indices = @transform_17, window_bounds = array<i64: 8, 32>}, {transform_indices = @transform_18, window_bounds = array<i64: 1, 4, 8, 8>}]} {
    %c0 = arith.constant 0 : index
    %c0_0 = arith.constant 0 : index
    %0 = vector.load %arg1[%c0, %c0_0] : memref<8x32xf32, #tpu.memory_space<vmem>>, vector<8x32xf32>
    %c0_1 = arith.constant 0 : index
    %c0_2 = arith.constant 0 : index
    %1 = vector.load %arg3[%c0_1, %c0_2] : memref<1x32xf32, #tpu.memory_space<vmem>>, vector<1x32xf32>
    %c0_3 = arith.constant 0 : index
    %c0_4 = arith.constant 0 : index
    %2 = vector.load %arg5[%c0_3, %c0_4] : memref<1x32xf32, #tpu.memory_space<vmem>>, vector<1x32xf32>
    %c0_5 = arith.constant 0 : index
    %c0_6 = arith.constant 0 : index
    %3 = vector.load %arg7[%c0_5, %c0_6] : memref<1x32xf32, #tpu.memory_space<vmem>>, vector<1x32xf32>
    %c0_7 = arith.constant 0 : index
    %c0_8 = arith.constant 0 : index
    %4 = vector.load %arg9[%c0_7, %c0_8] : memref<1x32xf32, #tpu.memory_space<vmem>>, vector<1x32xf32>
    %c0_9 = arith.constant 0 : index
    %c0_10 = arith.constant 0 : index
    %5 = vector.load %arg10[%c0_9, %c0_10] : memref<1x32xf32, #tpu.memory_space<vmem>>, vector<1x32xf32>
    %c0_11 = arith.constant 0 : index
    %c0_12 = arith.constant 0 : index
    %6 = vector.load %arg11[%c0_11, %c0_12] : memref<1x32xf32, #tpu.memory_space<vmem>>, vector<1x32xf32>
    %c0_13 = arith.constant 0 : index
    %c0_14 = arith.constant 0 : index
    %7 = vector.load %arg16[%c0_13, %c0_14] : memref<1x32xf32, #tpu.memory_space<vmem>>, vector<1x32xf32>
    %c0_15 = arith.constant 0 : index
    %c0_16 = arith.constant 0 : index
    %8 = vector.load %arg17[%c0_15, %c0_16] : memref<1x32xf32, #tpu.memory_space<vmem>>, vector<1x32xf32>
    %c0_17 = arith.constant 0 : index
    %c0_18 = arith.constant 0 : index
    %9 = vector.load %arg13[%c0_17, %c0_18] : memref<1x64xf32, #tpu.memory_space<vmem>>, vector<1x64xf32>
    %c0_19 = arith.constant 0 : index
    %c0_20 = arith.constant 0 : index
    %10 = vector.load %arg15[%c0_19, %c0_20] : memref<1x32xf32, #tpu.memory_space<vmem>>, vector<1x32xf32>
    %c0_21 = arith.constant 0 : index
    %c0_22 = arith.constant 0 : index
    %11 = vector.load %arg2[%c0_21, %c0_22] : memref<32x32xf32, #tpu.memory_space<vmem>>, vector<32x32xf32>
    %cst = arith.constant dense<0.000000e+00> : vector<8x32xf32>
    %12 = tpu.matmul %0, %11, %cst {dimension_numbers = #tpu.dot_dimension_numbers<[1], [0], [0], [1], [0, 0, 1, 1], [], []>} : vector<8x32xf32>, vector<32x32xf32>, vector<8x32xf32> -> vector<8x32xf32>
    %13 = vector.broadcast %1 : vector<1x32xf32> to vector<8x32xf32>
    %14 = arith.addf %12, %13 : vector<8x32xf32>
    %c0_23 = arith.constant 0 : index
    %c0_24 = arith.constant 0 : index
    %15 = vector.load %arg4[%c0_23, %c0_24] : memref<32x32xf32, #tpu.memory_space<vmem>>, vector<32x32xf32>
    %cst_25 = arith.constant dense<0.000000e+00> : vector<8x32xf32>
    %16 = tpu.matmul %0, %15, %cst_25 {dimension_numbers = #tpu.dot_dimension_numbers<[1], [0], [0], [1], [0, 0, 1, 1], [], []>} : vector<8x32xf32>, vector<32x32xf32>, vector<8x32xf32> -> vector<8x32xf32>
    %17 = vector.broadcast %2 : vector<1x32xf32> to vector<8x32xf32>
    %18 = arith.addf %16, %17 : vector<8x32xf32>
    %c0_26 = arith.constant 0 : index
    %c0_27 = arith.constant 0 : index
    %19 = vector.load %arg6[%c0_26, %c0_27] : memref<32x32xf32, #tpu.memory_space<vmem>>, vector<32x32xf32>
    %cst_28 = arith.constant dense<0.000000e+00> : vector<8x32xf32>
    %20 = tpu.matmul %0, %19, %cst_28 {dimension_numbers = #tpu.dot_dimension_numbers<[1], [0], [0], [1], [0, 0, 1, 1], [], []>} : vector<8x32xf32>, vector<32x32xf32>, vector<8x32xf32> -> vector<8x32xf32>
    %21 = vector.broadcast %3 : vector<1x32xf32> to vector<8x32xf32>
    %22 = arith.addf %20, %21 : vector<8x32xf32>
    %23 = vector.extract_strided_slice %14 {offsets = [0, 0], sizes = [8, 8], strides = [1, 1]} : vector<8x32xf32> to vector<8x8xf32>
    %24 = vector.extract_strided_slice %18 {offsets = [0, 0], sizes = [8, 8], strides = [1, 1]} : vector<8x32xf32> to vector<8x8xf32>
    %25 = vector.extract_strided_slice %22 {offsets = [0, 0], sizes = [8, 8], strides = [1, 1]} : vector<8x32xf32> to vector<8x8xf32>
    %cst_29 = arith.constant dense<0.000000e+00> : vector<8x8xf32>
    %26 = tpu.matmul %23, %24, %cst_29 {dimension_numbers = #tpu.dot_dimension_numbers<[1], [1], [0], [0], [0, 0, 1, 0], [], []>} : vector<8x8xf32>, vector<8x8xf32>, vector<8x8xf32> -> vector<8x8xf32>
    %cst_30 = arith.constant 0.353553385 : f32
    %27 = vector.broadcast %cst_30 : f32 to vector<8x8xf32>
    %28 = arith.mulf %26, %27 : vector<8x8xf32>
    %cst_31 = arith.constant dense<0xFF800000> : vector<8xf32>
    %29 = vector.multi_reduction <maximumf>, %28, %cst_31 [1] : vector<8x8xf32> to vector<8xf32>
    %30 = vector.shape_cast %29 : vector<8xf32> to vector<8x1xf32>
    %31 = vector.broadcast %30 : vector<8x1xf32> to vector<8x8xf32>
    %32 = arith.subf %28, %31 : vector<8x8xf32>
    %33 = math.exp %32 : vector<8x8xf32>
    %cst_32 = arith.constant dense<0.000000e+00> : vector<8xf32>
    %34 = vector.multi_reduction <add>, %33, %cst_32 [1] : vector<8x8xf32> to vector<8xf32>
    %35 = vector.shape_cast %34 : vector<8xf32> to vector<8x1xf32>
    %36 = tpu.reciprocal %35 {approx = true} : vector<8x1xf32> -> vector<8x1xf32>
    %37 = arith.mulf %35, %36 : vector<8x1xf32>
    %cst_33 = arith.constant 2.000000e+00 : f32
    %38 = vector.broadcast %cst_33 : f32 to vector<8x1xf32>
    %39 = arith.subf %38, %37 : vector<8x1xf32>
    %40 = arith.mulf %36, %39 : vector<8x1xf32>
    %41 = vector.broadcast %40 : vector<8x1xf32> to vector<8x8xf32>
    %42 = arith.mulf %33, %41 : vector<8x8xf32>
    %c0_34 = arith.constant 0 : index
    %c0_35 = arith.constant 0 : index
    %c0_36 = arith.constant 0 : index
    %c0_37 = arith.constant 0 : index
    %43 = vector.load %arg19[%c0_34, %c0_35, %c0_36, %c0_37] : memref<1x4x8x8xf32, #tpu.memory_space<vmem>>, vector<1x1x8x8xf32>
    %44 = vector.shape_cast %43 : vector<1x1x8x8xf32> to vector<8x8xf32>
    %45 = vector.shape_cast %42 : vector<8x8xf32> to vector<1x1x8x8xf32>
    tpu.vector_store %arg19[%c0_34, %c0_35, %c0_36, %c0_37], %45 {strides = array<i32>} : memref<1x4x8x8xf32, #tpu.memory_space<vmem>>, vector<1x1x8x8xf32>,
    %cst_38 = arith.constant dense<0.000000e+00> : vector<8x8xf32>
    %46 = tpu.matmul %42, %25, %cst_38 {dimension_numbers = #tpu.dot_dimension_numbers<[1], [0], [0], [1], [0, 0, 1, 1], [], []>} : vector<8x8xf32>, vector<8x8xf32>, vector<8x8xf32> -> vector<8x8xf32>
    %c0_39 = arith.constant 0 : index
    %c0_40 = arith.constant 0 : index
    %47 = vector.load %arg20[%c0_39, %c0_40] : memref<8x32xf32, #tpu.memory_space<vmem>>, vector<8x8xf32>
    tpu.vector_store %arg20[%c0_39, %c0_40], %46 {strides = array<i32>} : memref<8x32xf32, #tpu.memory_space<vmem>>, vector<8x8xf32>,
    %48 = vector.extract_strided_slice %14 {offsets = [0, 8], sizes = [8, 8], strides = [1, 1]} : vector<8x32xf32> to vector<8x8xf32>
    %49 = vector.extract_strided_slice %18 {offsets = [0, 8], sizes = [8, 8], strides = [1, 1]} : vector<8x32xf32> to vector<8x8xf32>
    %50 = vector.extract_strided_slice %22 {offsets = [0, 8], sizes = [8, 8], strides = [1, 1]} : vector<8x32xf32> to vector<8x8xf32>
    %cst_41 = arith.constant dense<0.000000e+00> : vector<8x8xf32>
    %51 = tpu.matmul %48, %49, %cst_41 {dimension_numbers = #tpu.dot_dimension_numbers<[1], [1], [0], [0], [0, 0, 1, 0], [], []>} : vector<8x8xf32>, vector<8x8xf32>, vector<8x8xf32> -> vector<8x8xf32>
    %cst_42 = arith.constant 0.353553385 : f32
    %52 = vector.broadcast %cst_42 : f32 to vector<8x8xf32>
    %53 = arith.mulf %51, %52 : vector<8x8xf32>
    %cst_43 = arith.constant dense<0xFF800000> : vector<8xf32>
    %54 = vector.multi_reduction <maximumf>, %53, %cst_43 [1] : vector<8x8xf32> to vector<8xf32>
    %55 = vector.shape_cast %54 : vector<8xf32> to vector<8x1xf32>
    %56 = vector.broadcast %55 : vector<8x1xf32> to vector<8x8xf32>
    %57 = arith.subf %53, %56 : vector<8x8xf32>
    %58 = math.exp %57 : vector<8x8xf32>
    %cst_44 = arith.constant dense<0.000000e+00> : vector<8xf32>
    %59 = vector.multi_reduction <add>, %58, %cst_44 [1] : vector<8x8xf32> to vector<8xf32>
    %60 = vector.shape_cast %59 : vector<8xf32> to vector<8x1xf32>
    %61 = tpu.reciprocal %60 {approx = true} : vector<8x1xf32> -> vector<8x1xf32>
    %62 = arith.mulf %60, %61 : vector<8x1xf32>
    %cst_45 = arith.constant 2.000000e+00 : f32
    %63 = vector.broadcast %cst_45 : f32 to vector<8x1xf32>
    %64 = arith.subf %63, %62 : vector<8x1xf32>
    %65 = arith.mulf %61, %64 : vector<8x1xf32>
    %66 = vector.broadcast %65 : vector<8x1xf32> to vector<8x8xf32>
    %67 = arith.mulf %58, %66 : vector<8x8xf32>
    %c0_46 = arith.constant 0 : index
    %c1 = arith.constant 1 : index
    %c0_47 = arith.constant 0 : index
    %c0_48 = arith.constant 0 : index
    %68 = vector.load %arg19[%c0_46, %c1, %c0_47, %c0_48] : memref<1x4x8x8xf32, #tpu.memory_space<vmem>>, vector<1x1x8x8xf32>
    %69 = vector.shape_cast %68 : vector<1x1x8x8xf32> to vector<8x8xf32>
    %70 = vector.shape_cast %67 : vector<8x8xf32> to vector<1x1x8x8xf32>
    tpu.vector_store %arg19[%c0_46, %c1, %c0_47, %c0_48], %70 {strides = array<i32>} : memref<1x4x8x8xf32, #tpu.memory_space<vmem>>, vector<1x1x8x8xf32>,
    %cst_49 = arith.constant dense<0.000000e+00> : vector<8x8xf32>
    %71 = tpu.matmul %67, %50, %cst_49 {dimension_numbers = #tpu.dot_dimension_numbers<[1], [0], [0], [1], [0, 0, 1, 1], [], []>} : vector<8x8xf32>, vector<8x8xf32>, vector<8x8xf32> -> vector<8x8xf32>
    %c0_50 = arith.constant 0 : index
    %c8 = arith.constant 8 : index
    %72 = vector.load %arg20[%c0_50, %c8] : memref<8x32xf32, #tpu.memory_space<vmem>>, vector<8x8xf32>
    tpu.vector_store %arg20[%c0_50, %c8], %71 {strides = array<i32>} : memref<8x32xf32, #tpu.memory_space<vmem>>, vector<8x8xf32>,
    %73 = vector.extract_strided_slice %14 {offsets = [0, 16], sizes = [8, 8], strides = [1, 1]} : vector<8x32xf32> to vector<8x8xf32>
    %74 = vector.extract_strided_slice %18 {offsets = [0, 16], sizes = [8, 8], strides = [1, 1]} : vector<8x32xf32> to vector<8x8xf32>
    %75 = vector.extract_strided_slice %22 {offsets = [0, 16], sizes = [8, 8], strides = [1, 1]} : vector<8x32xf32> to vector<8x8xf32>
    %cst_51 = arith.constant dense<0.000000e+00> : vector<8x8xf32>
    %76 = tpu.matmul %73, %74, %cst_51 {dimension_numbers = #tpu.dot_dimension_numbers<[1], [1], [0], [0], [0, 0, 1, 0], [], []>} : vector<8x8xf32>, vector<8x8xf32>, vector<8x8xf32> -> vector<8x8xf32>
    %cst_52 = arith.constant 0.353553385 : f32
    %77 = vector.broadcast %cst_52 : f32 to vector<8x8xf32>
    %78 = arith.mulf %76, %77 : vector<8x8xf32>
    %cst_53 = arith.constant dense<0xFF800000> : vector<8xf32>
    %79 = vector.multi_reduction <maximumf>, %78, %cst_53 [1] : vector<8x8xf32> to vector<8xf32>
    %80 = vector.shape_cast %79 : vector<8xf32> to vector<8x1xf32>
    %81 = vector.broadcast %80 : vector<8x1xf32> to vector<8x8xf32>
    %82 = arith.subf %78, %81 : vector<8x8xf32>
    %83 = math.exp %82 : vector<8x8xf32>
    %cst_54 = arith.constant dense<0.000000e+00> : vector<8xf32>
    %84 = vector.multi_reduction <add>, %83, %cst_54 [1] : vector<8x8xf32> to vector<8xf32>
    %85 = vector.shape_cast %84 : vector<8xf32> to vector<8x1xf32>
    %86 = tpu.reciprocal %85 {approx = true} : vector<8x1xf32> -> vector<8x1xf32>
    %87 = arith.mulf %85, %86 : vector<8x1xf32>
    %cst_55 = arith.constant 2.000000e+00 : f32
    %88 = vector.broadcast %cst_55 : f32 to vector<8x1xf32>
    %89 = arith.subf %88, %87 : vector<8x1xf32>
    %90 = arith.mulf %86, %89 : vector<8x1xf32>
    %91 = vector.broadcast %90 : vector<8x1xf32> to vector<8x8xf32>
    %92 = arith.mulf %83, %91 : vector<8x8xf32>
    %c0_56 = arith.constant 0 : index
    %c2 = arith.constant 2 : index
    %c0_57 = arith.constant 0 : index
    %c0_58 = arith.constant 0 : index
    %93 = vector.load %arg19[%c0_56, %c2, %c0_57, %c0_58] : memref<1x4x8x8xf32, #tpu.memory_space<vmem>>, vector<1x1x8x8xf32>
    %94 = vector.shape_cast %93 : vector<1x1x8x8xf32> to vector<8x8xf32>
    %95 = vector.shape_cast %92 : vector<8x8xf32> to vector<1x1x8x8xf32>
    tpu.vector_store %arg19[%c0_56, %c2, %c0_57, %c0_58], %95 {strides = array<i32>} : memref<1x4x8x8xf32, #tpu.memory_space<vmem>>, vector<1x1x8x8xf32>,
    %cst_59 = arith.constant dense<0.000000e+00> : vector<8x8xf32>
    %96 = tpu.matmul %92, %75, %cst_59 {dimension_numbers = #tpu.dot_dimension_numbers<[1], [0], [0], [1], [0, 0, 1, 1], [], []>} : vector<8x8xf32>, vector<8x8xf32>, vector<8x8xf32> -> vector<8x8xf32>
    %c0_60 = arith.constant 0 : index
    %c16 = arith.constant 16 : index
    %97 = vector.load %arg20[%c0_60, %c16] : memref<8x32xf32, #tpu.memory_space<vmem>>, vector<8x8xf32>
    tpu.vector_store %arg20[%c0_60, %c16], %96 {strides = array<i32>} : memref<8x32xf32, #tpu.memory_space<vmem>>, vector<8x8xf32>,
    %98 = vector.extract_strided_slice %14 {offsets = [0, 24], sizes = [8, 8], strides = [1, 1]} : vector<8x32xf32> to vector<8x8xf32>
    %99 = vector.extract_strided_slice %18 {offsets = [0, 24], sizes = [8, 8], strides = [1, 1]} : vector<8x32xf32> to vector<8x8xf32>
    %100 = vector.extract_strided_slice %22 {offsets = [0, 24], sizes = [8, 8], strides = [1, 1]} : vector<8x32xf32> to vector<8x8xf32>
    %cst_61 = arith.constant dense<0.000000e+00> : vector<8x8xf32>
    %101 = tpu.matmul %98, %99, %cst_61 {dimension_numbers = #tpu.dot_dimension_numbers<[1], [1], [0], [0], [0, 0, 1, 0], [], []>} : vector<8x8xf32>, vector<8x8xf32>, vector<8x8xf32> -> vector<8x8xf32>
    %cst_62 = arith.constant 0.353553385 : f32
    %102 = vector.broadcast %cst_62 : f32 to vector<8x8xf32>
    %103 = arith.mulf %101, %102 : vector<8x8xf32>
    %cst_63 = arith.constant dense<0xFF800000> : vector<8xf32>
    %104 = vector.multi_reduction <maximumf>, %103, %cst_63 [1] : vector<8x8xf32> to vector<8xf32>
    %105 = vector.shape_cast %104 : vector<8xf32> to vector<8x1xf32>
    %106 = vector.broadcast %105 : vector<8x1xf32> to vector<8x8xf32>
    %107 = arith.subf %103, %106 : vector<8x8xf32>
    %108 = math.exp %107 : vector<8x8xf32>
    %cst_64 = arith.constant dense<0.000000e+00> : vector<8xf32>
    %109 = vector.multi_reduction <add>, %108, %cst_64 [1] : vector<8x8xf32> to vector<8xf32>
    %110 = vector.shape_cast %109 : vector<8xf32> to vector<8x1xf32>
    %111 = tpu.reciprocal %110 {approx = true} : vector<8x1xf32> -> vector<8x1xf32>
    %112 = arith.mulf %110, %111 : vector<8x1xf32>
    %cst_65 = arith.constant 2.000000e+00 : f32
    %113 = vector.broadcast %cst_65 : f32 to vector<8x1xf32>
    %114 = arith.subf %113, %112 : vector<8x1xf32>
    %115 = arith.mulf %111, %114 : vector<8x1xf32>
    %116 = vector.broadcast %115 : vector<8x1xf32> to vector<8x8xf32>
    %117 = arith.mulf %108, %116 : vector<8x8xf32>
    %c0_66 = arith.constant 0 : index
    %c3 = arith.constant 3 : index
    %c0_67 = arith.constant 0 : index
    %c0_68 = arith.constant 0 : index
    %118 = vector.load %arg19[%c0_66, %c3, %c0_67, %c0_68] : memref<1x4x8x8xf32, #tpu.memory_space<vmem>>, vector<1x1x8x8xf32>
    %119 = vector.shape_cast %118 : vector<1x1x8x8xf32> to vector<8x8xf32>
    %120 = vector.shape_cast %117 : vector<8x8xf32> to vector<1x1x8x8xf32>
    tpu.vector_store %arg19[%c0_66, %c3, %c0_67, %c0_68], %120 {strides = array<i32>} : memref<1x4x8x8xf32, #tpu.memory_space<vmem>>, vector<1x1x8x8xf32>,
    %cst_69 = arith.constant dense<0.000000e+00> : vector<8x8xf32>
    %121 = tpu.matmul %117, %100, %cst_69 {dimension_numbers = #tpu.dot_dimension_numbers<[1], [0], [0], [1], [0, 0, 1, 1], [], []>} : vector<8x8xf32>, vector<8x8xf32>, vector<8x8xf32> -> vector<8x8xf32>
    %c0_70 = arith.constant 0 : index
    %c24 = arith.constant 24 : index
    %122 = vector.load %arg20[%c0_70, %c24] : memref<8x32xf32, #tpu.memory_space<vmem>>, vector<8x8xf32>
    tpu.vector_store %arg20[%c0_70, %c24], %121 {strides = array<i32>} : memref<8x32xf32, #tpu.memory_space<vmem>>, vector<8x8xf32>,
    %c0_71 = arith.constant 0 : index
    %c0_72 = arith.constant 0 : index
    %123 = vector.load %arg20[%c0_71, %c0_72] : memref<8x32xf32, #tpu.memory_space<vmem>>, vector<8x32xf32>
    %c0_73 = arith.constant 0 : index
    %c0_74 = arith.constant 0 : index
    %124 = vector.load %arg8[%c0_73, %c0_74] : memref<32x32xf32, #tpu.memory_space<vmem>>, vector<32x32xf32>
    %cst_75 = arith.constant dense<0.000000e+00> : vector<8x32xf32>
    %125 = tpu.matmul %123, %124, %cst_75 {dimension_numbers = #tpu.dot_dimension_numbers<[1], [0], [0], [1], [0, 0, 1, 1], [], []>} : vector<8x32xf32>, vector<32x32xf32>, vector<8x32xf32> -> vector<8x32xf32>
    %126 = vector.broadcast %4 : vector<1x32xf32> to vector<8x32xf32>
    %127 = arith.addf %125, %126 : vector<8x32xf32>
    %128 = arith.addf %0, %127 : vector<8x32xf32>
    %cst_76 = arith.constant dense<0.000000e+00> : vector<8xf32>
    %129 = vector.multi_reduction <add>, %128, %cst_76 [1] : vector<8x32xf32> to vector<8xf32>
    %130 = vector.shape_cast %129 : vector<8xf32> to vector<8x1xf32>
    %cst_77 = arith.constant 3.200000e+01 : f32
    %131 = vector.broadcast %cst_77 : f32 to vector<8x1xf32>
    %132 = arith.divf %130, %131 : vector<8x1xf32>
    %133 = vector.broadcast %132 : vector<8x1xf32> to vector<8x32xf32>
    %134 = arith.subf %128, %133 : vector<8x32xf32>
    %135 = arith.mulf %134, %134 : vector<8x32xf32>
    %cst_78 = arith.constant dense<0.000000e+00> : vector<8xf32>
    %136 = vector.multi_reduction <add>, %135, %cst_78 [1] : vector<8x32xf32> to vector<8xf32>
    %137 = vector.shape_cast %136 : vector<8xf32> to vector<8x1xf32>
    %cst_79 = arith.constant 3.200000e+01 : f32
    %138 = vector.broadcast %cst_79 : f32 to vector<8x1xf32>
    %139 = arith.divf %137, %138 : vector<8x1xf32>
    %140 = vector.broadcast %132 : vector<8x1xf32> to vector<8x32xf32>
    %141 = arith.subf %128, %140 : vector<8x32xf32>
    %cst_80 = arith.constant 9.99999974E-6 : f32
    %142 = vector.broadcast %cst_80 : f32 to vector<8x1xf32>
    %143 = arith.addf %139, %142 : vector<8x1xf32>
    %144 = math.rsqrt %143 : vector<8x1xf32>
    %145 = vector.broadcast %144 : vector<8x1xf32> to vector<8x32xf32>
    %146 = arith.mulf %141, %145 : vector<8x32xf32>
    %147 = vector.broadcast %5 : vector<1x32xf32> to vector<8x32xf32>
    %148 = arith.mulf %146, %147 : vector<8x32xf32>
    %149 = vector.broadcast %6 : vector<1x32xf32> to vector<8x32xf32>
    %150 = arith.addf %148, %149 : vector<8x32xf32>
    %c0_81 = arith.constant 0 : index
    %c0_82 = arith.constant 0 : index
    %151 = vector.load %arg12[%c0_81, %c0_82] : memref<32x64xf32, #tpu.memory_space<vmem>>, vector<32x64xf32>
    %cst_83 = arith.constant dense<0.000000e+00> : vector<8x64xf32>
    %152 = tpu.matmul %150, %151, %cst_83 {dimension_numbers = #tpu.dot_dimension_numbers<[1], [0], [0], [1], [0, 0, 1, 1], [], []>} : vector<8x32xf32>, vector<32x64xf32>, vector<8x64xf32> -> vector<8x64xf32>
    %153 = vector.broadcast %9 : vector<1x64xf32> to vector<8x64xf32>
    %154 = arith.addf %152, %153 : vector<8x64xf32>
    %cst_84 = arith.constant 5.000000e-01 : f32
    %155 = vector.broadcast %cst_84 : f32 to vector<8x64xf32>
    %156 = arith.mulf %155, %154 : vector<8x64xf32>
    %cst_85 = arith.constant 0.707106769 : f32
    %157 = vector.broadcast %cst_85 : f32 to vector<8x64xf32>
    %158 = arith.mulf %154, %157 : vector<8x64xf32>
    %159 = math.erf %158 : vector<8x64xf32>
    %cst_86 = arith.constant 1.000000e+00 : f32
    %160 = vector.broadcast %cst_86 : f32 to vector<8x64xf32>
    %161 = arith.addf %160, %159 : vector<8x64xf32>
    %162 = arith.mulf %156, %161 : vector<8x64xf32>
    %c0_87 = arith.constant 0 : index
    %c0_88 = arith.constant 0 : index
    %163 = vector.load %arg14[%c0_87, %c0_88] : memref<64x32xf32, #tpu.memory_space<vmem>>, vector<64x32xf32>
    %cst_89 = arith.constant dense<0.000000e+00> : vector<8x32xf32>
    %164 = tpu.matmul %162, %163, %cst_89 {dimension_numbers = #tpu.dot_dimension_numbers<[1], [0], [0], [1], [0, 0, 1, 1], [], []>} : vector<8x64xf32>, vector<64x32xf32>, vector<8x32xf32> -> vector<8x32xf32>
    %165 = vector.broadcast %10 : vector<1x32xf32> to vector<8x32xf32>
    %166 = arith.addf %164, %165 : vector<8x32xf32>
    %167 = arith.addf %150, %166 : vector<8x32xf32>
    %cst_90 = arith.constant dense<0.000000e+00> : vector<8xf32>
    %168 = vector.multi_reduction <add>, %167, %cst_90 [1] : vector<8x32xf32> to vector<8xf32>
    %169 = vector.shape_cast %168 : vector<8xf32> to vector<8x1xf32>
    %cst_91 = arith.constant 3.200000e+01 : f32
    %170 = vector.broadcast %cst_91 : f32 to vector<8x1xf32>
    %171 = arith.divf %169, %170 : vector<8x1xf32>
    %172 = vector.broadcast %171 : vector<8x1xf32> to vector<8x32xf32>
    %173 = arith.subf %167, %172 : vector<8x32xf32>
    %174 = arith.mulf %173, %173 : vector<8x32xf32>
    %cst_92 = arith.constant dense<0.000000e+00> : vector<8xf32>
    %175 = vector.multi_reduction <add>, %174, %cst_92 [1] : vector<8x32xf32> to vector<8xf32>
    %176 = vector.shape_cast %175 : vector<8xf32> to vector<8x1xf32>
    %cst_93 = arith.constant 3.200000e+01 : f32
    %177 = vector.broadcast %cst_93 : f32 to vector<8x1xf32>
    %178 = arith.divf %176, %177 : vector<8x1xf32>
    %179 = vector.broadcast %171 : vector<8x1xf32> to vector<8x32xf32>
    %180 = arith.subf %167, %179 : vector<8x32xf32>
    %cst_94 = arith.constant 9.99999974E-6 : f32
    %181 = vector.broadcast %cst_94 : f32 to vector<8x1xf32>
    %182 = arith.addf %178, %181 : vector<8x1xf32>
    %183 = math.rsqrt %182 : vector<8x1xf32>
    %184 = vector.broadcast %183 : vector<8x1xf32> to vector<8x32xf32>
    %185 = arith.mulf %180, %184 : vector<8x32xf32>
    %186 = vector.broadcast %7 : vector<1x32xf32> to vector<8x32xf32>
    %187 = arith.mulf %185, %186 : vector<8x32xf32>
    %188 = vector.broadcast %8 : vector<1x32xf32> to vector<8x32xf32>
    %189 = arith.addf %187, %188 : vector<8x32xf32>
    %c0_95 = arith.constant 0 : index
    %c0_96 = arith.constant 0 : index
    %190 = vector.load %arg18[%c0_95, %c0_96] : memref<8x32xf32, #tpu.memory_space<vmem>>, vector<8x32xf32>
    tpu.vector_store %arg18[%c0_95, %c0_96], %189 {strides = array<i32>} : memref<8x32xf32, #tpu.memory_space<vmem>>, vector<8x32xf32>,
    return
  }
  func.func @transform_0(%arg0: i32) -> (i32, i32) {
    %c0_i32 = arith.constant 0 : i32
    %c0_i32_0 = arith.constant 0 : i32
    return %arg0, %c0_i32 : i32, i32
  }
  func.func @transform_1(%arg0: i32) -> (i32, i32) {
    %c0_i32 = arith.constant 0 : i32
    %c0_i32_0 = arith.constant 0 : i32
    %c0_i32_1 = arith.constant 0 : i32
    return %c0_i32, %c0_i32_0 : i32, i32
  }
  func.func @transform_2(%arg0: i32) -> (i32, i32) {
    %c0_i32 = arith.constant 0 : i32
    %c0_i32_0 = arith.constant 0 : i32
    %c0_i32_1 = arith.constant 0 : i32
    return %c0_i32, %c0_i32_0 : i32, i32
  }
  func.func @transform_3(%arg0: i32) -> (i32, i32) {
    %c0_i32 = arith.constant 0 : i32
    %c0_i32_0 = arith.constant 0 : i32
    %c0_i32_1 = arith.constant 0 : i32
    return %c0_i32, %c0_i32_0 : i32, i32
  }
  func.func @transform_4(%arg0: i32) -> (i32, i32) {
    %c0_i32 = arith.constant 0 : i32
    %c0_i32_0 = arith.constant 0 : i32
    %c0_i32_1 = arith.constant 0 : i32
    return %c0_i32, %c0_i32_0 : i32, i32
  }
  func.func @transform_5(%arg0: i32) -> (i32, i32) {
    %c0_i32 = arith.constant 0 : i32
    %c0_i32_0 = arith.constant 0 : i32
    %c0_i32_1 = arith.constant 0 : i32
    return %c0_i32, %c0_i32_0 : i32, i32
  }
  func.func @transform_6(%arg0: i32) -> (i32, i32) {
    %c0_i32 = arith.constant 0 : i32
    %c0_i32_0 = arith.constant 0 : i32
    %c0_i32_1 = arith.constant 0 : i32
    return %c0_i32, %c0_i32_0 : i32, i32
  }
  func.func @transform_7(%arg0: i32) -> (i32, i32) {
    %c0_i32 = arith.constant 0 : i32
    %c0_i32_0 = arith.constant 0 : i32
    %c0_i32_1 = arith.constant 0 : i32
    return %c0_i32, %c0_i32_0 : i32, i32
  }
  func.func @transform_8(%arg0: i32) -> (i32, i32) {
    %c0_i32 = arith.constant 0 : i32
    %c0_i32_0 = arith.constant 0 : i32
    %c0_i32_1 = arith.constant 0 : i32
    return %c0_i32, %c0_i32_0 : i32, i32
  }
  func.func @transform_9(%arg0: i32) -> (i32, i32) {
    %c0_i32 = arith.constant 0 : i32
    %c0_i32_0 = arith.constant 0 : i32
    %c0_i32_1 = arith.constant 0 : i32
    return %c0_i32, %c0_i32_0 : i32, i32
  }
  func.func @transform_10(%arg0: i32) -> (i32, i32) {
    %c0_i32 = arith.constant 0 : i32
    %c0_i32_0 = arith.constant 0 : i32
    %c0_i32_1 = arith.constant 0 : i32
    return %c0_i32, %c0_i32_0 : i32, i32
  }
  func.func @transform_11(%arg0: i32) -> (i32, i32) {
    %c0_i32 = arith.constant 0 : i32
    %c0_i32_0 = arith.constant 0 : i32
    %c0_i32_1 = arith.constant 0 : i32
    return %c0_i32, %c0_i32_0 : i32, i32
  }
  func.func @transform_12(%arg0: i32) -> (i32, i32) {
    %c0_i32 = arith.constant 0 : i32
    %c0_i32_0 = arith.constant 0 : i32
    %c0_i32_1 = arith.constant 0 : i32
    return %c0_i32, %c0_i32_0 : i32, i32
  }
  func.func @transform_13(%arg0: i32) -> (i32, i32) {
    %c0_i32 = arith.constant 0 : i32
    %c0_i32_0 = arith.constant 0 : i32
    %c0_i32_1 = arith.constant 0 : i32
    return %c0_i32, %c0_i32_0 : i32, i32
  }
  func.func @transform_14(%arg0: i32) -> (i32, i32) {
    %c0_i32 = arith.constant 0 : i32
    %c0_i32_0 = arith.constant 0 : i32
    %c0_i32_1 = arith.constant 0 : i32
    return %c0_i32, %c0_i32_0 : i32, i32
  }
  func.func @transform_15(%arg0: i32) -> (i32, i32) {
    %c0_i32 = arith.constant 0 : i32
    %c0_i32_0 = arith.constant 0 : i32
    %c0_i32_1 = arith.constant 0 : i32
    return %c0_i32, %c0_i32_0 : i32, i32
  }
  func.func @transform_16(%arg0: i32) -> (i32, i32) {
    %c0_i32 = arith.constant 0 : i32
    %c0_i32_0 = arith.constant 0 : i32
    %c0_i32_1 = arith.constant 0 : i32
    return %c0_i32, %c0_i32_0 : i32, i32
  }
  func.func @transform_17(%arg0: i32) -> (i32, i32) {
    %c0_i32 = arith.constant 0 : i32
    %c0_i32_0 = arith.constant 0 : i32
    return %arg0, %c0_i32 : i32, i32
  }
  func.func @transform_18(%arg0: i32) -> (i32, i32, i32, i32) {
    %c0_i32 = arith.constant 0 : i32
    %c0_i32_0 = arith.constant 0 : i32
    %c0_i32_1 = arith.constant 0 : i32
    %c0_i32_2 = arith.constant 0 : i32
    return %arg0, %c0_i32, %c0_i32_0, %c0_i32_1 : i32, i32, i32, i32
  }
}

module attributes {stable_mosaic.version = 11 : i64} {
  func.func @_transformer_block_kernel(%arg0: i32, %arg1: memref<8x32xf32, #tpu.memory_space<vmem>>, %arg2: memref<32x32xf32, #tpu.memory_space<vmem>>, %arg3: memref<1x32xf32, #tpu.memory_space<vmem>>, %arg4: memref<32x32xf32, #tpu.memory_space<vmem>>, %arg5: memref<1x32xf32, #tpu.memory_space<vmem>>, %arg6: memref<32x32xf32, #tpu.memory_space<vmem>>, %arg7: memref<1x32xf32, #tpu.memory_space<vmem>>, %arg8: memref<32x32xf32, #tpu.memory_space<vmem>>, %arg9: memref<1x32xf32, #tpu.memory_space<vmem>>, %arg10: memref<1x32xf32, #tpu.memory_space<vmem>>, %arg11: memref<1x32xf32, #tpu.memory_space<vmem>>, %arg12: memref<32x64xf32, #tpu.memory_space<vmem>>, %arg13: memref<1x64xf32, #tpu.memory_space<vmem>>, %arg14: memref<64x32xf32, #tpu.memory_space<vmem>>, %arg15: memref<1x32xf32, #tpu.memory_space<vmem>>, %arg16: memref<1x32xf32, #tpu.memory_space<vmem>>, %arg17: memref<1x32xf32, #tpu.memory_space<vmem>>, %arg18: memref<8x32xf32, #tpu.memory_space<vmem>>, %arg19: memref<1x4x8x8xf32, #tpu.memory_space<vmem>>, %arg20: memref<8x32xf32, #tpu.memory_space<vmem>>) attributes {dimension_semantics = [#tpu.dimension_semantics<parallel>], iteration_bounds = array<i64: 2>, scalar_prefetch = 0 : i64, scratch_operands = 1 : i64, tpu.core_type = #tpu.core_type<tc>, window_params = [{transform_indices = @transform_0, window_bounds = array<i64: 8, 32>}, {pipeline_mode = #tpu.pipeline_mode<synchronous>, transform_indices = @transform_1, window_bounds = array<i64: 32, 32>}, {pipeline_mode = #tpu.pipeline_mode<synchronous>, transform_indices = @transform_2, window_bounds = array<i64: 1, 32>}, {pipeline_mode = #tpu.pipeline_mode<synchronous>, transform_indices = @transform_3, window_bounds = array<i64: 32, 32>}, {pipeline_mode = #tpu.pipeline_mode<synchronous>, transform_indices = @transform_4, window_bounds = array<i64: 1, 32>}, {pipeline_mode = #tpu.pipeline_mode<synchronous>, transform_indices = @transform_5, window_bounds = array<i64: 32, 32>}, {pipeline_mode = #tpu.pipeline_mode<synchronous>, transform_indices = @transform_6, window_bounds = array<i64: 1, 32>}, {pipeline_mode = #tpu.pipeline_mode<synchronous>, transform_indices = @transform_7, window_bounds = array<i64: 32, 32>}, {pipeline_mode = #tpu.pipeline_mode<synchronous>, transform_indices = @transform_8, window_bounds = array<i64: 1, 32>}, {pipeline_mode = #tpu.pipeline_mode<synchronous>, transform_indices = @transform_9, window_bounds = array<i64: 1, 32>}, {pipeline_mode = #tpu.pipeline_mode<synchronous>, transform_indices = @transform_10, window_bounds = array<i64: 1, 32>}, {pipeline_mode = #tpu.pipeline_mode<synchronous>, transform_indices = @transform_11, window_bounds = array<i64: 32, 64>}, {pipeline_mode = #tpu.pipeline_mode<synchronous>, transform_indices = @transform_12, window_bounds = array<i64: 1, 64>}, {pipeline_mode = #tpu.pipeline_mode<synchronous>, transform_indices = @transform_13, window_bounds = array<i64: 64, 32>}, {pipeline_mode = #tpu.pipeline_mode<synchronous>, transform_indices = @transform_14, window_bounds = array<i64: 1, 32>}, {pipeline_mode = #tpu.pipeline_mode<synchronous>, transform_indices = @transform_15, window_bounds = array<i64: 1, 32>}, {pipeline_mode = #tpu.pipeline_mode<synchronous>, transform_indices = @transform_16, window_bounds = array<i64: 1, 32>}, {transform_indices = @transform_17, window_bounds = array<i64: 8, 32>}, {transform_indices = @transform_18, window_bounds = array<i64: 1, 4, 8, 8>}]} {
    %c0 = arith.constant 0 : index
    %c0_0 = arith.constant 0 : index
    %0 = vector.load %arg1[%c0, %c0_0] : memref<8x32xf32, #tpu.memory_space<vmem>>, vector<8x32xf32>
    %c0_1 = arith.constant 0 : index
    %c0_2 = arith.constant 0 : index
    %1 = vector.load %arg3[%c0_1, %c0_2] : memref<1x32xf32, #tpu.memory_space<vmem>>, vector<1x32xf32>
    %c0_3 = arith.constant 0 : index
    %c0_4 = arith.constant 0 : index
    %2 = vector.load %arg5[%c0_3, %c0_4] : memref<1x32xf32, #tpu.memory_space<vmem>>, vector<1x32xf32>
    %c0_5 = arith.constant 0 : index
    %c0_6 = arith.constant 0 : index
    %3 = vector.load %arg7[%c0_5, %c0_6] : memref<1x32xf32, #tpu.memory_space<vmem>>, vector<1x32xf32>
    %c0_7 = arith.constant 0 : index
    %c0_8 = arith.constant 0 : index
    %4 = vector.load %arg9[%c0_7, %c0_8] : memref<1x32xf32, #tpu.memory_space<vmem>>, vector<1x32xf32>
    %c0_9 = arith.constant 0 : index
    %c0_10 = arith.constant 0 : index
    %5 = vector.load %arg10[%c0_9, %c0_10] : memref<1x32xf32, #tpu.memory_space<vmem>>, vector<1x32xf32>
    %c0_11 = arith.constant 0 : index
    %c0_12 = arith.constant 0 : index
    %6 = vector.load %arg11[%c0_11, %c0_12] : memref<1x32xf32, #tpu.memory_space<vmem>>, vector<1x32xf32>
    %c0_13 = arith.constant 0 : index
    %c0_14 = arith.constant 0 : index
    %7 = vector.load %arg16[%c0_13, %c0_14] : memref<1x32xf32, #tpu.memory_space<vmem>>, vector<1x32xf32>
    %c0_15 = arith.constant 0 : index
    %c0_16 = arith.constant 0 : index
    %8 = vector.load %arg17[%c0_15, %c0_16] : memref<1x32xf32, #tpu.memory_space<vmem>>, vector<1x32xf32>
    %c0_17 = arith.constant 0 : index
    %c0_18 = arith.constant 0 : index
    %9 = vector.load %arg13[%c0_17, %c0_18] : memref<1x64xf32, #tpu.memory_space<vmem>>, vector<1x64xf32>
    %c0_19 = arith.constant 0 : index
    %c0_20 = arith.constant 0 : index
    %10 = vector.load %arg15[%c0_19, %c0_20] : memref<1x32xf32, #tpu.memory_space<vmem>>, vector<1x32xf32>
    %c0_21 = arith.constant 0 : index
    %c0_22 = arith.constant 0 : index
    %11 = vector.load %arg2[%c0_21, %c0_22] : memref<32x32xf32, #tpu.memory_space<vmem>>, vector<32x32xf32>
    %cst = arith.constant dense<0.000000e+00> : vector<8x32xf32>
    %12 = tpu.matmul %0, %11, %cst {dimension_numbers = #tpu.dot_dimension_numbers<[1], [0], [0], [1], [0, 0, 1, 1], [], []>} : vector<8x32xf32>, vector<32x32xf32>, vector<8x32xf32> -> vector<8x32xf32>
    %13 = vector.broadcast %1 : vector<1x32xf32> to vector<8x32xf32>
    %14 = arith.addf %12, %13 : vector<8x32xf32>
    %c0_23 = arith.constant 0 : index
    %c0_24 = arith.constant 0 : index
    %15 = vector.load %arg4[%c0_23, %c0_24] : memref<32x32xf32, #tpu.memory_space<vmem>>, vector<32x32xf32>
    %cst_25 = arith.constant dense<0.000000e+00> : vector<8x32xf32>
    %16 = tpu.matmul %0, %15, %cst_25 {dimension_numbers = #tpu.dot_dimension_numbers<[1], [0], [0], [1], [0, 0, 1, 1], [], []>} : vector<8x32xf32>, vector<32x32xf32>, vector<8x32xf32> -> vector<8x32xf32>
    %17 = vector.broadcast %2 : vector<1x32xf32> to vector<8x32xf32>
    %18 = arith.addf %16, %17 : vector<8x32xf32>
    %c0_26 = arith.constant 0 : index
    %c0_27 = arith.constant 0 : index
    %19 = vector.load %arg6[%c0_26, %c0_27] : memref<32x32xf32, #tpu.memory_space<vmem>>, vector<32x32xf32>
    %cst_28 = arith.constant dense<0.000000e+00> : vector<8x32xf32>
    %20 = tpu.matmul %0, %19, %cst_28 {dimension_numbers = #tpu.dot_dimension_numbers<[1], [0], [0], [1], [0, 0, 1, 1], [], []>} : vector<8x32xf32>, vector<32x32xf32>, vector<8x32xf32> -> vector<8x32xf32>
    %21 = vector.broadcast %3 : vector<1x32xf32> to vector<8x32xf32>
    %22 = arith.addf %20, %21 : vector<8x32xf32>
    %23 = vector.extract_strided_slice %14 {offsets = [0, 0], sizes = [8, 8], strides = [1, 1]} : vector<8x32xf32> to vector<8x8xf32>
    %24 = vector.extract_strided_slice %18 {offsets = [0, 0], sizes = [8, 8], strides = [1, 1]} : vector<8x32xf32> to vector<8x8xf32>
    %25 = vector.extract_strided_slice %22 {offsets = [0, 0], sizes = [8, 8], strides = [1, 1]} : vector<8x32xf32> to vector<8x8xf32>
    %cst_29 = arith.constant dense<0.000000e+00> : vector<8x8xf32>
    %26 = tpu.matmul %23, %24, %cst_29 {dimension_numbers = #tpu.dot_dimension_numbers<[1], [1], [0], [0], [0, 0, 1, 0], [], []>} : vector<8x8xf32>, vector<8x8xf32>, vector<8x8xf32> -> vector<8x8xf32>
    %cst_30 = arith.constant 0.353553385 : f32
    %27 = vector.broadcast %cst_30 : f32 to vector<8x8xf32>
    %28 = arith.mulf %26, %27 : vector<8x8xf32>
    %cst_31 = arith.constant dense<0xFF800000> : vector<8xf32>
    %29 = vector.multi_reduction <maximumf>, %28, %cst_31 [1] : vector<8x8xf32> to vector<8xf32>
    %30 = vector.shape_cast %29 : vector<8xf32> to vector<8x1xf32>
    %31 = vector.broadcast %30 : vector<8x1xf32> to vector<8x8xf32>
    %32 = arith.subf %28, %31 : vector<8x8xf32>
    %33 = math.exp %32 : vector<8x8xf32>
    %cst_32 = arith.constant dense<0.000000e+00> : vector<8xf32>
    %34 = vector.multi_reduction <add>, %33, %cst_32 [1] : vector<8x8xf32> to vector<8xf32>
    %35 = vector.shape_cast %34 : vector<8xf32> to vector<8x1xf32>
    %36 = tpu.reciprocal %35 {approx = true} : vector<8x1xf32> -> vector<8x1xf32>
    %37 = arith.mulf %35, %36 : vector<8x1xf32>
    %cst_33 = arith.constant 2.000000e+00 : f32
    %38 = vector.broadcast %cst_33 : f32 to vector<8x1xf32>
    %39 = arith.subf %38, %37 : vector<8x1xf32>
    %40 = arith.mulf %36, %39 : vector<8x1xf32>
    %41 = vector.broadcast %40 : vector<8x1xf32> to vector<8x8xf32>
    %42 = arith.mulf %33, %41 : vector<8x8xf32>
    %c0_34 = arith.constant 0 : index
    %c0_35 = arith.constant 0 : index
    %c0_36 = arith.constant 0 : index
    %c0_37 = arith.constant 0 : index
    %43 = vector.load %arg19[%c0_34, %c0_35, %c0_36, %c0_37] : memref<1x4x8x8xf32, #tpu.memory_space<vmem>>, vector<1x1x8x8xf32>
    %44 = vector.shape_cast %43 : vector<1x1x8x8xf32> to vector<8x8xf32>
    %45 = vector.shape_cast %42 : vector<8x8xf32> to vector<1x1x8x8xf32>
    tpu.vector_store %arg19[%c0_34, %c0_35, %c0_36, %c0_37], %45 {strides = array<i32>} : memref<1x4x8x8xf32, #tpu.memory_space<vmem>>, vector<1x1x8x8xf32>,
    %cst_38 = arith.constant dense<0.000000e+00> : vector<8x8xf32>
    %46 = tpu.matmul %42, %25, %cst_38 {dimension_numbers = #tpu.dot_dimension_numbers<[1], [0], [0], [1], [0, 0, 1, 1], [], []>} : vector<8x8xf32>, vector<8x8xf32>, vector<8x8xf32> -> vector<8x8xf32>
    %c0_39 = arith.constant 0 : index
    %c0_40 = arith.constant 0 : index
    %47 = vector.load %arg20[%c0_39, %c0_40] : memref<8x32xf32, #tpu.memory_space<vmem>>, vector<8x8xf32>
    tpu.vector_store %arg20[%c0_39, %c0_40], %46 {strides = array<i32>} : memref<8x32xf32, #tpu.memory_space<vmem>>, vector<8x8xf32>,
    %48 = vector.extract_strided_slice %14 {offsets = [0, 8], sizes = [8, 8], strides = [1, 1]} : vector<8x32xf32> to vector<8x8xf32>
    %49 = vector.extract_strided_slice %18 {offsets = [0, 8], sizes = [8, 8], strides = [1, 1]} : vector<8x32xf32> to vector<8x8xf32>
    %50 = vector.extract_strided_slice %22 {offsets = [0, 8], sizes = [8, 8], strides = [1, 1]} : vector<8x32xf32> to vector<8x8xf32>
    %cst_41 = arith.constant dense<0.000000e+00> : vector<8x8xf32>
    %51 = tpu.matmul %48, %49, %cst_41 {dimension_numbers = #tpu.dot_dimension_numbers<[1], [1], [0], [0], [0, 0, 1, 0], [], []>} : vector<8x8xf32>, vector<8x8xf32>, vector<8x8xf32> -> vector<8x8xf32>
    %cst_42 = arith.constant 0.353553385 : f32
    %52 = vector.broadcast %cst_42 : f32 to vector<8x8xf32>
    %53 = arith.mulf %51, %52 : vector<8x8xf32>
    %cst_43 = arith.constant dense<0xFF800000> : vector<8xf32>
    %54 = vector.multi_reduction <maximumf>, %53, %cst_43 [1] : vector<8x8xf32> to vector<8xf32>
    %55 = vector.shape_cast %54 : vector<8xf32> to vector<8x1xf32>
    %56 = vector.broadcast %55 : vector<8x1xf32> to vector<8x8xf32>
    %57 = arith.subf %53, %56 : vector<8x8xf32>
    %58 = math.exp %57 : vector<8x8xf32>
    %cst_44 = arith.constant dense<0.000000e+00> : vector<8xf32>
    %59 = vector.multi_reduction <add>, %58, %cst_44 [1] : vector<8x8xf32> to vector<8xf32>
    %60 = vector.shape_cast %59 : vector<8xf32> to vector<8x1xf32>
    %61 = tpu.reciprocal %60 {approx = true} : vector<8x1xf32> -> vector<8x1xf32>
    %62 = arith.mulf %60, %61 : vector<8x1xf32>
    %cst_45 = arith.constant 2.000000e+00 : f32
    %63 = vector.broadcast %cst_45 : f32 to vector<8x1xf32>
    %64 = arith.subf %63, %62 : vector<8x1xf32>
    %65 = arith.mulf %61, %64 : vector<8x1xf32>
    %66 = vector.broadcast %65 : vector<8x1xf32> to vector<8x8xf32>
    %67 = arith.mulf %58, %66 : vector<8x8xf32>
    %c0_46 = arith.constant 0 : index
    %c1 = arith.constant 1 : index
    %c0_47 = arith.constant 0 : index
    %c0_48 = arith.constant 0 : index
    %68 = vector.load %arg19[%c0_46, %c1, %c0_47, %c0_48] : memref<1x4x8x8xf32, #tpu.memory_space<vmem>>, vector<1x1x8x8xf32>
    %69 = vector.shape_cast %68 : vector<1x1x8x8xf32> to vector<8x8xf32>
    %70 = vector.shape_cast %67 : vector<8x8xf32> to vector<1x1x8x8xf32>
    tpu.vector_store %arg19[%c0_46, %c1, %c0_47, %c0_48], %70 {strides = array<i32>} : memref<1x4x8x8xf32, #tpu.memory_space<vmem>>, vector<1x1x8x8xf32>,
    %cst_49 = arith.constant dense<0.000000e+00> : vector<8x8xf32>
    %71 = tpu.matmul %67, %50, %cst_49 {dimension_numbers = #tpu.dot_dimension_numbers<[1], [0], [0], [1], [0, 0, 1, 1], [], []>} : vector<8x8xf32>, vector<8x8xf32>, vector<8x8xf32> -> vector<8x8xf32>
    %c0_50 = arith.constant 0 : index
    %c8 = arith.constant 8 : index
    %72 = vector.load %arg20[%c0_50, %c8] : memref<8x32xf32, #tpu.memory_space<vmem>>, vector<8x8xf32>
    tpu.vector_store %arg20[%c0_50, %c8], %71 {strides = array<i32>} : memref<8x32xf32, #tpu.memory_space<vmem>>, vector<8x8xf32>,
    %73 = vector.extract_strided_slice %14 {offsets = [0, 16], sizes = [8, 8], strides = [1, 1]} : vector<8x32xf32> to vector<8x8xf32>
    %74 = vector.extract_strided_slice %18 {offsets = [0, 16], sizes = [8, 8], strides = [1, 1]} : vector<8x32xf32> to vector<8x8xf32>
    %75 = vector.extract_strided_slice %22 {offsets = [0, 16], sizes = [8, 8], strides = [1, 1]} : vector<8x32xf32> to vector<8x8xf32>
    %cst_51 = arith.constant dense<0.000000e+00> : vector<8x8xf32>
    %76 = tpu.matmul %73, %74, %cst_51 {dimension_numbers = #tpu.dot_dimension_numbers<[1], [1], [0], [0], [0, 0, 1, 0], [], []>} : vector<8x8xf32>, vector<8x8xf32>, vector<8x8xf32> -> vector<8x8xf32>
    %cst_52 = arith.constant 0.353553385 : f32
    %77 = vector.broadcast %cst_52 : f32 to vector<8x8xf32>
    %78 = arith.mulf %76, %77 : vector<8x8xf32>
    %cst_53 = arith.constant dense<0xFF800000> : vector<8xf32>
    %79 = vector.multi_reduction <maximumf>, %78, %cst_53 [1] : vector<8x8xf32> to vector<8xf32>
    %80 = vector.shape_cast %79 : vector<8xf32> to vector<8x1xf32>
    %81 = vector.broadcast %80 : vector<8x1xf32> to vector<8x8xf32>
    %82 = arith.subf %78, %81 : vector<8x8xf32>
    %83 = math.exp %82 : vector<8x8xf32>
    %cst_54 = arith.constant dense<0.000000e+00> : vector<8xf32>
    %84 = vector.multi_reduction <add>, %83, %cst_54 [1] : vector<8x8xf32> to vector<8xf32>
    %85 = vector.shape_cast %84 : vector<8xf32> to vector<8x1xf32>
    %86 = tpu.reciprocal %85 {approx = true} : vector<8x1xf32> -> vector<8x1xf32>
    %87 = arith.mulf %85, %86 : vector<8x1xf32>
    %cst_55 = arith.constant 2.000000e+00 : f32
    %88 = vector.broadcast %cst_55 : f32 to vector<8x1xf32>
    %89 = arith.subf %88, %87 : vector<8x1xf32>
    %90 = arith.mulf %86, %89 : vector<8x1xf32>
    %91 = vector.broadcast %90 : vector<8x1xf32> to vector<8x8xf32>
    %92 = arith.mulf %83, %91 : vector<8x8xf32>
    %c0_56 = arith.constant 0 : index
    %c2 = arith.constant 2 : index
    %c0_57 = arith.constant 0 : index
    %c0_58 = arith.constant 0 : index
    %93 = vector.load %arg19[%c0_56, %c2, %c0_57, %c0_58] : memref<1x4x8x8xf32, #tpu.memory_space<vmem>>, vector<1x1x8x8xf32>
    %94 = vector.shape_cast %93 : vector<1x1x8x8xf32> to vector<8x8xf32>
    %95 = vector.shape_cast %92 : vector<8x8xf32> to vector<1x1x8x8xf32>
    tpu.vector_store %arg19[%c0_56, %c2, %c0_57, %c0_58], %95 {strides = array<i32>} : memref<1x4x8x8xf32, #tpu.memory_space<vmem>>, vector<1x1x8x8xf32>,
    %cst_59 = arith.constant dense<0.000000e+00> : vector<8x8xf32>
    %96 = tpu.matmul %92, %75, %cst_59 {dimension_numbers = #tpu.dot_dimension_numbers<[1], [0], [0], [1], [0, 0, 1, 1], [], []>} : vector<8x8xf32>, vector<8x8xf32>, vector<8x8xf32> -> vector<8x8xf32>
    %c0_60 = arith.constant 0 : index
    %c16 = arith.constant 16 : index
    %97 = vector.load %arg20[%c0_60, %c16] : memref<8x32xf32, #tpu.memory_space<vmem>>, vector<8x8xf32>
    tpu.vector_store %arg20[%c0_60, %c16], %96 {strides = array<i32>} : memref<8x32xf32, #tpu.memory_space<vmem>>, vector<8x8xf32>,
    %98 = vector.extract_strided_slice %14 {offsets = [0, 24], sizes = [8, 8], strides = [1, 1]} : vector<8x32xf32> to vector<8x8xf32>
    %99 = vector.extract_strided_slice %18 {offsets = [0, 24], sizes = [8, 8], strides = [1, 1]} : vector<8x32xf32> to vector<8x8xf32>
    %100 = vector.extract_strided_slice %22 {offsets = [0, 24], sizes = [8, 8], strides = [1, 1]} : vector<8x32xf32> to vector<8x8xf32>
    %cst_61 = arith.constant dense<0.000000e+00> : vector<8x8xf32>
    %101 = tpu.matmul %98, %99, %cst_61 {dimension_numbers = #tpu.dot_dimension_numbers<[1], [1], [0], [0], [0, 0, 1, 0], [], []>} : vector<8x8xf32>, vector<8x8xf32>, vector<8x8xf32> -> vector<8x8xf32>
    %cst_62 = arith.constant 0.353553385 : f32
    %102 = vector.broadcast %cst_62 : f32 to vector<8x8xf32>
    %103 = arith.mulf %101, %102 : vector<8x8xf32>
    %cst_63 = arith.constant dense<0xFF800000> : vector<8xf32>
    %104 = vector.multi_reduction <maximumf>, %103, %cst_63 [1] : vector<8x8xf32> to vector<8xf32>
    %105 = vector.shape_cast %104 : vector<8xf32> to vector<8x1xf32>
    %106 = vector.broadcast %105 : vector<8x1xf32> to vector<8x8xf32>
    %107 = arith.subf %103, %106 : vector<8x8xf32>
    %108 = math.exp %107 : vector<8x8xf32>
    %cst_64 = arith.constant dense<0.000000e+00> : vector<8xf32>
    %109 = vector.multi_reduction <add>, %108, %cst_64 [1] : vector<8x8xf32> to vector<8xf32>
    %110 = vector.shape_cast %109 : vector<8xf32> to vector<8x1xf32>
    %111 = tpu.reciprocal %110 {approx = true} : vector<8x1xf32> -> vector<8x1xf32>
    %112 = arith.mulf %110, %111 : vector<8x1xf32>
    %cst_65 = arith.constant 2.000000e+00 : f32
    %113 = vector.broadcast %cst_65 : f32 to vector<8x1xf32>
    %114 = arith.subf %113, %112 : vector<8x1xf32>
    %115 = arith.mulf %111, %114 : vector<8x1xf32>
    %116 = vector.broadcast %115 : vector<8x1xf32> to vector<8x8xf32>
    %117 = arith.mulf %108, %116 : vector<8x8xf32>
    %c0_66 = arith.constant 0 : index
    %c3 = arith.constant 3 : index
    %c0_67 = arith.constant 0 : index
    %c0_68 = arith.constant 0 : index
    %118 = vector.load %arg19[%c0_66, %c3, %c0_67, %c0_68] : memref<1x4x8x8xf32, #tpu.memory_space<vmem>>, vector<1x1x8x8xf32>
    %119 = vector.shape_cast %118 : vector<1x1x8x8xf32> to vector<8x8xf32>
    %120 = vector.shape_cast %117 : vector<8x8xf32> to vector<1x1x8x8xf32>
    tpu.vector_store %arg19[%c0_66, %c3, %c0_67, %c0_68], %120 {strides = array<i32>} : memref<1x4x8x8xf32, #tpu.memory_space<vmem>>, vector<1x1x8x8xf32>,
    %cst_69 = arith.constant dense<0.000000e+00> : vector<8x8xf32>
    %121 = tpu.matmul %117, %100, %cst_69 {dimension_numbers = #tpu.dot_dimension_numbers<[1], [0], [0], [1], [0, 0, 1, 1], [], []>} : vector<8x8xf32>, vector<8x8xf32>, vector<8x8xf32> -> vector<8x8xf32>
    %c0_70 = arith.constant 0 : index
    %c24 = arith.constant 24 : index
    %122 = vector.load %arg20[%c0_70, %c24] : memref<8x32xf32, #tpu.memory_space<vmem>>, vector<8x8xf32>
    tpu.vector_store %arg20[%c0_70, %c24], %121 {strides = array<i32>} : memref<8x32xf32, #tpu.memory_space<vmem>>, vector<8x8xf32>,
    %c0_71 = arith.constant 0 : index
    %c0_72 = arith.constant 0 : index
    %123 = vector.load %arg20[%c0_71, %c0_72] : memref<8x32xf32, #tpu.memory_space<vmem>>, vector<8x32xf32>
    %c0_73 = arith.constant 0 : index
    %c0_74 = arith.constant 0 : index
    %124 = vector.load %arg8[%c0_73, %c0_74] : memref<32x32xf32, #tpu.memory_space<vmem>>, vector<32x32xf32>
    %cst_75 = arith.constant dense<0.000000e+00> : vector<8x32xf32>
    %125 = tpu.matmul %123, %124, %cst_75 {dimension_numbers = #tpu.dot_dimension_numbers<[1], [0], [0], [1], [0, 0, 1, 1], [], []>} : vector<8x32xf32>, vector<32x32xf32>, vector<8x32xf32> -> vector<8x32xf32>
    %126 = vector.broadcast %4 : vector<1x32xf32> to vector<8x32xf32>
    %127 = arith.addf %125, %126 : vector<8x32xf32>
    %128 = arith.addf %0, %127 : vector<8x32xf32>
    %cst_76 = arith.constant dense<0.000000e+00> : vector<8xf32>
    %129 = vector.multi_reduction <add>, %128, %cst_76 [1] : vector<8x32xf32> to vector<8xf32>
    %130 = vector.shape_cast %129 : vector<8xf32> to vector<8x1xf32>
    %cst_77 = arith.constant 3.200000e+01 : f32
    %131 = vector.broadcast %cst_77 : f32 to vector<8x1xf32>
    %132 = arith.divf %130, %131 : vector<8x1xf32>
    %133 = vector.broadcast %132 : vector<8x1xf32> to vector<8x32xf32>
    %134 = arith.subf %128, %133 : vector<8x32xf32>
    %135 = arith.mulf %134, %134 : vector<8x32xf32>
    %cst_78 = arith.constant dense<0.000000e+00> : vector<8xf32>
    %136 = vector.multi_reduction <add>, %135, %cst_78 [1] : vector<8x32xf32> to vector<8xf32>
    %137 = vector.shape_cast %136 : vector<8xf32> to vector<8x1xf32>
    %cst_79 = arith.constant 3.200000e+01 : f32
    %138 = vector.broadcast %cst_79 : f32 to vector<8x1xf32>
    %139 = arith.divf %137, %138 : vector<8x1xf32>
    %140 = vector.broadcast %132 : vector<8x1xf32> to vector<8x32xf32>
    %141 = arith.subf %128, %140 : vector<8x32xf32>
    %cst_80 = arith.constant 9.99999974E-6 : f32
    %142 = vector.broadcast %cst_80 : f32 to vector<8x1xf32>
    %143 = arith.addf %139, %142 : vector<8x1xf32>
    %144 = math.rsqrt %143 : vector<8x1xf32>
    %145 = vector.broadcast %144 : vector<8x1xf32> to vector<8x32xf32>
    %146 = arith.mulf %141, %145 : vector<8x32xf32>
    %147 = vector.broadcast %5 : vector<1x32xf32> to vector<8x32xf32>
    %148 = arith.mulf %146, %147 : vector<8x32xf32>
    %149 = vector.broadcast %6 : vector<1x32xf32> to vector<8x32xf32>
    %150 = arith.addf %148, %149 : vector<8x32xf32>
    %c0_81 = arith.constant 0 : index
    %c0_82 = arith.constant 0 : index
    %151 = vector.load %arg12[%c0_81, %c0_82] : memref<32x64xf32, #tpu.memory_space<vmem>>, vector<32x64xf32>
    %cst_83 = arith.constant dense<0.000000e+00> : vector<8x64xf32>
    %152 = tpu.matmul %150, %151, %cst_83 {dimension_numbers = #tpu.dot_dimension_numbers<[1], [0], [0], [1], [0, 0, 1, 1], [], []>} : vector<8x32xf32>, vector<32x64xf32>, vector<8x64xf32> -> vector<8x64xf32>
    %153 = vector.broadcast %9 : vector<1x64xf32> to vector<8x64xf32>
    %154 = arith.addf %152, %153 : vector<8x64xf32>
    %cst_84 = arith.constant 5.000000e-01 : f32
    %155 = vector.broadcast %cst_84 : f32 to vector<8x64xf32>
    %156 = arith.mulf %155, %154 : vector<8x64xf32>
    %cst_85 = arith.constant 0.707106769 : f32
    %157 = vector.broadcast %cst_85 : f32 to vector<8x64xf32>
    %158 = arith.mulf %154, %157 : vector<8x64xf32>
    %159 = math.erf %158 : vector<8x64xf32>
    %cst_86 = arith.constant 1.000000e+00 : f32
    %160 = vector.broadcast %cst_86 : f32 to vector<8x64xf32>
    %161 = arith.addf %160, %159 : vector<8x64xf32>
    %162 = arith.mulf %156, %161 : vector<8x64xf32>
    %c0_87 = arith.constant 0 : index
    %c0_88 = arith.constant 0 : index
    %163 = vector.load %arg14[%c0_87, %c0_88] : memref<64x32xf32, #tpu.memory_space<vmem>>, vector<64x32xf32>
    %cst_89 = arith.constant dense<0.000000e+00> : vector<8x32xf32>
    %164 = tpu.matmul %162, %163, %cst_89 {dimension_numbers = #tpu.dot_dimension_numbers<[1], [0], [0], [1], [0, 0, 1, 1], [], []>} : vector<8x64xf32>, vector<64x32xf32>, vector<8x32xf32> -> vector<8x32xf32>
    %165 = vector.broadcast %10 : vector<1x32xf32> to vector<8x32xf32>
    %166 = arith.addf %164, %165 : vector<8x32xf32>
    %167 = arith.addf %150, %166 : vector<8x32xf32>
    %cst_90 = arith.constant dense<0.000000e+00> : vector<8xf32>
    %168 = vector.multi_reduction <add>, %167, %cst_90 [1] : vector<8x32xf32> to vector<8xf32>
    %169 = vector.shape_cast %168 : vector<8xf32> to vector<8x1xf32>
    %cst_91 = arith.constant 3.200000e+01 : f32
    %170 = vector.broadcast %cst_91 : f32 to vector<8x1xf32>
    %171 = arith.divf %169, %170 : vector<8x1xf32>
    %172 = vector.broadcast %171 : vector<8x1xf32> to vector<8x32xf32>
    %173 = arith.subf %167, %172 : vector<8x32xf32>
    %174 = arith.mulf %173, %173 : vector<8x32xf32>
    %cst_92 = arith.constant dense<0.000000e+00> : vector<8xf32>
    %175 = vector.multi_reduction <add>, %174, %cst_92 [1] : vector<8x32xf32> to vector<8xf32>
    %176 = vector.shape_cast %175 : vector<8xf32> to vector<8x1xf32>
    %cst_93 = arith.constant 3.200000e+01 : f32
    %177 = vector.broadcast %cst_93 : f32 to vector<8x1xf32>
    %178 = arith.divf %176, %177 : vector<8x1xf32>
    %179 = vector.broadcast %171 : vector<8x1xf32> to vector<8x32xf32>
    %180 = arith.subf %167, %179 : vector<8x32xf32>
    %cst_94 = arith.constant 9.99999974E-6 : f32
    %181 = vector.broadcast %cst_94 : f32 to vector<8x1xf32>
    %182 = arith.addf %178, %181 : vector<8x1xf32>
    %183 = math.rsqrt %182 : vector<8x1xf32>
    %184 = vector.broadcast %183 : vector<8x1xf32> to vector<8x32xf32>
    %185 = arith.mulf %180, %184 : vector<8x32xf32>
    %186 = vector.broadcast %7 : vector<1x32xf32> to vector<8x32xf32>
    %187 = arith.mulf %185, %186 : vector<8x32xf32>
    %188 = vector.broadcast %8 : vector<1x32xf32> to vector<8x32xf32>
    %189 = arith.addf %187, %188 : vector<8x32xf32>
    %c0_95 = arith.constant 0 : index
    %c0_96 = arith.constant 0 : index
    %190 = vector.load %arg18[%c0_95, %c0_96] : memref<8x32xf32, #tpu.memory_space<vmem>>, vector<8x32xf32>
    tpu.vector_store %arg18[%c0_95, %c0_96], %189 {strides = array<i32>} : memref<8x32xf32, #tpu.memory_space<vmem>>, vector<8x32xf32>,
    return
  }
  func.func @transform_0(%arg0: i32) -> (i32, i32) {
    %c0_i32 = arith.constant 0 : i32
    %c0_i32_0 = arith.constant 0 : i32
    return %arg0, %c0_i32 : i32, i32
  }
  func.func @transform_1(%arg0: i32) -> (i32, i32) {
    %c0_i32 = arith.constant 0 : i32
    %c0_i32_0 = arith.constant 0 : i32
    %c0_i32_1 = arith.constant 0 : i32
    return %c0_i32, %c0_i32_0 : i32, i32
  }
  func.func @transform_2(%arg0: i32) -> (i32, i32) {
    %c0_i32 = arith.constant 0 : i32
    %c0_i32_0 = arith.constant 0 : i32
    %c0_i32_1 = arith.constant 0 : i32
    return %c0_i32, %c0_i32_0 : i32, i32
  }
  func.func @transform_3(%arg0: i32) -> (i32, i32) {
    %c0_i32 = arith.constant 0 : i32
    %c0_i32_0 = arith.constant 0 : i32
    %c0_i32_1 = arith.constant 0 : i32
    return %c0_i32, %c0_i32_0 : i32, i32
  }
  func.func @transform_4(%arg0: i32) -> (i32, i32) {
    %c0_i32 = arith.constant 0 : i32
    %c0_i32_0 = arith.constant 0 : i32
    %c0_i32_1 = arith.constant 0 : i32
    return %c0_i32, %c0_i32_0 : i32, i32
  }
  func.func @transform_5(%arg0: i32) -> (i32, i32) {
    %c0_i32 = arith.constant 0 : i32
    %c0_i32_0 = arith.constant 0 : i32
    %c0_i32_1 = arith.constant 0 : i32
    return %c0_i32, %c0_i32_0 : i32, i32
  }
  func.func @transform_6(%arg0: i32) -> (i32, i32) {
    %c0_i32 = arith.constant 0 : i32
    %c0_i32_0 = arith.constant 0 : i32
    %c0_i32_1 = arith.constant 0 : i32
    return %c0_i32, %c0_i32_0 : i32, i32
  }
  func.func @transform_7(%arg0: i32) -> (i32, i32) {
    %c0_i32 = arith.constant 0 : i32
    %c0_i32_0 = arith.constant 0 : i32
    %c0_i32_1 = arith.constant 0 : i32
    return %c0_i32, %c0_i32_0 : i32, i32
  }
  func.func @transform_8(%arg0: i32) -> (i32, i32) {
    %c0_i32 = arith.constant 0 : i32
    %c0_i32_0 = arith.constant 0 : i32
    %c0_i32_1 = arith.constant 0 : i32
    return %c0_i32, %c0_i32_0 : i32, i32
  }
  func.func @transform_9(%arg0: i32) -> (i32, i32) {
    %c0_i32 = arith.constant 0 : i32
    %c0_i32_0 = arith.constant 0 : i32
    %c0_i32_1 = arith.constant 0 : i32
    return %c0_i32, %c0_i32_0 : i32, i32
  }
  func.func @transform_10(%arg0: i32) -> (i32, i32) {
    %c0_i32 = arith.constant 0 : i32
    %c0_i32_0 = arith.constant 0 : i32
    %c0_i32_1 = arith.constant 0 : i32
    return %c0_i32, %c0_i32_0 : i32, i32
  }
  func.func @transform_11(%arg0: i32) -> (i32, i32) {
    %c0_i32 = arith.constant 0 : i32
    %c0_i32_0 = arith.constant 0 : i32
    %c0_i32_1 = arith.constant 0 : i32
    return %c0_i32, %c0_i32_0 : i32, i32
  }
  func.func @transform_12(%arg0: i32) -> (i32, i32) {
    %c0_i32 = arith.constant 0 : i32
    %c0_i32_0 = arith.constant 0 : i32
    %c0_i32_1 = arith.constant 0 : i32
    return %c0_i32, %c0_i32_0 : i32, i32
  }
  func.func @transform_13(%arg0: i32) -> (i32, i32) {
    %c0_i32 = arith.constant 0 : i32
    %c0_i32_0 = arith.constant 0 : i32
    %c0_i32_1 = arith.constant 0 : i32
    return %c0_i32, %c0_i32_0 : i32, i32
  }
  func.func @transform_14(%arg0: i32) -> (i32, i32) {
    %c0_i32 = arith.constant 0 : i32
    %c0_i32_0 = arith.constant 0 : i32
    %c0_i32_1 = arith.constant 0 : i32
    return %c0_i32, %c0_i32_0 : i32, i32
  }
  func.func @transform_15(%arg0: i32) -> (i32, i32) {
    %c0_i32 = arith.constant 0 : i32
    %c0_i32_0 = arith.constant 0 : i32
    %c0_i32_1 = arith.constant 0 : i32
    return %c0_i32, %c0_i32_0 : i32, i32
  }
  func.func @transform_16(%arg0: i32) -> (i32, i32) {
    %c0_i32 = arith.constant 0 : i32
    %c0_i32_0 = arith.constant 0 : i32
    %c0_i32_1 = arith.constant 0 : i32
    return %c0_i32, %c0_i32_0 : i32, i32
  }
  func.func @transform_17(%arg0: i32) -> (i32, i32) {
    %c0_i32 = arith.constant 0 : i32
    %c0_i32_0 = arith.constant 0 : i32
    return %arg0, %c0_i32 : i32, i32
  }
  func.func @transform_18(%arg0: i32) -> (i32, i32, i32, i32) {
    %c0_i32 = arith.constant 0 : i32
    %c0_i32_0 = arith.constant 0 : i32
    %c0_i32_1 = arith.constant 0 : i32
    %c0_i32_2 = arith.constant 0 : i32
    return %arg0, %c0_i32, %c0_i32_0, %c0_i32_1 : i32, i32, i32, i32
  }
}

</mosaic_0001>

<bundles_post_ra>
// kernel: tpu_custom_call.1
= control target key start
LH: loop header
LB: loop body
LE: loop exit
PB: predicated region body
PF: predicated region fallthrough
CT: control target
= control target key end

     0   :  { %s3196_s0 = inlined_call_operand.hbm [shape: f32[16,32], index: 0, kind: input, shape index: {}]   ;;  %s3197_s1 = inlined_call_operand.vmem [shape: f32[32,32], index: 1, kind: input, shape index: {}]   ;;  %s3198_s2 = inlined_call_operand.vmem [shape: f32[1,32], index: 2, kind: input, shape index: {}]   ;;  %s3199_s3 = inlined_call_operand.vmem [shape: f32[32,32], index: 3, kind: input, shape index: {}]   ;;  %s3200_s4 = inlined_call_operand.vmem [shape: f32[1,32], index: 4, kind: input, shape index: {}]   ;;  %s3201_s5 = inlined_call_operand.vmem [shape: f32[32,32], index: 5, kind: input, shape index: {}]   ;;  %s3202_s6 = inlined_call_operand.vmem [shape: f32[1,32], index: 6, kind: input, shape index: {}]   ;;  %s3203_s7 = inlined_call_operand.hbm [shape: f32[32,32], index: 7, kind: input, shape index: {}]   ;;  %s3204_s8 = inlined_call_operand.vmem [shape: f32[1,32], index: 8, kind: input, shape index: {}]   ;;  %s3205_s9 = inlined_call_operand.vmem [shape: f32[1,32], index: 9, kind: input, shape index: {}]   ;;  %s3206_s10 = inlined_call_operand.vmem [shape: f32[1,32], index: 10, kind: input, shape index: {}]   ;;  %s3207_s11 = inlined_call_operand.hbm [shape: f32[32,64], index: 11, kind: input, shape index: {}]   ;;  %s3208_s12 = inlined_call_operand.vmem [shape: f32[1,64], index: 12, kind: input, shape index: {}]   ;;  %s3209_s13 = inlined_call_operand.vmem [shape: f32[64,32], index: 13, kind: input, shape index: {}]   ;;  %s3210_s14 = inlined_call_operand.vmem [shape: f32[1,32], index: 14, kind: input, shape index: {}]   ;;  %s3211_s15 = inlined_call_operand.vmem [shape: f32[1,32], index: 15, kind: input, shape index: {}]   ;;  %s3212_s16 = inlined_call_operand.vmem [shape: f32[1,32], index: 16, kind: input, shape index: {}]   ;;  %s3213_s17 = inlined_call_operand.hbm [shape: f32[16,32], index: 17, kind: output, shape index: {0}]   ;;  %s3214_s18 = inlined_call_operand.hbm [shape: f32[2,4,8,8], index: 18, kind: output, shape index: {1}]  }
   0x1   :  { %3227 = sst [smem:[#allocation18_spill]] %s3196_s0 }
   0x2   :  { %3228 = sst [smem:[#allocation19_spill]] %s3197_s1 }
   0x3   :  { %3229 = sst [smem:[#allocation20_spill]] %s3198_s2 }
   0x4   :  { %3230 = sst [smem:[#allocation21_spill]] %s3199_s3 }
   0x5   :  { %3231 = sst [smem:[#allocation22_spill]] %s3200_s4 }
   0x6   :  { %3232 = sst [smem:[#allocation23_spill]] %s3201_s5 }
   0x7   :  { %3233 = sst [smem:[#allocation24_spill]] %s3203_s7 }
   0x8   :  { %3234 = sst [smem:[#allocation25_spill]] %s3210_s14 }
   0x9   :  { %3235 = sst [smem:[#allocation26_spill]] %s3211_s15 }
   0xa   :  { %3236 = sst [smem:[#allocation27_spill]] %s3212_s16 }
   0xb   :  { %3237 = sst [smem:[#allocation28_spill]] %s3213_s17 }
   0xc   :  { %3238 = sst [smem:[#allocation29_spill]] %s3214_s18 }
   0xd   :  { %24 = vsyncpa [#allocation4], 0 }
   0xe   :  { %26 = vsyncpa [#allocation4 + $0x1], 0 }
   0xf   :  { %27 = vsyncpa [#allocation7], 0 }
  0x10   :  { %28 = vsyncpa [#allocation5], 0 }
  0x11   :  { %30 = vsyncpa [#allocation5 + $0x1], 0 }
  0x12   :  { %31 = vsyncpa [#allocation11], 0 }
  0x13   :  { %33 = vsyncpa [#allocation11 + $0x1], 0  ;;  %s2725_s27 = smov 0   ;;  %s2727_s28 = smov 0  }
  0x14   :  { %s2729_s29 = smov 0   ;;  %s2731_s30 = smov 0  }
  0x15 LB: > { %3239 = sst [smem:[#allocation16_spill]] %s2599_s27  ;;  %s2746_s0 = sadd.s32 4294967295, %s2611_s30   ;;  %s2611_s30 = sphi %s2731_s30, %s3274_s30   ;;  %s2607_s29 = sphi %s2729_s29, %s3273_s29   ;;  %s2603_s28 = sphi %s2727_s28, %s3272_s28   ;;  %s2599_s27 = sphi %s2725_s27, %s3271_s27  }
  0x16   : > { %s2059_s19 = sadd.s32 4294967294, %s2611_s30   ;;  %p59_p0 = scmp.ne.s32.totalorder %s2603_s28, %s2599_s27 }
  0x17   : > { %p3220_p1 = scmp.eq.s32.totalorder %s2746_s0, 0  ;;  %p425_p3 = scmp.eq.s32.totalorder %s2059_s19, 1 }
  0x18   : > { %p2060_p5 = scmp.ge.s32.totalorder %s2611_s30, 1  ;;  %p458_p7 = scmp.lt.s32.totalorder %s2611_s30, 3 }
  0x19   : > { %p2755_p4 = por %p3220_p1, %p59_p0  ;;  %p2760_p6 = por %p425_p3, %p59_p0 }
  0x1a   : > { %p2765_p8 = pnand %p2060_p5, %p458_p7  ;;  %s2613_s22 = smov [#allocation6]  }
  0x1b   : > { %s3240_s1 = scalar_select %p2755_p4, 1, 0 }
  0x1c   : > { %s3241_s20 = scalar_select %p2760_p6, 1, 0 }
  0x1d   : > { %s488_s2 = sshll.u32 %s2613_s22, 4  ;;  %p2331_p9 = pneg %p2765_p8  ;;  %s2769_s2 = int_to_ptr.vmem [resolvable:$true] %s488_s2 }
  0x1e   : > { %3242 = sst [smem:[#allocation17_spill]] %s3241_s20  ;;  %s2614_s24 = smov [#allocation8]  }
  0x1f   : > { %p2776_p11 = pnand %p2331_p9, %p3220_p1  ;;  %s510_s25 = sshll.u32 %s2614_s24, 4  ;;  %s2780_s25 = int_to_ptr.vmem [resolvable:$true] %s510_s25 }
  0x20   : > { %s3245_s7 = sld [smem:[#allocation24_spill]] }
  0x21   : > { %p2425_p13 = pneg %p2776_p11 }
  0x26   : > { %s2423_s22 = scalar_lea.hbm %s3245_s7, 512 }
  0x27   : > { %p2424_p12 = scmp.ne.s32.totalorder %s3245_s7, %s2423_s22  ;;  %p2430_p5 = scmp.lt.u32.totalorder %s2423_s22, %s3245_s7 }
  0x29   : > { %p2426_p0 = pnand %p2425_p13, %p2424_p12 }
  0x2b   : > { %p2427_p3 = pneg %p2426_p0 }
  0x2d   : > { %p2432_p7 = pnand %p2430_p5, %p2427_p3 }
  0x2f   : > { %2435 = shalt.err (!%p2432_p7)
}
  0x30   : > { %s2436_s24 = scalar_lea.vmem %s2769_s2, 512  ;;  %p2444_p2 = scmp.lt.s32.totalorder %s2769_s2, %s2769_s2 }
  0x31   : > { %p2437_p9 = scmp.ne.s32.totalorder %s2769_s2, %s2436_s24  ;;  %p2445_p12 = scmp.lt.s32.totalorder %s2436_s24, %s2436_s24 }
  0x33   : > { %p2439_p10 = pnand %p2437_p9, %p2425_p13  ;;  %p2446_p0 = por %p2445_p12, %p2444_p2 }
  0x35   : > { %p2440_p1 = pneg %p2439_p10 }
  0x37   : > { %p2447_p6 = pnand %p2446_p0, %p2440_p1 }
  0x39   : > { %2450 = shalt.err (!%p2447_p6)
}
  0x3a   : > { %s2615_s16 = smov 128   ;;  %s2616_s17 = smov 8  }
  0x3b   : > { %2334 = dma.hbm_to_vmem [thread:$0]  (!%p2776_p11), %s3245_s7, 512, %s2769_s2, [#allocation7], %s2615_s16, %s2615_s16, %s2616_s17  }
  0x3c   : > { %s2451_s22 = scalar_lea.hbm %s3207_s11, 512 }
  0x3d   : > { %p2452_p2 = scmp.ne.s32.totalorder %s3207_s11, %s2451_s22  ;;  %p2458_p10 = scmp.lt.u32.totalorder %s2451_s22, %s3207_s11 }
  0x3f   : > { %p2454_p1 = pnand %p2452_p2, %p2425_p13 }
  0x41   : > { %p2455_p6 = pneg %p2454_p1 }
  0x43   : > { %p2460_p3 = pnand %p2458_p10, %p2455_p6 }
  0x45   : > { %2463 = shalt.err (!%p2460_p3)
}
  0x46   : > { %s2464_s2 = scalar_lea.vmem %s2780_s25, 512  ;;  %p2472_p12 = scmp.lt.s32.totalorder %s2780_s25, %s2780_s25 }
  0x47   : > { %p2465_p5 = scmp.ne.s32.totalorder %s2780_s25, %s2464_s2  ;;  %p2473_p0 = scmp.lt.s32.totalorder %s2464_s2, %s2464_s2 }
  0x49   : > { %p2467_p7 = pnand %p2465_p5, %p2425_p13  ;;  %p2474_p2 = por %p2473_p0, %p2472_p12 }
  0x4b   : > { %p2468_p9 = pneg %p2467_p7 }
  0x4d   : > { %p2475_p1 = pnand %p2474_p2, %p2468_p9 }
  0x4f   : > { %2478 = shalt.err (!%p2475_p1)
}
  0x50   : > { %2337 = dma.hbm_to_vmem [thread:$0]  (!%p2776_p11), %s3207_s11, 512, %s2780_s25, [#allocation7], %s2615_s16, %s2615_s16, %s2616_s17  }
  0x51   : > { %s2835_s18 = sadd.s32 1, %s2611_s30   ;;  %s46_s23 = sadd.s32 1, %s2607_s29 }
  0x52   : > { %s43_s27 = ssub.s32 %s2611_s30, %s2835_s18  ;;  %p53_p13 = scmp.ne.s32.totalorder %s2607_s29, %s2603_s28 }
  0x53   : > { %p44_p6 = scmp.eq.s32.totalorder %s43_s27, 0  ;;  %p54_p10 = scmp.eq.s32.totalorder %s2611_s30, 0 }
  0x54   : > { %p3246_p3 = scmp.eq.s32.totalorder %s2746_s0, 1  ;;  %p2351_p7 = scmp.lt.s32.totalorder %s2611_s30, 2 }
  0x55   : > { %s2851_s26 = scalar_select %p44_p6, %s2607_s29, %s46_s23  }
  0x56   : > { %p2845_p5 = por %p3246_p3, %p53_p13  ;;  %p55_p9 = por %p54_p10, %p53_p13 }
  0x57   : > { %s539_s19 = sand.u32 1, %s2607_s29   ;;  %s2065_s25 = sshll.u32 %s2611_s30, 7 }
  0x58   : > { %s3247_s20 = scalar_select %p2845_p5, 1, 0 }
  0x59   : > { %s2064_s22 = sshll.u32 %s539_s19, 3  ;;  %s3248_s24 = sld [smem:[#allocation18_spill]] }
  0x5a   : > { %s543_s14 = scalar_lea.vmem [#allocation3], %s2064_s22  ;;  %p2862_p11 = pnand %p2351_p7, %p55_p9 }
  0x5b   : > { %s550_s15 = sshll.u32 %s543_s14, 4  ;;  %s540_s27 = scalar_lea.sflag [#allocation4], %s539_s19  ;;  %s2860_s15 = int_to_ptr.vmem [resolvable:$true] %s550_s15 }
  0x5c   : > { %p2481_p0 = pneg %p2862_p11 }
  0x5f   : > { %s2858_s2 = scalar_lea.hbm %s3248_s24, %s2065_s25  ;;  %s2484_s16 = scalar_lea.hbm %s3248_s24, 256 }
  0x60   : > { %s2479_s7 = scalar_lea.hbm %s2858_s2, 128  ;;  %p2485_p13 = scmp.lt.u32.totalorder %s2858_s2, %s3248_s24 }
  0x61   : > { %p2480_p12 = scmp.ne.s32.totalorder %s2858_s2, %s2479_s7  ;;  %p2486_p6 = scmp.lt.u32.totalorder %s2484_s16, %s2479_s7 }
  0x62   : > { %p2488_p3 = scmp.lt.u32.totalorder %s2479_s7, %s2858_s2 }
  0x63   : > { %p2482_p2 = pnand %p2481_p0, %p2480_p12  ;;  %p2487_p10 = por %p2486_p6, %p2485_p13 }
  0x65   : > { %p2483_p1 = pneg %p2482_p2  ;;  %p2489_p7 = por %p2488_p3, %p2487_p10 }
  0x67   : > { %p2490_p9 = pnand %p2489_p7, %p2483_p1 }
  0x69   : > { %2493 = shalt.err (!%p2490_p9)
}
  0x6a   : > { %s2494_s19 = scalar_lea.vmem %s2860_s15, 128  ;;  %s2617_s25 = smov [#allocation3]  }
  0x6b   : > { %p2495_p12 = scmp.ne.s32.totalorder %s2860_s15, %s2494_s19  ;;  %s2499_s22 = sshll.u32 %s2617_s25, 4  ;;  %s2500_s22 = int_to_ptr.vmem [resolvable:$false] %s2499_s22 }
  0x6c   : > { %s2501_s17 = scalar_lea.vmem %s2500_s22, 256  ;;  %p2502_p4 = scmp.lt.s32.totalorder %s2860_s15, %s2500_s22 }
  0x6d   : > { %p2497_p2 = pnand %p2495_p12, %p2481_p0  ;;  %p2503_p13 = scmp.lt.s32.totalorder %s2501_s17, %s2494_s19 }
  0x6f   : > { %p2498_p5 = pneg %p2497_p2  ;;  %p2504_p6 = por %p2503_p13, %p2502_p4 }
  0x71   : > { %p2505_p10 = pnand %p2504_p6, %p2498_p5 }
  0x73   : > { %2508 = shalt.err (!%p2505_p10)
}
  0x74   : > { %2341 = dma.hbm_to_vmem [thread:$0]  (!%p2862_p11), %s2858_s2, 128, %s2860_s15, %s540_s27  }
  0x75   : > { %559 = sbr.rel (%p2765_p8) target bundleno = 2666 (0xa6a), region = 88  ;;  %s2894_s7 = sand.u32 (!%p2765_p8), 1, %s2603_s28  }
  0x76   : > { %s3224_s16 = sshll.u32 (!%p2765_p8), %s2894_s7, 3  ;;  %s562_s14 = scalar_lea.sflag (!%p2765_p8), [#allocation4], %s2894_s7 }
  0x77   : > { %s565_s19 = scalar_lea.vmem (!%p2765_p8), [#allocation3], %s3224_s16  ;;  %p3250_p4 = scmp.ne.s32.totalorder (!%p2765_p8), %s3240_s1, 0 }
  0x7c   : > { %2582 = dma.done.wait (%p3250_p4), %s562_s14, 128  }
  0x7d   : > { %2584 = vsyncadd (%p3250_p4), %s562_s14, 4294967168  ;;  %p3251_p5 = scmp.eq.s32.totalorder %s2746_s0, 0 }
  0x7f   : > { %2586 = dma.done.wait (%p3251_p5), [#allocation7], 1024   ;;  %p3252_p8 = pmov %p3251_p5 }
  0x80   : > { %v2618_v0 = vmov 0.0|0.0   ;;  %vm2619_vm0 = vmmov 0   ;;  %v2620_v1 = vmov 0.0   ;;  %s3253_s2 = sld [smem:[#allocation19_spill]]  ;;  %s3254_s3 = sld [smem:[#allocation21_spill]]  ;;  %v2933_v10 = vld [vmem:[%s565_s19] sm:$0xff] }
  0x81   : > { %2588 = vsyncadd (%p3252_p8), [#allocation7], 4294966272  ;;  %2275 = vmatprep.subr.bf16.mxu1 %v2618_v0  ;;  %2169 = vmatprep.mubr.msk.f32.mxu1 %vm2619_vm0, %v2620_v1  ;;  %vm652_vm1 = vcmask 261120   ;;  %s3255_s5 = sld [smem:[#allocation23_spill]]  ;;  %s3256_s4 = sld [smem:[#allocation22_spill]]  ;;  %vm886_vm2 = vcmask 64512  }
  0x82   : > { %2287 = vmatprep.subr.bf16.mxu0 %v2618_v0  ;;  %2191 = vmatprep.mubr.msk.f32.mxu0 %vm2619_vm0, %v2620_v1  ;;  %s3257_s14 = sld [smem:[#allocation20_spill]]  ;;  %s2621_s1 = smov 112   ;;  %v2076_v29 = vld [vmem:[%s3202_s6] ss:$0 sm:$0xff]  ;;  %vm1229_vm3 = vcmask 130112   ;;  %vm1406_vm4 = vcmask 195712  }
  0x83   : > { %s2622_s21 = smov 120   ;;  %s2623_s15 = smov 104   ;;  %vm1583_vm5 = vcmask 261312   ;;  %vm1800_vm6 = vcmask 523264  }
  0x84   : > { %s2071_s25 = sshll.u32 %s2894_s7, 5  ;;  %s3225_s19 = smov 8  }
  0x85   : > { %s3024_s22 = scalar_lea.vmem [#allocation10], %s2071_s25  ;;  %s2625_s17 = smov 16  }
  0x86   : > { %v642_v2 = vld [vmem:[%s3253_s2] sm:$0xff]  ;;  %v643_v3 = vld [vmem:[%s3253_s2 + $0x8] sm:$0xff]  ;;  %v644_v4 = vld [vmem:[%s3253_s2 + $0x10] sm:$0xff]  ;;  %s2110_s23 = sshll.u32 %s2746_s0, 9  ;;  %s1935_s27 = sshll.u32 %s3024_s22, 4  ;;  %s3112_s27 = int_to_ptr.vmem [resolvable:$true] %s1935_s27 }
  0x87   : > { %v2276_v5 = vpack.c.bf16 %v643_v3, %v642_v2  ;;  %v645_v6 = vld [vmem:[%s3253_s2 + $0x18] sm:$0xff]  ;;  %v726_v8 = vld [vmem:[%s3254_s3] sm:$0xff]  ;;  %v727_v9 = vld [vmem:[%s3254_s3 + $0x8] sm:$0xff]  ;;  %p3260_p0 = scmp.ne.s32.totalorder %s3247_s20, 0  ;;  %s2627_s16 = smov [#allocation10]  }
  0x88   : > { %v2279_v7 = vpack.c.bf16 %v645_v6, %v644_v4  ;;  %v2282_v11 = vpack.c.bf16 %v727_v9, %v726_v8  ;;  %v728_v12 = vld [vmem:[%s3254_s3 + $0x10] sm:$0xff]  ;;  %v729_v13 = vld [vmem:[%s3254_s3 + $0x18] sm:$0xff]  ;;  %v806_v15 = vld [vmem:[%s3255_s5] sm:$0xff] }
  0x89   : > { %2277 = vmatpush3.bf16.msra.mxu1 %v2276_v5  ;;  %v2285_v14 = vpack.c.bf16 %v729_v13, %v728_v12  ;;  %v807_v16 = vld [vmem:[%s3255_s5 + $0x8] sm:$0xff]  ;;  %v808_v17 = vld [vmem:[%s3255_s5 + $0x10] sm:$0xff]  ;;  %v809_v19 = vld [vmem:[%s3255_s5 + $0x18] sm:$0xff] }
  0x8a   : > { %2278 = vmatprep.subr.bf16.mxu1 %v2618_v0  ;;  %v2288_v18 = vpack.c.bf16 %v807_v16, %v806_v15  ;;  %v2291_v20 = vpack.c.bf16 %v809_v19, %v808_v17  ;;  %v2074_v23 = vld [vmem:[%s3256_s4] ss:$0 sm:$0xff] }
  0x8b   : > { %v2072_v27 = vld [vmem:[%s3257_s14] ss:$0 sm:$0xff]  ;;  %s2626_s14 = smov 24  }
  0x8c   : > { %2289 = vmatpush3.bf16.msra.mxu0 %v2288_v18 }
  0x8d   : > { %2280 = vmatpush3.bf16.msra.mxu1 %v2279_v7  ;;  %2290 = vmatprep.subr.bf16.mxu0 %v2618_v0 }
  0x8e   : > { %2281 = vmatprep.subr.bf16.mxu1 %v2618_v0 }
  0x90   : > { %2170 = vmatmul.mubr.msk.f32.vlgmr.msra.gmra.mrb[0].mxu1 %vm652_vm1, %v2933_v10  ;;  %2292 = vmatpush3.bf16.msra.mxu0 %v2291_v20 }
  0x91   : > { %2283 = vmatpush3.bf16.msra.mxu1 %v2282_v11  ;;  %2180 = vmatprep.mubr.msk.f32.mxu1 %vm2619_vm0, %v2620_v1 }
  0x92   : > { %2284 = vmatprep.subr.bf16.mxu1 %v2618_v0  ;;  %2204 = vmatprep.subr.mxu0 %v2620_v1 }
  0x93   : > { %2192 = vmatmul.mubr.msk.f32.vlgmr.msra.gmra.mrb[0].mxu0 %vm652_vm1, %v2933_v10 }
  0x94   : > { %2206 = vmatprep.mubr.msk.f32.mxu0 %vm2619_vm0, %v2620_v1 }
  0x95   : > { %2286 = vmatpush3.bf16.msra.mxu1 %v2285_v14 }
  0x96   : > { %2194 = vmatprep.subr.mxu1 %v2620_v1 }
  0x98   : > { %2181 = vmatmul.mubr.msk.f32.vlgmr.msra.gmra.mrb[2].mxu1 %vm652_vm1, %v2933_v10 }
  0x99   : > { %2196 = vmatprep.mubr.msk.f32.mxu1 %vm2619_vm0, %v2620_v1 }
 0x163   : > { %v722_v21 = vpop.f32.mrb[0].mxu1 }
 0x164   : > { %v2171_v22 = vpop.f32.mrb[1].mxu1  ;;  %v723_v28 = vadd.f32 %v2072_v27, %v722_v21 }
 0x166   : > { %v882_v30 = vpop.f32.mrb[0].mxu0 }
 0x167   : > { %v2990_v31 = vadd.f32 %v2076_v29, %v882_v30  ;;  %v2193_v32 = vpop.f32.mrb[1].mxu0 }
 0x16b   : > { %v802_v24 = vpop.f32.mrb[2].mxu1 }
 0x16c   : > { %v803_v25 = vadd.f32 %v2074_v23, %v802_v24  ;;  %v2182_v26 = vpop.f32.mrb[3].mxu1 }
 0x16e   : > { %1233 = vrot.lane.b32.xlu1 %v803_v25, %s2621_s1  ;;  %1055 = vrot.lane.b32.xlu0 %v803_v25, %s2622_s21 }
 0x16f   : > { %2195 = vmatpush3.xpose.msk.msra.mxu1 %vm886_vm2, %v803_v25 }
 0x170   : > { %2199 = vmatprep.subr.mxu1 %v2620_v1 }
 0x172   : > { %2197 = vmatmul.mubr.msk.f32.vlgmr.msra.gmra.mrb[4].mxu1 %vm886_vm2, %v723_v28  ;;  %1231 = vrot.lane.b32.xlu1 %v723_v28, %s2621_s1 }
 0x173   : > { %1053 = vrot.lane.b32.xlu0 %v723_v28, %s2622_s21  ;;  %2201 = vmatprep.mubr.msk.f32.mxu1 %vm2619_vm0, %v2620_v1 }
 0x174   : > { %2200 = vmatpush3.msra.mxu1 %v2990_v31 }
 0x175   : > { %2209 = vmatprep.subr.mxu1 %v2620_v1 }
 0x176   : > { %1408 = vrot.lane.b32.xlu1 %v723_v28, %s2623_s15 }
 0x177   : > { %1410 = vrot.lane.b32.xlu0 %v803_v25, %s2623_s15 }
 0x1e0   : > { %v1056_v33 = vpop.permute.xlu0 %1055  ;;  %v1234_v34 = vpop.permute.xlu1 %1233 }
 0x1e1   : > { %2205 = vmatpush3.xpose.msk.msra.mxu0 %vm886_vm2, %v1056_v33 }
 0x1e2   : > { %2214 = vmatprep.subr.mxu0 %v2620_v1 }
 0x1e4   : > { %v1232_v36 = vpop.permute.xlu1 %1231 }
 0x1e5   : > { %v1054_v35 = vpop.permute.xlu0 %1053 }
 0x1e6   : > { %2207 = vmatmul.mubr.msk.f32.vlgmr.msra.gmra.mrb[2].mxu0 %vm886_vm2, %v1054_v35 }
 0x1e7   : > { %2215 = vmatpush3.xpose.msk.msra.mxu0 %vm886_vm2, %v1234_v34  ;;  %2216 = vmatprep.mubr.msk.f32.mxu0 %vm2619_vm0, %v2620_v1 }
 0x1e8   : > { %2224 = vmatprep.subr.mxu0 %v2620_v1  ;;  %v1409_v38 = vpop.permute.xlu1 %1408 }
 0x1e9   : > { %v1411_v37 = vpop.permute.xlu0 %1410 }
 0x1ea   : > { %2217 = vmatmul.mubr.msk.f32.vlgmr.msra.gmra.mrb[4].mxu0 %vm886_vm2, %v1232_v36 }
 0x1eb   : > { %2225 = vmatpush3.xpose.msk.msra.mxu0 %vm886_vm2, %v1411_v37  ;;  %2226 = vmatprep.mubr.msk.f32.mxu0 %vm2619_vm0, %v2620_v1 }
 0x1ec   : > { %2293 = vmatprep.subr.bf16.mxu0 %v2618_v0 }
 0x1ee   : > { %2227 = vmatmul.mubr.msk.f32.vlgmr.msra.gmra.mrb[6].mxu0 %vm886_vm2, %v1409_v38 }
 0x1ef   : > { %2242 = vmatprep.mubr.msk.f32.mxu0 %vm2619_vm0, %v2620_v1 }
 0x245   : > { %v959_v39 = vpop.f32.mrb[4].mxu1 }
 0x246   : > { %v963_v40 = vmul.f32 0.35355338, %v959_v39  ;;  %v2198_v41 = vpop.f32.mrb[5].mxu1 }
 0x248   : > { %v964_v42 = vsel %vm886_vm2, %v963_v40, -inf }
 0x249   : > { %965 = vmax.xlane.f32.xlu0 %v964_v42 }
 0x2b9   : > { %v1127_v43 = vpop.f32.mrb[2].mxu0 }
 0x2ba   : > { %v1131_v44 = vmul.f32 0.35355338, %v1127_v43  ;;  %v2208_v45 = vpop.f32.mrb[3].mxu0  ;;  %v1586_v43 = vld [vmem:[#allocation6] sm:$0xff] }
 0x2bc   : > { %v1132_v46 = vsel %vm886_vm2, %v1131_v44, -inf }
 0x2bd   : > { %1133 = vmax.xlane.f32.xlu1 %v1132_v46  ;;  %v1305_v47 = vpop.f32.mrb[4].mxu0  ;;  %v1588_v46 = vld [vmem:[#allocation6 + $0x10] sm:$0xff] }
 0x2be   : > { %v1309_v48 = vmul.f32 0.35355338, %v1305_v47  ;;  %v2218_v49 = vpop.f32.mrb[5].mxu0  ;;  %v1589_v47 = vld [vmem:[#allocation6 + $0x18] sm:$0xff] }
 0x2c0   : > { %v1310_v50 = vsel %vm886_vm2, %v1309_v48, -inf }
 0x2c1   : > { %v1482_v51 = vpop.f32.mrb[6].mxu0  ;;  %1311 = vmax.xlane.f32.xlu0 %v1310_v50 }
 0x2c2   : > { %v1486_v52 = vmul.f32 0.35355338, %v1482_v51  ;;  %v2228_v53 = vpop.f32.mrb[7].mxu0 }
 0x2c4   : > { %v1487_v54 = vsel %vm886_vm2, %v1486_v52, -inf }
 0x2c5   : > { %1488 = vmax.xlane.f32.xlu0 %v1487_v54 }
 0x2d6   : > { %v966_v55 = vpop.xlane.xlu0 %965 }
 0x2d7   : > { %v967_v56 = vsub.f32 %v963_v40, %v966_v55 }
 0x2d9   : > { %v968_v57 = vmul.f32 1.442695, %v967_v56 }
 0x2db   : > { %2401 = vpow2.f32 %v968_v57 }
 0x2e5   : > { %v2402_v58 = vpop.eup %2401 }
 0x2e6   : > { %v970_v59 = vsel %vm886_vm2, %v2402_v58, 0.0 }
 0x2e7   : > { %971 = vadd.xlane.f32.xlu1 %v970_v59  ;;  %v2093_v59 = vld [vmem:[%s3204_s8] ss:$0 sm:$0xff] }
 0x2f8   : > { %1149 = vrot.lane.b32.xlu1 %v2990_v31, %s2622_s21 }
 0x34a   : > { %v1134_v60 = vpop.xlane.xlu1 %1133 }
 0x34b   : > { %v1135_v61 = vsub.f32 %v1131_v44, %v1134_v60  ;;  %v1587_v44 = vld [vmem:[#allocation6 + $0x8] sm:$0xff] }
 0x34c   : > { %v2294_v45 = vpack.c.bf16 %v1587_v44, %v1586_v43 }
 0x34d   : > { %v1136_v62 = vmul.f32 1.442695, %v1135_v61 }
 0x34e   : > { %v1312_v63 = vpop.xlane.xlu0 %1311  ;;  %2295 = vmatpush3.bf16.msra.mxu0 %v2294_v45 }
 0x34f   : > { %2403 = vpow2.f32 %v1136_v62  ;;  %v1313_v2 = vsub.f32 %v1309_v48, %v1312_v63  ;;  %v2297_v48 = vpack.c.bf16 %v1589_v47, %v1588_v46  ;;  %2296 = vmatprep.subr.bf16.mxu0 %v2618_v0 }
 0x351   : > { %v1314_v3 = vmul.f32 1.442695, %v1313_v2 }
 0x352   : > { %v1489_v4 = vpop.xlane.xlu0 %1488  ;;  %2298 = vmatpush3.bf16.msra.mxu0 %v2297_v48 }
 0x353   : > { %2405 = vpow2.f32 %v1314_v3  ;;  %v1490_v5 = vsub.f32 %v1486_v52, %v1489_v4  ;;  %2305 = vmatprep.subr.bf16.mxu0 %v2618_v0 }
 0x355   : > { %v1491_v6 = vmul.f32 1.442695, %v1490_v5 }
 0x357   : > { %2407 = vpow2.f32 %v1491_v6 }
 0x359   : > { %v2404_v7 = vpop.eup %2403 }
 0x35a   : > { %v1138_v8 = vsel %vm886_vm2, %v2404_v7, 0.0 }
 0x35b   : > { %1139 = vadd.xlane.f32.xlu0 %v1138_v8  ;;  %v1699_v8 = vld [vmem:[#allocation8 + $0x8] sm:$0xff] }
 0x35d   : > { %v2406_v9 = vpop.eup %2405 }
 0x35e   : > { %v1316_v11 = vsel %vm886_vm2, %v2406_v9, 0.0 }
 0x35f   : > { %1317 = vadd.xlane.f32.xlu1 %v1316_v11  ;;  %v1700_v11 = vld [vmem:[#allocation8 + $0x10] sm:$0xff] }
 0x361   : > { %v2408_v12 = vpop.eup %2407 }
 0x362   : > { %v1493_v13 = vsel %vm886_vm2, %v2408_v12, 0.0 }
 0x363   : > { %1494 = vadd.xlane.f32.xlu0 %v1493_v13 }
 0x370   : > { %1503 = vrot.lane.b32.xlu1 %v2990_v31, %s2623_s15  ;;  %s3258_s15 = sld [smem:[#allocation25_spill]] }
 0x374   : > { %v972_v14 = vpop.xlane.xlu1 %971 }
 0x375   : > { %2409 = vrcp.f32 %v972_v14 }
 0x378   : > { %v1150_v20 = vpop.permute.xlu1 %1149 }
 0x379   : > { %1326 = vrot.lane.b32.xlu0 %v2990_v31, %s2621_s1 }
 0x37f   : > { %v2410_v15 = vpop.eup %2409 }
 0x380   : > { %v974_v16 = vmul.f32 %v2410_v15, %v972_v14 }
 0x382   : > { %v975_v17 = vsub.f32 2.0, %v974_v16 }
 0x384   : > { %v976_v18 = vmul.f32 %v2410_v15, %v975_v17  ;;  %v2095_v17 = vld [vmem:[%s3205_s9] ss:$0 sm:$0xff] }
 0x386   : > { %v977_v19 = vmul.f32 %v2402_v58, %v976_v18 }
 0x388   : > { %978 = vst.msk [vmem:[%s3024_s22] sm:$0xff] %vm886_vm2, %v977_v19  ;;  %2202 = vmatmul.mubr.msk.f32.vlgmr.msra.gmra.mrb[6].mxu1 %vm886_vm2, %v977_v19  ;;  %v2096_v19 = vld [vmem:[%s3206_s10] ss:$0 sm:$0xff] }
 0x389   : > { %2210 = vmatpush3.msra.mxu1 %v1150_v20  ;;  %2211 = vmatprep.mubr.msk.f32.mxu1 %vm2619_vm0, %v2620_v1 }
 0x38a   : > { %2219 = vmatprep.subr.mxu1 %v2620_v1 }
 0x3e8   : > { %v1140_v21 = vpop.xlane.xlu0 %1139 }
 0x3e9   : > { %2411 = vrcp.f32 %v1140_v21 }
 0x3ec   : > { %v1318_v22 = vpop.xlane.xlu1 %1317 }
 0x3ed   : > { %2413 = vrcp.f32 %v1318_v22 }
 0x3f0   : > { %v1495_v23 = vpop.xlane.xlu0 %1494  ;;  %v1504_v38 = vpop.permute.xlu1 %1503 }
 0x3f1   : > { %2415 = vrcp.f32 %v1495_v23 }
 0x3f3   : > { %v2412_v24 = vpop.eup %2411 }
 0x3f4   : > { %v1142_v25 = vmul.f32 %v2412_v24, %v1140_v21  ;;  %v1327_v35 = vpop.permute.xlu0 %1326 }
 0x3f6   : > { %v1143_v26 = vsub.f32 2.0, %v1142_v25  ;;  %v1788_v25 = vld [vmem:[%s3209_s13 + $0x10] sm:$0xff] }
 0x3f7   : > { %v2414_v27 = vpop.eup %2413 }
 0x3f8   : > { %v1144_v28 = vmul.f32 %v2412_v24, %v1143_v26  ;;  %v1320_v29 = vmul.f32 %v2414_v27, %v1318_v22  ;;  %v1786_v22 = vld [vmem:[%s3209_s13] sm:$0xff]  ;;  %v1789_v26 = vld [vmem:[%s3209_s13 + $0x18] sm:$0xff] }
 0x3fa   : > { %v1145_v30 = vmul.f32 %v2404_v7, %v1144_v28  ;;  %v1321_v31 = vsub.f32 2.0, %v1320_v29  ;;  %v1790_v28 = vld [vmem:[%s3209_s13 + $0x20] sm:$0xff]  ;;  %v1791_v29 = vld [vmem:[%s3209_s13 + $0x28] sm:$0xff] }
 0x3fb   : > { %v2416_v32 = vpop.eup %2415 }
 0x3fc   : > { %2083 = vst.msk [vmem:[%s3024_s22 + $0x8] sm:$0xff] %vm886_vm2, %v1145_v30  ;;  %v1322_v33 = vmul.f32 %v2414_v27, %v1321_v31  ;;  %v1497_v34 = vmul.f32 %v2416_v32, %v1495_v23  ;;  %2212 = vmatmul.mubr.msk.f32.vlgmr.msra.gmra.mrb[8].mxu1 %vm886_vm2, %v1145_v30  ;;  %v1787_v23 = vld [vmem:[%s3209_s13 + $0x8] sm:$0xff]  ;;  %v2309_v27 = vpack.c.bf16 %v1789_v26, %v1788_v25  ;;  %v1792_v31 = vld [vmem:[%s3209_s13 + $0x30] sm:$0xff] }
 0x3fd   : > { %2220 = vmatpush3.msra.mxu1 %v1327_v35  ;;  %2221 = vmatprep.mubr.msk.f32.mxu1 %vm2619_vm0, %v2620_v1  ;;  %v2306_v24 = vpack.c.bf16 %v1787_v23, %v1786_v22  ;;  %v2312_v30 = vpack.c.bf16 %v1791_v29, %v1790_v28 }
 0x3fe   : > { %v1323_v36 = vmul.f32 %v2406_v9, %v1322_v33  ;;  %v1498_v37 = vsub.f32 2.0, %v1497_v34  ;;  %2229 = vmatprep.subr.mxu1 %v2620_v1  ;;  %v2097_v34 = vld [vmem:[%s3208_s12] ss:$0 sm:$0xff] }
 0x400   : > { %2087 = vst.msk [vmem:[%s3024_s22 + $0x10] sm:$0xff] %vm886_vm2, %v1323_v36  ;;  %v1499_v39 = vmul.f32 %v2416_v32, %v1498_v37  ;;  %2222 = vmatmul.mubr.msk.f32.vlgmr.msra.gmra.mrb[10].mxu1 %vm886_vm2, %v1323_v36  ;;  %v1793_v32 = vld [vmem:[%s3209_s13 + $0x38] sm:$0xff] }
 0x401   : > { %2230 = vmatpush3.msra.mxu1 %v1504_v38  ;;  %2231 = vmatprep.mubr.msk.f32.mxu1 %vm2619_vm0, %v2620_v1  ;;  %v2315_v33 = vpack.c.bf16 %v1793_v32, %v1792_v31 }
 0x402   : > { %v1500_v40 = vmul.f32 %v2408_v12, %v1499_v39  ;;  %2299 = vmatprep.subr.bf16.mxu1 %v2618_v0  ;;  %v1701_v12 = vld [vmem:[#allocation8 + $0x18] sm:$0xff] }
 0x403   : > { %v2303_v13 = vpack.c.bf16 %v1701_v12, %v1700_v11 }
 0x404   : > { %2091 = vst.msk [vmem:[%s3024_s22 + $0x18] sm:$0xff] %vm886_vm2, %v1500_v40  ;;  %2232 = vmatmul.mubr.msk.f32.vlgmr.msra.gmra.mrb[12].mxu1 %vm886_vm2, %v1500_v40 }
 0x405   : > { %2253 = vmatprep.mubr.msk.f32.mxu1 %vm2619_vm0, %v2620_v1 }
 0x45b   : > { %v1048_v41 = vpop.f32.mrb[6].mxu1 }
 0x45c   : > { %1052 = vst.msk [vmem:[#allocation2] sm:$0xff] %vm886_vm2, %v1048_v41  ;;  %v2203_v42 = vpop.f32.mrb[7].mxu1 }
 0x45d   : > { %v2099_v42 = vld [vmem:[%s3258_s15] ss:$0 sm:$0xff]  ;;  %s2509_s15 = scalar_lea.vmem %s3112_s27, 512 }
 0x45e   : > { %p2510_p11 = scmp.ne.s32.totalorder %s3112_s27, %s2509_s15 }
 0x460   : > { %p2511_p1 = pnand %p2510_p11, %p3260_p0 }
 0x462   : > { %p2512_p3 = pneg %p2511_p1 }
 0x4cf   : > { %v1221_v49 = vpop.f32.mrb[8].mxu1 }
 0x4d0   : > { %1226 = vrot.lane.b32.xlu1 %v1221_v49, %s3225_s19  ;;  %v2213_v50 = vpop.f32.mrb[9].mxu1  ;;  %s2513_s19 = sshll.u32 %s2627_s16, 4  ;;  %s2514_s19 = int_to_ptr.vmem [resolvable:$false] %s2513_s19 }
 0x4d1   : > { %s2515_s22 = scalar_lea.vmem %s2514_s19, 1024  ;;  %p2516_p7 = scmp.lt.s32.totalorder %s3112_s27, %s2514_s19 }
 0x4d2   : > { %p2517_p9 = scmp.lt.s32.totalorder %s2515_s22, %s2509_s15 }
 0x4d3   : > { %v1398_v51 = vpop.f32.mrb[10].mxu1 }
 0x4d4   : > { %1403 = vrot.lane.b32.xlu0 %v1398_v51, %s2625_s17  ;;  %v2223_v52 = vpop.f32.mrb[11].mxu1  ;;  %p2518_p12 = por %p2517_p9, %p2516_p7 }
 0x4d6   : > { %p2519_p2 = pnand %p2518_p12, %p2512_p3 }
 0x4d7   : > { %v1575_v53 = vpop.f32.mrb[12].mxu1 }
 0x4d8   : > { %1580 = vrot.lane.b32.xlu1 %v1575_v53, %s2626_s14  ;;  %v2233_v54 = vpop.f32.mrb[13].mxu1  ;;  %s3259_s14 = sld [smem:[#allocation29_spill]] }
 0x4de   : > { %s3110_s1 = scalar_lea.hbm %s3259_s14, %s2110_s23 }
 0x542   : > { %v1227_v55 = vpop.permute.xlu1 %1226 }
 0x543   : > { %1230 = vst.msk [vmem:[#allocation2] sm:$0xff] %vm1229_vm3, %v1227_v55 }
 0x546   : > { %v1404_v56 = vpop.permute.xlu0 %1403 }
 0x547   : > { %1407 = vst.msk [vmem:[#allocation2] sm:$0xff] %vm1406_vm4, %v1404_v56 }
 0x54a   : > { %v1581_v57 = vpop.permute.xlu1 %1580 }
 0x54b   : > { %1584 = vst.msk [vmem:[#allocation2] sm:$0xff] %vm1583_vm5, %v1581_v57 }
 0x552   : > { %v1585_v58 = vld [vmem:[#allocation2] sm:$0xff] }
 0x553   : > { %2243 = vmatmul.mubr.msk.f32.vlgmr.msra.gmra.mrb[8].mxu0 %vm652_vm1, %v1585_v58 }
 0x554   : > { %2272 = vmatprep.mubr.msk.f32.mxu0 %vm2619_vm0, %v2620_v1  ;;  %v1698_v1 = vld [vmem:[#allocation8] sm:$0xff]  ;;  %2307 = vmatpush3.bf16.msra.mxu0 %v2306_v24 }
 0x555   : > { %v2300_v9 = vpack.c.bf16 %v1699_v8, %v1698_v1  ;;  %2308 = vmatprep.subr.bf16.mxu0 %v2618_v0 }
 0x557   : > { %2301 = vmatpush3.bf16.msra.mxu1 %v2300_v9 }
 0x558   : > { %2302 = vmatprep.subr.bf16.mxu1 %v2618_v0  ;;  %2310 = vmatpush3.bf16.msra.mxu0 %v2309_v27 }
 0x559   : > { %2311 = vmatprep.subr.bf16.mxu0 %v2618_v0 }
 0x55b   : > { %2304 = vmatpush3.bf16.msra.mxu1 %v2303_v13 }
 0x55c   : > { %2313 = vmatpush3.bf16.msra.mxu0 %v2312_v30 }
 0x55d   : > { %2314 = vmatprep.subr.bf16.mxu0 %v2618_v0 }
 0x560   : > { %2316 = vmatpush3.bf16.msra.mxu0 %v2315_v33 }
 0x626   : > { %v1665_v60 = vpop.f32.mrb[8].mxu0 }
 0x627   : > { %v1666_v61 = vadd.f32 %v2093_v59, %v1665_v60  ;;  %v2244_v62 = vpop.f32.mrb[9].mxu0 }
 0x629   : > { %v1669_v63 = vadd.f32 %v1666_v61, %v2933_v10 }
 0x62b   : > { %v1670_v2 = vsel %vm652_vm1, %v1669_v63, 0.0 }
 0x62c   : > { %1671 = vadd.xlane.f32.xlu0 %v1670_v2 }
 0x6b9   : > { %v1672_v3 = vpop.xlane.xlu0 %1671 }
 0x6ba   : > { %v1674_v4 = vmul.f32 0.03125, %v1672_v3 }
 0x6bc   : > { %v1675_v5 = vsub.f32 %v1669_v63, %v1674_v4 }
 0x6be   : > { %v1676_v6 = vmul.f32 %v1675_v5, %v1675_v5 }
 0x6c0   : > { %v1677_v7 = vsel %vm652_vm1, %v1676_v6, 0.0 }
 0x6c1   : > { %1678 = vadd.xlane.f32.xlu1 %v1677_v7 }
 0x74e   : > { %v1679_v10 = vpop.xlane.xlu1 %1678 }
 0x74f   : > { %v1680_v14 = vmul.f32 0.03125, %v1679_v10 }
 0x751   : > { %v1681_v15 = vadd.f32 1e-05, %v1680_v14 }
 0x753   : > { %2417 = vrsqrt.f32 %v1681_v15 }
 0x75d   : > { %v2418_v16 = vpop.eup %2417 }
 0x75e   : > { %v1683_v18 = vmul.f32 %v2418_v16, %v1675_v5 }
 0x760   : > { %v1690_v20 = vmul.f32 %v2095_v17, %v1683_v18 }
 0x762   : > { %v1697_v21 = vadd.f32 %v2096_v19, %v1690_v20 }
 0x764   : > { %2254 = vmatmul.mubr.msk.f32.vlgmr.msra.gmra.mrb[14].mxu1 %vm652_vm1, %v1697_v21 }
 0x837   : > { %v1777_v35 = vpop.f32.mrb[14].mxu1 }
 0x838   : > { %v1778_v36 = vadd.f32 %v2097_v34, %v1777_v35  ;;  %v2255_v37 = vpop.f32.mrb[15].mxu1 }
 0x83a   : > { %v1782_v38 = vmul.f32 0.70710677, %v1778_v36  ;;  %v1781_v39 = vmul.f32 0.5, %v1778_v36 }
 0x83c   : > { %2419 = verf.f32 %v1782_v38 }
 0x846   : > { %v2420_v0 = vpop.eup %2419 }
 0x847   : > { %v1784_v40 = vadd.f32 1.0, %v2420_v0 }
 0x849   : > { %v1785_v41 = vmul.f32 %v1784_v40, %v1781_v39 }
 0x84b   : > { %2273 = vmatmul.mubr.msk.f32.vlgmr.msra.gmra.mrb[10].mxu0 %vm1800_vm6, %v1785_v41 }
 0x91e   : > { %v1870_v43 = vpop.f32.mrb[10].mxu0 }
 0x91f   : > { %v1871_v44 = vadd.f32 %v2099_v42, %v1870_v43  ;;  %v2274_v45 = vpop.f32.mrb[11].mxu0 }
 0x921   : > { %v1874_v46 = vadd.f32 %v1871_v44, %v1697_v21 }
 0x923   : > { %v1875_v47 = vsel %vm652_vm1, %v1874_v46, 0.0 }
 0x924   : > { %1876 = vadd.xlane.f32.xlu0 %v1875_v47 }
 0x9b1   : > { %v1877_v48 = vpop.xlane.xlu0 %1876 }
 0x9b2   : > { %v1878_v49 = vmul.f32 0.03125, %v1877_v48 }
 0x9b4   : > { %v1879_v50 = vsub.f32 %v1874_v46, %v1878_v49 }
 0x9b6   : > { %v1880_v51 = vmul.f32 %v1879_v50, %v1879_v50 }
 0x9b8   : > { %v1881_v52 = vsel %vm652_vm1, %v1880_v51, 0.0 }
 0x9b9   : > { %1882 = vadd.xlane.f32.xlu0 %v1881_v52 }
 0x9ba   : > { %2522 = shalt.err (!%p2519_p2)
}
 0x9bb   : > { %s2523_s23 = scalar_lea.hbm %s3110_s1, 512  ;;  %s2527_s16 = scalar_lea.hbm %s3259_s14, 1024 }
 0x9bc   : > { %p2524_p13 = scmp.ne.s32.totalorder %s3110_s1, %s2523_s23  ;;  %p2528_p4 = scmp.lt.u32.totalorder %s3110_s1, %s3259_s14 }
 0x9bd   : > { %p2529_p5 = scmp.lt.u32.totalorder %s2527_s16, %s2523_s23  ;;  %p2531_p11 = scmp.lt.u32.totalorder %s2523_s23, %s3110_s1 }
 0x9be   : > { %p2525_p6 = pnand %p2524_p13, %p3260_p0 }
 0x9bf   : > { %p2530_p8 = por %p2529_p5, %p2528_p4 }
 0x9c0   : > { %p2526_p10 = pneg %p2525_p6 }
 0x9c1   : > { %p2532_p1 = por %p2531_p11, %p2530_p8 }
 0x9c3   : > { %p2533_p3 = pnand %p2532_p1, %p2526_p10 }
 0x9c5   : > { %2536 = shalt.err (!%p2533_p3)
}
 0x9c6   : > { %s2628_s15 = smov 128   ;;  %s3261_s22 = smov 8  }
 0x9c7   : > { %s3262_s2 = scalar_lea.sflag [#allocation11], %s2894_s7  ;;  %s3263_s25 = sld [smem:[#allocation26_spill]] }
 0x9c8   : > { %2328 = dma.vmem_to_hbm [thread:$0]  (%p3260_p0), %s3112_s27, 512, %s3110_s1, %s3262_s2, %s2628_s15, %s2628_s15, %s3261_s22  }
 0x9c9   : > { %s3264_s19 = sld [smem:[#allocation27_spill]]  ;;  %s2105_s3 = sshll.u32 %s2746_s0, 7 }
 0x9ca   : > { %s3265_s4 = sshll.u32 %s2894_s7, 3  ;;  %s3266_s15 = sld [smem:[#allocation28_spill]] }
 0x9cb   : > { %s623_s5 = scalar_lea.vmem [#allocation9], %s3265_s4  ;;  %s1904_s21 = scalar_lea.sflag [#allocation5], %s2894_s7 }
 0x9cc   : > { %s1922_s2 = sshll.u32 %s623_s5, 4  ;;  %s2629_s4 = smov [#allocation9]   ;;  %s3153_s2 = int_to_ptr.vmem [resolvable:$true] %s1922_s2 }
 0x9cd   : > { %v2101_v57 = vld [vmem:[%s3263_s25] ss:$0 sm:$0xff]  ;;  %s2537_s23 = scalar_lea.vmem %s3153_s2, 128  ;;  %s2541_s0 = sshll.u32 %s2629_s4, 4  ;;  %s2542_s0 = int_to_ptr.vmem [resolvable:$false] %s2541_s0 }
 0x9ce   : > { %p2538_p7 = scmp.ne.s32.totalorder %s3153_s2, %s2537_s23  ;;  %s2543_s25 = scalar_lea.vmem %s2542_s0, 256 }
 0x9cf   : > { %v2102_v59 = vld [vmem:[%s3264_s19] ss:$0 sm:$0xff]  ;;  %p2544_p2 = scmp.lt.s32.totalorder %s3153_s2, %s2542_s0  ;;  %p2545_p13 = scmp.lt.s32.totalorder %s2543_s25, %s2537_s23 }
 0x9d0   : > { %s3151_s22 = scalar_lea.hbm %s3266_s15, %s2105_s3  ;;  %p2539_p9 = pnand %p2538_p7, %p3260_p0 }
 0x9d1   : > { %p2546_p6 = por %p2545_p13, %p2544_p2 }
 0x9d2   : > { %p2540_p12 = pneg %p2539_p9 }
 0x9d4   : > { %p2547_p10 = pnand %p2546_p6, %p2540_p12 }
 0xa46   : > { %v1883_v53 = vpop.xlane.xlu0 %1882 }
 0xa47   : > { %v1884_v54 = vmul.f32 0.03125, %v1883_v53 }
 0xa49   : > { %v1885_v55 = vadd.f32 1e-05, %v1884_v54 }
 0xa4b   : > { %2421 = vrsqrt.f32 %v1885_v55 }
 0xa55   : > { %v2422_v56 = vpop.eup %2421 }
 0xa56   : > { %v1887_v58 = vmul.f32 %v2422_v56, %v1879_v50 }
 0xa58   : > { %v1894_v60 = vmul.f32 %v2101_v57, %v1887_v58 }
 0xa5a   : > { %v1901_v61 = vadd.f32 %v2102_v59, %v1894_v60 }
 0xa5c   : > { %1902 = vst.msk [vmem:[%s623_s5] sm:$0xff] %vm652_vm1, %v1901_v61 }
 0xa5d   : > { %2550 = shalt.err (!%p2547_p10)
}
 0xa5e   : > { %s2551_s3 = scalar_lea.hbm %s3151_s22, 128  ;;  %s2555_s17 = scalar_lea.hbm %s3266_s15, 256 }
 0xa5f   : > { %p2552_p4 = scmp.ne.s32.totalorder %s3151_s22, %s2551_s3  ;;  %p2556_p11 = scmp.lt.u32.totalorder %s3151_s22, %s3266_s15 }
 0xa60   : > { %p2557_p1 = scmp.lt.u32.totalorder %s2555_s17, %s2551_s3  ;;  %p2559_p7 = scmp.lt.u32.totalorder %s2551_s3, %s3151_s22 }
 0xa61   : > { %p2553_p5 = pnand %p2552_p4, %p3260_p0 }
 0xa62   : > { %p2558_p3 = por %p2557_p1, %p2556_p11 }
 0xa63   : > { %p2554_p8 = pneg %p2553_p5 }
 0xa64   : > { %p2560_p9 = por %p2559_p7, %p2558_p3 }
 0xa66   : > { %p2561_p12 = pnand %p2560_p9, %p2554_p8 }
 0xa68   : > { %2564 = shalt.err (!%p2561_p12)
}
 0xa69   : > { %2327 = dma.vmem_to_hbm [thread:$0]  (%p3260_p0), %s3153_s2, 128, %s3151_s22, %s1904_s21  }
 0xa6a PF: > { %s3267_s27 = sld [smem:[#allocation16_spill]]  ;;  %s3268_s1 = sld [smem:[#allocation17_spill]] }
 0xa6b   : > { %p3270_p13 = scmp.ge.s32.totalorder %s2611_s30, 2 }
 0xa70   : > { %s1950_s23 = sand.u32 1, %s3267_s27   ;;  %p3269_p2 = scmp.ne.s32.totalorder %s3268_s1, 0 }
 0xa71   : > { %s1951_s4 = scalar_lea.sflag [#allocation5], %s1950_s23 }
 0xa72   : > { %p2343_p6 = pnand %p3270_p13, %p3269_p2 }
 0xa74   : > { %2590 = dma.done.wait (!%p2343_p6), %s1951_s4, 128  }
 0xa75   : > { %2592 = vsyncadd (!%p2343_p6), %s1951_s4, 4294967168  ;;  %s1960_s0 = scalar_lea.sflag [#allocation11], %s1950_s23 }
 0xa76   : > { %2594 = dma.done.wait (!%p2343_p6), %s1960_s0, 512  }
 0xa77   : > { %2596 = vsyncadd (!%p2343_p6), %s1960_s0, 4294966784  ;;  %p36_p0 = scmp.ge.s32.totalorder %s2835_s18, 4   ;;  %s3271_s27 = smov %s2603_s28 }
 0xa78   : > { %s3272_s28 = smov %s2607_s29  ;;  %s3273_s29 = smov %s2851_s26 }
 0xa79   : > { %s3274_s30 = smov %s2835_s18  ;;  %38 = sbr.rel (!%p36_p0) target bundleno = 21 (0x15), region = 161 }
 0xa80   :  { %1965 = vsyncpa [#allocation4], 1 }
 0xa81   :  { %1967 = vsyncpa [#allocation4 + $0x1], 1 }
 0xa82   :  { %1968 = vsyncpa [#allocation7], 1 }
 0xa83   :  { %1969 = vsyncpa [#allocation5], 1 }
 0xa84   :  { %1971 = vsyncpa [#allocation5 + $0x1], 1 }
 0xa85   :  { %1972 = vsyncpa [#allocation11], 1 }
 0xa86   :  { %1974 = vsyncpa [#allocation11 + $0x1], 1 }

// kernel: tpu_custom_call.1
= control target key start
LH: loop header
LB: loop body
LE: loop exit
PB: predicated region body
PF: predicated region fallthrough
CT: control target
= control target key end

     0   :  { %s3196_s0 = inlined_call_operand.hbm [shape: f32[16,32], index: 0, kind: input, shape index: {}]   ;;  %s3197_s1 = inlined_call_operand.vmem [shape: f32[32,32], index: 1, kind: input, shape index: {}]   ;;  %s3198_s2 = inlined_call_operand.vmem [shape: f32[1,32], index: 2, kind: input, shape index: {}]   ;;  %s3199_s3 = inlined_call_operand.vmem [shape: f32[32,32], index: 3, kind: input, shape index: {}]   ;;  %s3200_s4 = inlined_call_operand.vmem [shape: f32[1,32], index: 4, kind: input, shape index: {}]   ;;  %s3201_s5 = inlined_call_operand.vmem [shape: f32[32,32], index: 5, kind: input, shape index: {}]   ;;  %s3202_s6 = inlined_call_operand.vmem [shape: f32[1,32], index: 6, kind: input, shape index: {}]   ;;  %s3203_s7 = inlined_call_operand.hbm [shape: f32[32,32], index: 7, kind: input, shape index: {}]   ;;  %s3204_s8 = inlined_call_operand.vmem [shape: f32[1,32], index: 8, kind: input, shape index: {}]   ;;  %s3205_s9 = inlined_call_operand.vmem [shape: f32[1,32], index: 9, kind: input, shape index: {}]   ;;  %s3206_s10 = inlined_call_operand.vmem [shape: f32[1,32], index: 10, kind: input, shape index: {}]   ;;  %s3207_s11 = inlined_call_operand.hbm [shape: f32[32,64], index: 11, kind: input, shape index: {}]   ;;  %s3208_s12 = inlined_call_operand.vmem [shape: f32[1,64], index: 12, kind: input, shape index: {}]   ;;  %s3209_s13 = inlined_call_operand.vmem [shape: f32[64,32], index: 13, kind: input, shape index: {}]   ;;  %s3210_s14 = inlined_call_operand.vmem [shape: f32[1,32], index: 14, kind: input, shape index: {}]   ;;  %s3211_s15 = inlined_call_operand.vmem [shape: f32[1,32], index: 15, kind: input, shape index: {}]   ;;  %s3212_s16 = inlined_call_operand.vmem [shape: f32[1,32], index: 16, kind: input, shape index: {}]   ;;  %s3213_s17 = inlined_call_operand.hbm [shape: f32[16,32], index: 17, kind: output, shape index: {0}]   ;;  %s3214_s18 = inlined_call_operand.hbm [shape: f32[2,4,8,8], index: 18, kind: output, shape index: {1}]  }
   0x1   :  { %3227 = sst [smem:[#allocation18_spill]] %s3196_s0 }
   0x2   :  { %3228 = sst [smem:[#allocation19_spill]] %s3197_s1 }
   0x3   :  { %3229 = sst [smem:[#allocation20_spill]] %s3198_s2 }
   0x4   :  { %3230 = sst [smem:[#allocation21_spill]] %s3199_s3 }
   0x5   :  { %3231 = sst [smem:[#allocation22_spill]] %s3200_s4 }
   0x6   :  { %3232 = sst [smem:[#allocation23_spill]] %s3201_s5 }
   0x7   :  { %3233 = sst [smem:[#allocation24_spill]] %s3203_s7 }
   0x8   :  { %3234 = sst [smem:[#allocation25_spill]] %s3210_s14 }
   0x9   :  { %3235 = sst [smem:[#allocation26_spill]] %s3211_s15 }
   0xa   :  { %3236 = sst [smem:[#allocation27_spill]] %s3212_s16 }
   0xb   :  { %3237 = sst [smem:[#allocation28_spill]] %s3213_s17 }
   0xc   :  { %3238 = sst [smem:[#allocation29_spill]] %s3214_s18 }
   0xd   :  { %24 = vsyncpa [#allocation4], 0 }
   0xe   :  { %26 = vsyncpa [#allocation4 + $0x1], 0 }
   0xf   :  { %27 = vsyncpa [#allocation7], 0 }
  0x10   :  { %28 = vsyncpa [#allocation5], 0 }
  0x11   :  { %30 = vsyncpa [#allocation5 + $0x1], 0 }
  0x12   :  { %31 = vsyncpa [#allocation11], 0 }
  0x13   :  { %33 = vsyncpa [#allocation11 + $0x1], 0  ;;  %s2725_s27 = smov 0   ;;  %s2727_s28 = smov 0  }
  0x14   :  { %s2729_s29 = smov 0   ;;  %s2731_s30 = smov 0  }
  0x15 LB: > { %3239 = sst [smem:[#allocation16_spill]] %s2599_s27  ;;  %s2746_s0 = sadd.s32 4294967295, %s2611_s30   ;;  %s2611_s30 = sphi %s2731_s30, %s3274_s30   ;;  %s2607_s29 = sphi %s2729_s29, %s3273_s29   ;;  %s2603_s28 = sphi %s2727_s28, %s3272_s28   ;;  %s2599_s27 = sphi %s2725_s27, %s3271_s27  }
  0x16   : > { %s2059_s19 = sadd.s32 4294967294, %s2611_s30   ;;  %p59_p0 = scmp.ne.s32.totalorder %s2603_s28, %s2599_s27 }
  0x17   : > { %p3220_p1 = scmp.eq.s32.totalorder %s2746_s0, 0  ;;  %p425_p3 = scmp.eq.s32.totalorder %s2059_s19, 1 }
  0x18   : > { %p2060_p5 = scmp.ge.s32.totalorder %s2611_s30, 1  ;;  %p458_p7 = scmp.lt.s32.totalorder %s2611_s30, 3 }
  0x19   : > { %p2755_p4 = por %p3220_p1, %p59_p0  ;;  %p2760_p6 = por %p425_p3, %p59_p0 }
  0x1a   : > { %p2765_p8 = pnand %p2060_p5, %p458_p7  ;;  %s2613_s22 = smov [#allocation6]  }
  0x1b   : > { %s3240_s1 = scalar_select %p2755_p4, 1, 0 }
  0x1c   : > { %s3241_s20 = scalar_select %p2760_p6, 1, 0 }
  0x1d   : > { %s488_s2 = sshll.u32 %s2613_s22, 4  ;;  %p2331_p9 = pneg %p2765_p8  ;;  %s2769_s2 = int_to_ptr.vmem [resolvable:$true] %s488_s2 }
  0x1e   : > { %3242 = sst [smem:[#allocation17_spill]] %s3241_s20  ;;  %s2614_s24 = smov [#allocation8]  }
  0x1f   : > { %p2776_p11 = pnand %p2331_p9, %p3220_p1  ;;  %s510_s25 = sshll.u32 %s2614_s24, 4  ;;  %s2780_s25 = int_to_ptr.vmem [resolvable:$true] %s510_s25 }
  0x20   : > { %s3245_s7 = sld [smem:[#allocation24_spill]] }
  0x21   : > { %p2425_p13 = pneg %p2776_p11 }
  0x26   : > { %s2423_s22 = scalar_lea.hbm %s3245_s7, 512 }
  0x27   : > { %p2424_p12 = scmp.ne.s32.totalorder %s3245_s7, %s2423_s22  ;;  %p2430_p5 = scmp.lt.u32.totalorder %s2423_s22, %s3245_s7 }
  0x29   : > { %p2426_p0 = pnand %p2425_p13, %p2424_p12 }
  0x2b   : > { %p2427_p3 = pneg %p2426_p0 }
  0x2d   : > { %p2432_p7 = pnand %p2430_p5, %p2427_p3 }
  0x2f   : > { %2435 = shalt.err (!%p2432_p7)
}
  0x30   : > { %s2436_s24 = scalar_lea.vmem %s2769_s2, 512  ;;  %p2444_p2 = scmp.lt.s32.totalorder %s2769_s2, %s2769_s2 }
  0x31   : > { %p2437_p9 = scmp.ne.s32.totalorder %s2769_s2, %s2436_s24  ;;  %p2445_p12 = scmp.lt.s32.totalorder %s2436_s24, %s2436_s24 }
  0x33   : > { %p2439_p10 = pnand %p2437_p9, %p2425_p13  ;;  %p2446_p0 = por %p2445_p12, %p2444_p2 }
  0x35   : > { %p2440_p1 = pneg %p2439_p10 }
  0x37   : > { %p2447_p6 = pnand %p2446_p0, %p2440_p1 }
  0x39   : > { %2450 = shalt.err (!%p2447_p6)
}
  0x3a   : > { %s2615_s16 = smov 128   ;;  %s2616_s17 = smov 8  }
  0x3b   : > { %2334 = dma.hbm_to_vmem [thread:$0]  (!%p2776_p11), %s3245_s7, 512, %s2769_s2, [#allocation7], %s2615_s16, %s2615_s16, %s2616_s17  }
  0x3c   : > { %s2451_s22 = scalar_lea.hbm %s3207_s11, 512 }
  0x3d   : > { %p2452_p2 = scmp.ne.s32.totalorder %s3207_s11, %s2451_s22  ;;  %p2458_p10 = scmp.lt.u32.totalorder %s2451_s22, %s3207_s11 }
  0x3f   : > { %p2454_p1 = pnand %p2452_p2, %p2425_p13 }
  0x41   : > { %p2455_p6 = pneg %p2454_p1 }
  0x43   : > { %p2460_p3 = pnand %p2458_p10, %p2455_p6 }
  0x45   : > { %2463 = shalt.err (!%p2460_p3)
}
  0x46   : > { %s2464_s2 = scalar_lea.vmem %s2780_s25, 512  ;;  %p2472_p12 = scmp.lt.s32.totalorder %s2780_s25, %s2780_s25 }
  0x47   : > { %p2465_p5 = scmp.ne.s32.totalorder %s2780_s25, %s2464_s2  ;;  %p2473_p0 = scmp.lt.s32.totalorder %s2464_s2, %s2464_s2 }
  0x49   : > { %p2467_p7 = pnand %p2465_p5, %p2425_p13  ;;  %p2474_p2 = por %p2473_p0, %p2472_p12 }
  0x4b   : > { %p2468_p9 = pneg %p2467_p7 }
  0x4d   : > { %p2475_p1 = pnand %p2474_p2, %p2468_p9 }
  0x4f   : > { %2478 = shalt.err (!%p2475_p1)
}
  0x50   : > { %2337 = dma.hbm_to_vmem [thread:$0]  (!%p2776_p11), %s3207_s11, 512, %s2780_s25, [#allocation7], %s2615_s16, %s2615_s16, %s2616_s17  }
  0x51   : > { %s2835_s18 = sadd.s32 1, %s2611_s30   ;;  %s46_s23 = sadd.s32 1, %s2607_s29 }
  0x52   : > { %s43_s27 = ssub.s32 %s2611_s30, %s2835_s18  ;;  %p53_p13 = scmp.ne.s32.totalorder %s2607_s29, %s2603_s28 }
  0x53   : > { %p44_p6 = scmp.eq.s32.totalorder %s43_s27, 0  ;;  %p54_p10 = scmp.eq.s32.totalorder %s2611_s30, 0 }
  0x54   : > { %p3246_p3 = scmp.eq.s32.totalorder %s2746_s0, 1  ;;  %p2351_p7 = scmp.lt.s32.totalorder %s2611_s30, 2 }
  0x55   : > { %s2851_s26 = scalar_select %p44_p6, %s2607_s29, %s46_s23  }
  0x56   : > { %p2845_p5 = por %p3246_p3, %p53_p13  ;;  %p55_p9 = por %p54_p10, %p53_p13 }
  0x57   : > { %s539_s19 = sand.u32 1, %s2607_s29   ;;  %s2065_s25 = sshll.u32 %s2611_s30, 7 }
  0x58   : > { %s3247_s20 = scalar_select %p2845_p5, 1, 0 }
  0x59   : > { %s2064_s22 = sshll.u32 %s539_s19, 3  ;;  %s3248_s24 = sld [smem:[#allocation18_spill]] }
  0x5a   : > { %s543_s14 = scalar_lea.vmem [#allocation3], %s2064_s22  ;;  %p2862_p11 = pnand %p2351_p7, %p55_p9 }
  0x5b   : > { %s550_s15 = sshll.u32 %s543_s14, 4  ;;  %s540_s27 = scalar_lea.sflag [#allocation4], %s539_s19  ;;  %s2860_s15 = int_to_ptr.vmem [resolvable:$true] %s550_s15 }
  0x5c   : > { %p2481_p0 = pneg %p2862_p11 }
  0x5f   : > { %s2858_s2 = scalar_lea.hbm %s3248_s24, %s2065_s25  ;;  %s2484_s16 = scalar_lea.hbm %s3248_s24, 256 }
  0x60   : > { %s2479_s7 = scalar_lea.hbm %s2858_s2, 128  ;;  %p2485_p13 = scmp.lt.u32.totalorder %s2858_s2, %s3248_s24 }
  0x61   : > { %p2480_p12 = scmp.ne.s32.totalorder %s2858_s2, %s2479_s7  ;;  %p2486_p6 = scmp.lt.u32.totalorder %s2484_s16, %s2479_s7 }
  0x62   : > { %p2488_p3 = scmp.lt.u32.totalorder %s2479_s7, %s2858_s2 }
  0x63   : > { %p2482_p2 = pnand %p2481_p0, %p2480_p12  ;;  %p2487_p10 = por %p2486_p6, %p2485_p13 }
  0x65   : > { %p2483_p1 = pneg %p2482_p2  ;;  %p2489_p7 = por %p2488_p3, %p2487_p10 }
  0x67   : > { %p2490_p9 = pnand %p2489_p7, %p2483_p1 }
  0x69   : > { %2493 = shalt.err (!%p2490_p9)
}
  0x6a   : > { %s2494_s19 = scalar_lea.vmem %s2860_s15, 128  ;;  %s2617_s25 = smov [#allocation3]  }
  0x6b   : > { %p2495_p12 = scmp.ne.s32.totalorder %s2860_s15, %s2494_s19  ;;  %s2499_s22 = sshll.u32 %s2617_s25, 4  ;;  %s2500_s22 = int_to_ptr.vmem [resolvable:$false] %s2499_s22 }
  0x6c   : > { %s2501_s17 = scalar_lea.vmem %s2500_s22, 256  ;;  %p2502_p4 = scmp.lt.s32.totalorder %s2860_s15, %s2500_s22 }
  0x6d   : > { %p2497_p2 = pnand %p2495_p12, %p2481_p0  ;;  %p2503_p13 = scmp.lt.s32.totalorder %s2501_s17, %s2494_s19 }
  0x6f   : > { %p2498_p5 = pneg %p2497_p2  ;;  %p2504_p6 = por %p2503_p13, %p2502_p4 }
  0x71   : > { %p2505_p10 = pnand %p2504_p6, %p2498_p5 }
  0x73   : > { %2508 = shalt.err (!%p2505_p10)
}
  0x74   : > { %2341 = dma.hbm_to_vmem [thread:$0]  (!%p2862_p11), %s2858_s2, 128, %s2860_s15, %s540_s27  }
  0x75   : > { %559 = sbr.rel (%p2765_p8) target bundleno = 2666 (0xa6a), region = 88  ;;  %s2894_s7 = sand.u32 (!%p2765_p8), 1, %s2603_s28  }
  0x76   : > { %s3224_s16 = sshll.u32 (!%p2765_p8), %s2894_s7, 3  ;;  %s562_s14 = scalar_lea.sflag (!%p2765_p8), [#allocation4], %s2894_s7 }
  0x77   : > { %s565_s19 = scalar_lea.vmem (!%p2765_p8), [#allocation3], %s3224_s16  ;;  %p3250_p4 = scmp.ne.s32.totalorder (!%p2765_p8), %s3240_s1, 0 }
  0x7c   : > { %2582 = dma.done.wait (%p3250_p4), %s562_s14, 128  }
  0x7d   : > { %2584 = vsyncadd (%p3250_p4), %s562_s14, 4294967168  ;;  %p3251_p5 = scmp.eq.s32.totalorder %s2746_s0, 0 }
  0x7f   : > { %2586 = dma.done.wait (%p3251_p5), [#allocation7], 1024   ;;  %p3252_p8 = pmov %p3251_p5 }
  0x80   : > { %v2618_v0 = vmov 0.0|0.0   ;;  %vm2619_vm0 = vmmov 0   ;;  %v2620_v1 = vmov 0.0   ;;  %s3253_s2 = sld [smem:[#allocation19_spill]]  ;;  %s3254_s3 = sld [smem:[#allocation21_spill]]  ;;  %v2933_v10 = vld [vmem:[%s565_s19] sm:$0xff] }
  0x81   : > { %2588 = vsyncadd (%p3252_p8), [#allocation7], 4294966272  ;;  %2275 = vmatprep.subr.bf16.mxu1 %v2618_v0  ;;  %2169 = vmatprep.mubr.msk.f32.mxu1 %vm2619_vm0, %v2620_v1  ;;  %vm652_vm1 = vcmask 261120   ;;  %s3255_s5 = sld [smem:[#allocation23_spill]]  ;;  %s3256_s4 = sld [smem:[#allocation22_spill]]  ;;  %vm886_vm2 = vcmask 64512  }
  0x82   : > { %2287 = vmatprep.subr.bf16.mxu0 %v2618_v0  ;;  %2191 = vmatprep.mubr.msk.f32.mxu0 %vm2619_vm0, %v2620_v1  ;;  %s3257_s14 = sld [smem:[#allocation20_spill]]  ;;  %s2621_s1 = smov 112   ;;  %v2076_v29 = vld [vmem:[%s3202_s6] ss:$0 sm:$0xff]  ;;  %vm1229_vm3 = vcmask 130112   ;;  %vm1406_vm4 = vcmask 195712  }
  0x83   : > { %s2622_s21 = smov 120   ;;  %s2623_s15 = smov 104   ;;  %vm1583_vm5 = vcmask 261312   ;;  %vm1800_vm6 = vcmask 523264  }
  0x84   : > { %s2071_s25 = sshll.u32 %s2894_s7, 5  ;;  %s3225_s19 = smov 8  }
  0x85   : > { %s3024_s22 = scalar_lea.vmem [#allocation10], %s2071_s25  ;;  %s2625_s17 = smov 16  }
  0x86   : > { %v642_v2 = vld [vmem:[%s3253_s2] sm:$0xff]  ;;  %v643_v3 = vld [vmem:[%s3253_s2 + $0x8] sm:$0xff]  ;;  %v644_v4 = vld [vmem:[%s3253_s2 + $0x10] sm:$0xff]  ;;  %s2110_s23 = sshll.u32 %s2746_s0, 9  ;;  %s1935_s27 = sshll.u32 %s3024_s22, 4  ;;  %s3112_s27 = int_to_ptr.vmem [resolvable:$true] %s1935_s27 }
  0x87   : > { %v2276_v5 = vpack.c.bf16 %v643_v3, %v642_v2  ;;  %v645_v6 = vld [vmem:[%s3253_s2 + $0x18] sm:$0xff]  ;;  %v726_v8 = vld [vmem:[%s3254_s3] sm:$0xff]  ;;  %v727_v9 = vld [vmem:[%s3254_s3 + $0x8] sm:$0xff]  ;;  %p3260_p0 = scmp.ne.s32.totalorder %s3247_s20, 0  ;;  %s2627_s16 = smov [#allocation10]  }
  0x88   : > { %v2279_v7 = vpack.c.bf16 %v645_v6, %v644_v4  ;;  %v2282_v11 = vpack.c.bf16 %v727_v9, %v726_v8  ;;  %v728_v12 = vld [vmem:[%s3254_s3 + $0x10] sm:$0xff]  ;;  %v729_v13 = vld [vmem:[%s3254_s3 + $0x18] sm:$0xff]  ;;  %v806_v15 = vld [vmem:[%s3255_s5] sm:$0xff] }
  0x89   : > { %2277 = vmatpush3.bf16.msra.mxu1 %v2276_v5  ;;  %v2285_v14 = vpack.c.bf16 %v729_v13, %v728_v12  ;;  %v807_v16 = vld [vmem:[%s3255_s5 + $0x8] sm:$0xff]  ;;  %v808_v17 = vld [vmem:[%s3255_s5 + $0x10] sm:$0xff]  ;;  %v809_v19 = vld [vmem:[%s3255_s5 + $0x18] sm:$0xff] }
  0x8a   : > { %2278 = vmatprep.subr.bf16.mxu1 %v2618_v0  ;;  %v2288_v18 = vpack.c.bf16 %v807_v16, %v806_v15  ;;  %v2291_v20 = vpack.c.bf16 %v809_v19, %v808_v17  ;;  %v2074_v23 = vld [vmem:[%s3256_s4] ss:$0 sm:$0xff] }
  0x8b   : > { %v2072_v27 = vld [vmem:[%s3257_s14] ss:$0 sm:$0xff]  ;;  %s2626_s14 = smov 24  }
  0x8c   : > { %2289 = vmatpush3.bf16.msra.mxu0 %v2288_v18 }
  0x8d   : > { %2280 = vmatpush3.bf16.msra.mxu1 %v2279_v7  ;;  %2290 = vmatprep.subr.bf16.mxu0 %v2618_v0 }
  0x8e   : > { %2281 = vmatprep.subr.bf16.mxu1 %v2618_v0 }
  0x90   : > { %2170 = vmatmul.mubr.msk.f32.vlgmr.msra.gmra.mrb[0].mxu1 %vm652_vm1, %v2933_v10  ;;  %2292 = vmatpush3.bf16.msra.mxu0 %v2291_v20 }
  0x91   : > { %2283 = vmatpush3.bf16.msra.mxu1 %v2282_v11  ;;  %2180 = vmatprep.mubr.msk.f32.mxu1 %vm2619_vm0, %v2620_v1 }
  0x92   : > { %2284 = vmatprep.subr.bf16.mxu1 %v2618_v0  ;;  %2204 = vmatprep.subr.mxu0 %v2620_v1 }
  0x93   : > { %2192 = vmatmul.mubr.msk.f32.vlgmr.msra.gmra.mrb[0].mxu0 %vm652_vm1, %v2933_v10 }
  0x94   : > { %2206 = vmatprep.mubr.msk.f32.mxu0 %vm2619_vm0, %v2620_v1 }
  0x95   : > { %2286 = vmatpush3.bf16.msra.mxu1 %v2285_v14 }
  0x96   : > { %2194 = vmatprep.subr.mxu1 %v2620_v1 }
  0x98   : > { %2181 = vmatmul.mubr.msk.f32.vlgmr.msra.gmra.mrb[2].mxu1 %vm652_vm1, %v2933_v10 }
  0x99   : > { %2196 = vmatprep.mubr.msk.f32.mxu1 %vm2619_vm0, %v2620_v1 }
 0x163   : > { %v722_v21 = vpop.f32.mrb[0].mxu1 }
 0x164   : > { %v2171_v22 = vpop.f32.mrb[1].mxu1  ;;  %v723_v28 = vadd.f32 %v2072_v27, %v722_v21 }
 0x166   : > { %v882_v30 = vpop.f32.mrb[0].mxu0 }
 0x167   : > { %v2990_v31 = vadd.f32 %v2076_v29, %v882_v30  ;;  %v2193_v32 = vpop.f32.mrb[1].mxu0 }
 0x16b   : > { %v802_v24 = vpop.f32.mrb[2].mxu1 }
 0x16c   : > { %v803_v25 = vadd.f32 %v2074_v23, %v802_v24  ;;  %v2182_v26 = vpop.f32.mrb[3].mxu1 }
 0x16e   : > { %1233 = vrot.lane.b32.xlu1 %v803_v25, %s2621_s1  ;;  %1055 = vrot.lane.b32.xlu0 %v803_v25, %s2622_s21 }
 0x16f   : > { %2195 = vmatpush3.xpose.msk.msra.mxu1 %vm886_vm2, %v803_v25 }
 0x170   : > { %2199 = vmatprep.subr.mxu1 %v2620_v1 }
 0x172   : > { %2197 = vmatmul.mubr.msk.f32.vlgmr.msra.gmra.mrb[4].mxu1 %vm886_vm2, %v723_v28  ;;  %1231 = vrot.lane.b32.xlu1 %v723_v28, %s2621_s1 }
 0x173   : > { %1053 = vrot.lane.b32.xlu0 %v723_v28, %s2622_s21  ;;  %2201 = vmatprep.mubr.msk.f32.mxu1 %vm2619_vm0, %v2620_v1 }
 0x174   : > { %2200 = vmatpush3.msra.mxu1 %v2990_v31 }
 0x175   : > { %2209 = vmatprep.subr.mxu1 %v2620_v1 }
 0x176   : > { %1408 = vrot.lane.b32.xlu1 %v723_v28, %s2623_s15 }
 0x177   : > { %1410 = vrot.lane.b32.xlu0 %v803_v25, %s2623_s15 }
 0x1e0   : > { %v1056_v33 = vpop.permute.xlu0 %1055  ;;  %v1234_v34 = vpop.permute.xlu1 %1233 }
 0x1e1   : > { %2205 = vmatpush3.xpose.msk.msra.mxu0 %vm886_vm2, %v1056_v33 }
 0x1e2   : > { %2214 = vmatprep.subr.mxu0 %v2620_v1 }
 0x1e4   : > { %v1232_v36 = vpop.permute.xlu1 %1231 }
 0x1e5   : > { %v1054_v35 = vpop.permute.xlu0 %1053 }
 0x1e6   : > { %2207 = vmatmul.mubr.msk.f32.vlgmr.msra.gmra.mrb[2].mxu0 %vm886_vm2, %v1054_v35 }
 0x1e7   : > { %2215 = vmatpush3.xpose.msk.msra.mxu0 %vm886_vm2, %v1234_v34  ;;  %2216 = vmatprep.mubr.msk.f32.mxu0 %vm2619_vm0, %v2620_v1 }
 0x1e8   : > { %2224 = vmatprep.subr.mxu0 %v2620_v1  ;;  %v1409_v38 = vpop.permute.xlu1 %1408 }
 0x1e9   : > { %v1411_v37 = vpop.permute.xlu0 %1410 }
 0x1ea   : > { %2217 = vmatmul.mubr.msk.f32.vlgmr.msra.gmra.mrb[4].mxu0 %vm886_vm2, %v1232_v36 }
 0x1eb   : > { %2225 = vmatpush3.xpose.msk.msra.mxu0 %vm886_vm2, %v1411_v37  ;;  %2226 = vmatprep.mubr.msk.f32.mxu0 %vm2619_vm0, %v2620_v1 }
 0x1ec   : > { %2293 = vmatprep.subr.bf16.mxu0 %v2618_v0 }
 0x1ee   : > { %2227 = vmatmul.mubr.msk.f32.vlgmr.msra.gmra.mrb[6].mxu0 %vm886_vm2, %v1409_v38 }
 0x1ef   : > { %2242 = vmatprep.mubr.msk.f32.mxu0 %vm2619_vm0, %v2620_v1 }
 0x245   : > { %v959_v39 = vpop.f32.mrb[4].mxu1 }
 0x246   : > { %v963_v40 = vmul.f32 0.35355338, %v959_v39  ;;  %v2198_v41 = vpop.f32.mrb[5].mxu1 }
 0x248   : > { %v964_v42 = vsel %vm886_vm2, %v963_v40, -inf }
 0x249   : > { %965 = vmax.xlane.f32.xlu0 %v964_v42 }
 0x2b9   : > { %v1127_v43 = vpop.f32.mrb[2].mxu0 }
 0x2ba   : > { %v1131_v44 = vmul.f32 0.35355338, %v1127_v43  ;;  %v2208_v45 = vpop.f32.mrb[3].mxu0  ;;  %v1586_v43 = vld [vmem:[#allocation6] sm:$0xff] }
 0x2bc   : > { %v1132_v46 = vsel %vm886_vm2, %v1131_v44, -inf }
 0x2bd   : > { %1133 = vmax.xlane.f32.xlu1 %v1132_v46  ;;  %v1305_v47 = vpop.f32.mrb[4].mxu0  ;;  %v1588_v46 = vld [vmem:[#allocation6 + $0x10] sm:$0xff] }
 0x2be   : > { %v1309_v48 = vmul.f32 0.35355338, %v1305_v47  ;;  %v2218_v49 = vpop.f32.mrb[5].mxu0  ;;  %v1589_v47 = vld [vmem:[#allocation6 + $0x18] sm:$0xff] }
 0x2c0   : > { %v1310_v50 = vsel %vm886_vm2, %v1309_v48, -inf }
 0x2c1   : > { %v1482_v51 = vpop.f32.mrb[6].mxu0  ;;  %1311 = vmax.xlane.f32.xlu0 %v1310_v50 }
 0x2c2   : > { %v1486_v52 = vmul.f32 0.35355338, %v1482_v51  ;;  %v2228_v53 = vpop.f32.mrb[7].mxu0 }
 0x2c4   : > { %v1487_v54 = vsel %vm886_vm2, %v1486_v52, -inf }
 0x2c5   : > { %1488 = vmax.xlane.f32.xlu0 %v1487_v54 }
 0x2d6   : > { %v966_v55 = vpop.xlane.xlu0 %965 }
 0x2d7   : > { %v967_v56 = vsub.f32 %v963_v40, %v966_v55 }
 0x2d9   : > { %v968_v57 = vmul.f32 1.442695, %v967_v56 }
 0x2db   : > { %2401 = vpow2.f32 %v968_v57 }
 0x2e5   : > { %v2402_v58 = vpop.eup %2401 }
 0x2e6   : > { %v970_v59 = vsel %vm886_vm2, %v2402_v58, 0.0 }
 0x2e7   : > { %971 = vadd.xlane.f32.xlu1 %v970_v59  ;;  %v2093_v59 = vld [vmem:[%s3204_s8] ss:$0 sm:$0xff] }
 0x2f8   : > { %1149 = vrot.lane.b32.xlu1 %v2990_v31, %s2622_s21 }
 0x34a   : > { %v1134_v60 = vpop.xlane.xlu1 %1133 }
 0x34b   : > { %v1135_v61 = vsub.f32 %v1131_v44, %v1134_v60  ;;  %v1587_v44 = vld [vmem:[#allocation6 + $0x8] sm:$0xff] }
 0x34c   : > { %v2294_v45 = vpack.c.bf16 %v1587_v44, %v1586_v43 }
 0x34d   : > { %v1136_v62 = vmul.f32 1.442695, %v1135_v61 }
 0x34e   : > { %v1312_v63 = vpop.xlane.xlu0 %1311  ;;  %2295 = vmatpush3.bf16.msra.mxu0 %v2294_v45 }
 0x34f   : > { %2403 = vpow2.f32 %v1136_v62  ;;  %v1313_v2 = vsub.f32 %v1309_v48, %v1312_v63  ;;  %v2297_v48 = vpack.c.bf16 %v1589_v47, %v1588_v46  ;;  %2296 = vmatprep.subr.bf16.mxu0 %v2618_v0 }
 0x351   : > { %v1314_v3 = vmul.f32 1.442695, %v1313_v2 }
 0x352   : > { %v1489_v4 = vpop.xlane.xlu0 %1488  ;;  %2298 = vmatpush3.bf16.msra.mxu0 %v2297_v48 }
 0x353   : > { %2405 = vpow2.f32 %v1314_v3  ;;  %v1490_v5 = vsub.f32 %v1486_v52, %v1489_v4  ;;  %2305 = vmatprep.subr.bf16.mxu0 %v2618_v0 }
 0x355   : > { %v1491_v6 = vmul.f32 1.442695, %v1490_v5 }
 0x357   : > { %2407 = vpow2.f32 %v1491_v6 }
 0x359   : > { %v2404_v7 = vpop.eup %2403 }
 0x35a   : > { %v1138_v8 = vsel %vm886_vm2, %v2404_v7, 0.0 }
 0x35b   : > { %1139 = vadd.xlane.f32.xlu0 %v1138_v8  ;;  %v1699_v8 = vld [vmem:[#allocation8 + $0x8] sm:$0xff] }
 0x35d   : > { %v2406_v9 = vpop.eup %2405 }
 0x35e   : > { %v1316_v11 = vsel %vm886_vm2, %v2406_v9, 0.0 }
 0x35f   : > { %1317 = vadd.xlane.f32.xlu1 %v1316_v11  ;;  %v1700_v11 = vld [vmem:[#allocation8 + $0x10] sm:$0xff] }
 0x361   : > { %v2408_v12 = vpop.eup %2407 }
 0x362   : > { %v1493_v13 = vsel %vm886_vm2, %v2408_v12, 0.0 }
 0x363   : > { %1494 = vadd.xlane.f32.xlu0 %v1493_v13 }
 0x370   : > { %1503 = vrot.lane.b32.xlu1 %v2990_v31, %s2623_s15  ;;  %s3258_s15 = sld [smem:[#allocation25_spill]] }
 0x374   : > { %v972_v14 = vpop.xlane.xlu1 %971 }
 0x375   : > { %2409 = vrcp.f32 %v972_v14 }
 0x378   : > { %v1150_v20 = vpop.permute.xlu1 %1149 }
 0x379   : > { %1326 = vrot.lane.b32.xlu0 %v2990_v31, %s2621_s1 }
 0x37f   : > { %v2410_v15 = vpop.eup %2409 }
 0x380   : > { %v974_v16 = vmul.f32 %v2410_v15, %v972_v14 }
 0x382   : > { %v975_v17 = vsub.f32 2.0, %v974_v16 }
 0x384   : > { %v976_v18 = vmul.f32 %v2410_v15, %v975_v17  ;;  %v2095_v17 = vld [vmem:[%s3205_s9] ss:$0 sm:$0xff] }
 0x386   : > { %v977_v19 = vmul.f32 %v2402_v58, %v976_v18 }
 0x388   : > { %978 = vst.msk [vmem:[%s3024_s22] sm:$0xff] %vm886_vm2, %v977_v19  ;;  %2202 = vmatmul.mubr.msk.f32.vlgmr.msra.gmra.mrb[6].mxu1 %vm886_vm2, %v977_v19  ;;  %v2096_v19 = vld [vmem:[%s3206_s10] ss:$0 sm:$0xff] }
 0x389   : > { %2210 = vmatpush3.msra.mxu1 %v1150_v20  ;;  %2211 = vmatprep.mubr.msk.f32.mxu1 %vm2619_vm0, %v2620_v1 }
 0x38a   : > { %2219 = vmatprep.subr.mxu1 %v2620_v1 }
 0x3e8   : > { %v1140_v21 = vpop.xlane.xlu0 %1139 }
 0x3e9   : > { %2411 = vrcp.f32 %v1140_v21 }
 0x3ec   : > { %v1318_v22 = vpop.xlane.xlu1 %1317 }
 0x3ed   : > { %2413 = vrcp.f32 %v1318_v22 }
 0x3f0   : > { %v1495_v23 = vpop.xlane.xlu0 %1494  ;;  %v1504_v38 = vpop.permute.xlu1 %1503 }
 0x3f1   : > { %2415 = vrcp.f32 %v1495_v23 }
 0x3f3   : > { %v2412_v24 = vpop.eup %2411 }
 0x3f4   : > { %v1142_v25 = vmul.f32 %v2412_v24, %v1140_v21  ;;  %v1327_v35 = vpop.permute.xlu0 %1326 }
 0x3f6   : > { %v1143_v26 = vsub.f32 2.0, %v1142_v25  ;;  %v1788_v25 = vld [vmem:[%s3209_s13 + $0x10] sm:$0xff] }
 0x3f7   : > { %v2414_v27 = vpop.eup %2413 }
 0x3f8   : > { %v1144_v28 = vmul.f32 %v2412_v24, %v1143_v26  ;;  %v1320_v29 = vmul.f32 %v2414_v27, %v1318_v22  ;;  %v1786_v22 = vld [vmem:[%s3209_s13] sm:$0xff]  ;;  %v1789_v26 = vld [vmem:[%s3209_s13 + $0x18] sm:$0xff] }
 0x3fa   : > { %v1145_v30 = vmul.f32 %v2404_v7, %v1144_v28  ;;  %v1321_v31 = vsub.f32 2.0, %v1320_v29  ;;  %v1790_v28 = vld [vmem:[%s3209_s13 + $0x20] sm:$0xff]  ;;  %v1791_v29 = vld [vmem:[%s3209_s13 + $0x28] sm:$0xff] }
 0x3fb   : > { %v2416_v32 = vpop.eup %2415 }
 0x3fc   : > { %2083 = vst.msk [vmem:[%s3024_s22 + $0x8] sm:$0xff] %vm886_vm2, %v1145_v30  ;;  %v1322_v33 = vmul.f32 %v2414_v27, %v1321_v31  ;;  %v1497_v34 = vmul.f32 %v2416_v32, %v1495_v23  ;;  %2212 = vmatmul.mubr.msk.f32.vlgmr.msra.gmra.mrb[8].mxu1 %vm886_vm2, %v1145_v30  ;;  %v1787_v23 = vld [vmem:[%s3209_s13 + $0x8] sm:$0xff]  ;;  %v2309_v27 = vpack.c.bf16 %v1789_v26, %v1788_v25  ;;  %v1792_v31 = vld [vmem:[%s3209_s13 + $0x30] sm:$0xff] }
 0x3fd   : > { %2220 = vmatpush3.msra.mxu1 %v1327_v35  ;;  %2221 = vmatprep.mubr.msk.f32.mxu1 %vm2619_vm0, %v2620_v1  ;;  %v2306_v24 = vpack.c.bf16 %v1787_v23, %v1786_v22  ;;  %v2312_v30 = vpack.c.bf16 %v1791_v29, %v1790_v28 }
 0x3fe   : > { %v1323_v36 = vmul.f32 %v2406_v9, %v1322_v33  ;;  %v1498_v37 = vsub.f32 2.0, %v1497_v34  ;;  %2229 = vmatprep.subr.mxu1 %v2620_v1  ;;  %v2097_v34 = vld [vmem:[%s3208_s12] ss:$0 sm:$0xff] }
 0x400   : > { %2087 = vst.msk [vmem:[%s3024_s22 + $0x10] sm:$0xff] %vm886_vm2, %v1323_v36  ;;  %v1499_v39 = vmul.f32 %v2416_v32, %v1498_v37  ;;  %2222 = vmatmul.mubr.msk.f32.vlgmr.msra.gmra.mrb[10].mxu1 %vm886_vm2, %v1323_v36  ;;  %v1793_v32 = vld [vmem:[%s3209_s13 + $0x38] sm:$0xff] }
 0x401   : > { %2230 = vmatpush3.msra.mxu1 %v1504_v38  ;;  %2231 = vmatprep.mubr.msk.f32.mxu1 %vm2619_vm0, %v2620_v1  ;;  %v2315_v33 = vpack.c.bf16 %v1793_v32, %v1792_v31 }
 0x402   : > { %v1500_v40 = vmul.f32 %v2408_v12, %v1499_v39  ;;  %2299 = vmatprep.subr.bf16.mxu1 %v2618_v0  ;;  %v1701_v12 = vld [vmem:[#allocation8 + $0x18] sm:$0xff] }
 0x403   : > { %v2303_v13 = vpack.c.bf16 %v1701_v12, %v1700_v11 }
 0x404   : > { %2091 = vst.msk [vmem:[%s3024_s22 + $0x18] sm:$0xff] %vm886_vm2, %v1500_v40  ;;  %2232 = vmatmul.mubr.msk.f32.vlgmr.msra.gmra.mrb[12].mxu1 %vm886_vm2, %v1500_v40 }
 0x405   : > { %2253 = vmatprep.mubr.msk.f32.mxu1 %vm2619_vm0, %v2620_v1 }
 0x45b   : > { %v1048_v41 = vpop.f32.mrb[6].mxu1 }
 0x45c   : > { %1052 = vst.msk [vmem:[#allocation2] sm:$0xff] %vm886_vm2, %v1048_v41  ;;  %v2203_v42 = vpop.f32.mrb[7].mxu1 }
 0x45d   : > { %v2099_v42 = vld [vmem:[%s3258_s15] ss:$0 sm:$0xff]  ;;  %s2509_s15 = scalar_lea.vmem %s3112_s27, 512 }
 0x45e   : > { %p2510_p11 = scmp.ne.s32.totalorder %s3112_s27, %s2509_s15 }
 0x460   : > { %p2511_p1 = pnand %p2510_p11, %p3260_p0 }
 0x462   : > { %p2512_p3 = pneg %p2511_p1 }
 0x4cf   : > { %v1221_v49 = vpop.f32.mrb[8].mxu1 }
 0x4d0   : > { %1226 = vrot.lane.b32.xlu1 %v1221_v49, %s3225_s19  ;;  %v2213_v50 = vpop.f32.mrb[9].mxu1  ;;  %s2513_s19 = sshll.u32 %s2627_s16, 4  ;;  %s2514_s19 = int_to_ptr.vmem [resolvable:$false] %s2513_s19 }
 0x4d1   : > { %s2515_s22 = scalar_lea.vmem %s2514_s19, 1024  ;;  %p2516_p7 = scmp.lt.s32.totalorder %s3112_s27, %s2514_s19 }
 0x4d2   : > { %p2517_p9 = scmp.lt.s32.totalorder %s2515_s22, %s2509_s15 }
 0x4d3   : > { %v1398_v51 = vpop.f32.mrb[10].mxu1 }
 0x4d4   : > { %1403 = vrot.lane.b32.xlu0 %v1398_v51, %s2625_s17  ;;  %v2223_v52 = vpop.f32.mrb[11].mxu1  ;;  %p2518_p12 = por %p2517_p9, %p2516_p7 }
 0x4d6   : > { %p2519_p2 = pnand %p2518_p12, %p2512_p3 }
 0x4d7   : > { %v1575_v53 = vpop.f32.mrb[12].mxu1 }
 0x4d8   : > { %1580 = vrot.lane.b32.xlu1 %v1575_v53, %s2626_s14  ;;  %v2233_v54 = vpop.f32.mrb[13].mxu1  ;;  %s3259_s14 = sld [smem:[#allocation29_spill]] }
 0x4de   : > { %s3110_s1 = scalar_lea.hbm %s3259_s14, %s2110_s23 }
 0x542   : > { %v1227_v55 = vpop.permute.xlu1 %1226 }
 0x543   : > { %1230 = vst.msk [vmem:[#allocation2] sm:$0xff] %vm1229_vm3, %v1227_v55 }
 0x546   : > { %v1404_v56 = vpop.permute.xlu0 %1403 }
 0x547   : > { %1407 = vst.msk [vmem:[#allocation2] sm:$0xff] %vm1406_vm4, %v1404_v56 }
 0x54a   : > { %v1581_v57 = vpop.permute.xlu1 %1580 }
 0x54b   : > { %1584 = vst.msk [vmem:[#allocation2] sm:$0xff] %vm1583_vm5, %v1581_v57 }
 0x552   : > { %v1585_v58 = vld [vmem:[#allocation2] sm:$0xff] }
 0x553   : > { %2243 = vmatmul.mubr.msk.f32.vlgmr.msra.gmra.mrb[8].mxu0 %vm652_vm1, %v1585_v58 }
 0x554   : > { %2272 = vmatprep.mubr.msk.f32.mxu0 %vm2619_vm0, %v2620_v1  ;;  %v1698_v1 = vld [vmem:[#allocation8] sm:$0xff]  ;;  %2307 = vmatpush3.bf16.msra.mxu0 %v2306_v24 }
 0x555   : > { %v2300_v9 = vpack.c.bf16 %v1699_v8, %v1698_v1  ;;  %2308 = vmatprep.subr.bf16.mxu0 %v2618_v0 }
 0x557   : > { %2301 = vmatpush3.bf16.msra.mxu1 %v2300_v9 }
 0x558   : > { %2302 = vmatprep.subr.bf16.mxu1 %v2618_v0  ;;  %2310 = vmatpush3.bf16.msra.mxu0 %v2309_v27 }
 0x559   : > { %2311 = vmatprep.subr.bf16.mxu0 %v2618_v0 }
 0x55b   : > { %2304 = vmatpush3.bf16.msra.mxu1 %v2303_v13 }
 0x55c   : > { %2313 = vmatpush3.bf16.msra.mxu0 %v2312_v30 }
 0x55d   : > { %2314 = vmatprep.subr.bf16.mxu0 %v2618_v0 }
 0x560   : > { %2316 = vmatpush3.bf16.msra.mxu0 %v2315_v33 }
 0x626   : > { %v1665_v60 = vpop.f32.mrb[8].mxu0 }
 0x627   : > { %v1666_v61 = vadd.f32 %v2093_v59, %v1665_v60  ;;  %v2244_v62 = vpop.f32.mrb[9].mxu0 }
 0x629   : > { %v1669_v63 = vadd.f32 %v1666_v61, %v2933_v10 }
 0x62b   : > { %v1670_v2 = vsel %vm652_vm1, %v1669_v63, 0.0 }
 0x62c   : > { %1671 = vadd.xlane.f32.xlu0 %v1670_v2 }
 0x6b9   : > { %v1672_v3 = vpop.xlane.xlu0 %1671 }
 0x6ba   : > { %v1674_v4 = vmul.f32 0.03125, %v1672_v3 }
 0x6bc   : > { %v1675_v5 = vsub.f32 %v1669_v63, %v1674_v4 }
 0x6be   : > { %v1676_v6 = vmul.f32 %v1675_v5, %v1675_v5 }
 0x6c0   : > { %v1677_v7 = vsel %vm652_vm1, %v1676_v6, 0.0 }
 0x6c1   : > { %1678 = vadd.xlane.f32.xlu1 %v1677_v7 }
 0x74e   : > { %v1679_v10 = vpop.xlane.xlu1 %1678 }
 0x74f   : > { %v1680_v14 = vmul.f32 0.03125, %v1679_v10 }
 0x751   : > { %v1681_v15 = vadd.f32 1e-05, %v1680_v14 }
 0x753   : > { %2417 = vrsqrt.f32 %v1681_v15 }
 0x75d   : > { %v2418_v16 = vpop.eup %2417 }
 0x75e   : > { %v1683_v18 = vmul.f32 %v2418_v16, %v1675_v5 }
 0x760   : > { %v1690_v20 = vmul.f32 %v2095_v17, %v1683_v18 }
 0x762   : > { %v1697_v21 = vadd.f32 %v2096_v19, %v1690_v20 }
 0x764   : > { %2254 = vmatmul.mubr.msk.f32.vlgmr.msra.gmra.mrb[14].mxu1 %vm652_vm1, %v1697_v21 }
 0x837   : > { %v1777_v35 = vpop.f32.mrb[14].mxu1 }
 0x838   : > { %v1778_v36 = vadd.f32 %v2097_v34, %v1777_v35  ;;  %v2255_v37 = vpop.f32.mrb[15].mxu1 }
 0x83a   : > { %v1782_v38 = vmul.f32 0.70710677, %v1778_v36  ;;  %v1781_v39 = vmul.f32 0.5, %v1778_v36 }
 0x83c   : > { %2419 = verf.f32 %v1782_v38 }
 0x846   : > { %v2420_v0 = vpop.eup %2419 }
 0x847   : > { %v1784_v40 = vadd.f32 1.0, %v2420_v0 }
 0x849   : > { %v1785_v41 = vmul.f32 %v1784_v40, %v1781_v39 }
 0x84b   : > { %2273 = vmatmul.mubr.msk.f32.vlgmr.msra.gmra.mrb[10].mxu0 %vm1800_vm6, %v1785_v41 }
 0x91e   : > { %v1870_v43 = vpop.f32.mrb[10].mxu0 }
 0x91f   : > { %v1871_v44 = vadd.f32 %v2099_v42, %v1870_v43  ;;  %v2274_v45 = vpop.f32.mrb[11].mxu0 }
 0x921   : > { %v1874_v46 = vadd.f32 %v1871_v44, %v1697_v21 }
 0x923   : > { %v1875_v47 = vsel %vm652_vm1, %v1874_v46, 0.0 }
 0x924   : > { %1876 = vadd.xlane.f32.xlu0 %v1875_v47 }
 0x9b1   : > { %v1877_v48 = vpop.xlane.xlu0 %1876 }
 0x9b2   : > { %v1878_v49 = vmul.f32 0.03125, %v1877_v48 }
 0x9b4   : > { %v1879_v50 = vsub.f32 %v1874_v46, %v1878_v49 }
 0x9b6   : > { %v1880_v51 = vmul.f32 %v1879_v50, %v1879_v50 }
 0x9b8   : > { %v1881_v52 = vsel %vm652_vm1, %v1880_v51, 0.0 }
 0x9b9   : > { %1882 = vadd.xlane.f32.xlu0 %v1881_v52 }
 0x9ba   : > { %2522 = shalt.err (!%p2519_p2)
}
 0x9bb   : > { %s2523_s23 = scalar_lea.hbm %s3110_s1, 512  ;;  %s2527_s16 = scalar_lea.hbm %s3259_s14, 1024 }
 0x9bc   : > { %p2524_p13 = scmp.ne.s32.totalorder %s3110_s1, %s2523_s23  ;;  %p2528_p4 = scmp.lt.u32.totalorder %s3110_s1, %s3259_s14 }
 0x9bd   : > { %p2529_p5 = scmp.lt.u32.totalorder %s2527_s16, %s2523_s23  ;;  %p2531_p11 = scmp.lt.u32.totalorder %s2523_s23, %s3110_s1 }
 0x9be   : > { %p2525_p6 = pnand %p2524_p13, %p3260_p0 }
 0x9bf   : > { %p2530_p8 = por %p2529_p5, %p2528_p4 }
 0x9c0   : > { %p2526_p10 = pneg %p2525_p6 }
 0x9c1   : > { %p2532_p1 = por %p2531_p11, %p2530_p8 }
 0x9c3   : > { %p2533_p3 = pnand %p2532_p1, %p2526_p10 }
 0x9c5   : > { %2536 = shalt.err (!%p2533_p3)
}
 0x9c6   : > { %s2628_s15 = smov 128   ;;  %s3261_s22 = smov 8  }
 0x9c7   : > { %s3262_s2 = scalar_lea.sflag [#allocation11], %s2894_s7  ;;  %s3263_s25 = sld [smem:[#allocation26_spill]] }
 0x9c8   : > { %2328 = dma.vmem_to_hbm [thread:$0]  (%p3260_p0), %s3112_s27, 512, %s3110_s1, %s3262_s2, %s2628_s15, %s2628_s15, %s3261_s22  }
 0x9c9   : > { %s3264_s19 = sld [smem:[#allocation27_spill]]  ;;  %s2105_s3 = sshll.u32 %s2746_s0, 7 }
 0x9ca   : > { %s3265_s4 = sshll.u32 %s2894_s7, 3  ;;  %s3266_s15 = sld [smem:[#allocation28_spill]] }
 0x9cb   : > { %s623_s5 = scalar_lea.vmem [#allocation9], %s3265_s4  ;;  %s1904_s21 = scalar_lea.sflag [#allocation5], %s2894_s7 }
 0x9cc   : > { %s1922_s2 = sshll.u32 %s623_s5, 4  ;;  %s2629_s4 = smov [#allocation9]   ;;  %s3153_s2 = int_to_ptr.vmem [resolvable:$true] %s1922_s2 }
 0x9cd   : > { %v2101_v57 = vld [vmem:[%s3263_s25] ss:$0 sm:$0xff]  ;;  %s2537_s23 = scalar_lea.vmem %s3153_s2, 128  ;;  %s2541_s0 = sshll.u32 %s2629_s4, 4  ;;  %s2542_s0 = int_to_ptr.vmem [resolvable:$false] %s2541_s0 }
 0x9ce   : > { %p2538_p7 = scmp.ne.s32.totalorder %s3153_s2, %s2537_s23  ;;  %s2543_s25 = scalar_lea.vmem %s2542_s0, 256 }
 0x9cf   : > { %v2102_v59 = vld [vmem:[%s3264_s19] ss:$0 sm:$0xff]  ;;  %p2544_p2 = scmp.lt.s32.totalorder %s3153_s2, %s2542_s0  ;;  %p2545_p13 = scmp.lt.s32.totalorder %s2543_s25, %s2537_s23 }
 0x9d0   : > { %s3151_s22 = scalar_lea.hbm %s3266_s15, %s2105_s3  ;;  %p2539_p9 = pnand %p2538_p7, %p3260_p0 }
 0x9d1   : > { %p2546_p6 = por %p2545_p13, %p2544_p2 }
 0x9d2   : > { %p2540_p12 = pneg %p2539_p9 }
 0x9d4   : > { %p2547_p10 = pnand %p2546_p6, %p2540_p12 }
 0xa46   : > { %v1883_v53 = vpop.xlane.xlu0 %1882 }
 0xa47   : > { %v1884_v54 = vmul.f32 0.03125, %v1883_v53 }
 0xa49   : > { %v1885_v55 = vadd.f32 1e-05, %v1884_v54 }
 0xa4b   : > { %2421 = vrsqrt.f32 %v1885_v55 }
 0xa55   : > { %v2422_v56 = vpop.eup %2421 }
 0xa56   : > { %v1887_v58 = vmul.f32 %v2422_v56, %v1879_v50 }
 0xa58   : > { %v1894_v60 = vmul.f32 %v2101_v57, %v1887_v58 }
 0xa5a   : > { %v1901_v61 = vadd.f32 %v2102_v59, %v1894_v60 }
 0xa5c   : > { %1902 = vst.msk [vmem:[%s623_s5] sm:$0xff] %vm652_vm1, %v1901_v61 }
 0xa5d   : > { %2550 = shalt.err (!%p2547_p10)
}
 0xa5e   : > { %s2551_s3 = scalar_lea.hbm %s3151_s22, 128  ;;  %s2555_s17 = scalar_lea.hbm %s3266_s15, 256 }
 0xa5f   : > { %p2552_p4 = scmp.ne.s32.totalorder %s3151_s22, %s2551_s3  ;;  %p2556_p11 = scmp.lt.u32.totalorder %s3151_s22, %s3266_s15 }
 0xa60   : > { %p2557_p1 = scmp.lt.u32.totalorder %s2555_s17, %s2551_s3  ;;  %p2559_p7 = scmp.lt.u32.totalorder %s2551_s3, %s3151_s22 }
 0xa61   : > { %p2553_p5 = pnand %p2552_p4, %p3260_p0 }
 0xa62   : > { %p2558_p3 = por %p2557_p1, %p2556_p11 }
 0xa63   : > { %p2554_p8 = pneg %p2553_p5 }
 0xa64   : > { %p2560_p9 = por %p2559_p7, %p2558_p3 }
 0xa66   : > { %p2561_p12 = pnand %p2560_p9, %p2554_p8 }
 0xa68   : > { %2564 = shalt.err (!%p2561_p12)
}
 0xa69   : > { %2327 = dma.vmem_to_hbm [thread:$0]  (%p3260_p0), %s3153_s2, 128, %s3151_s22, %s1904_s21  }
 0xa6a PF: > { %s3267_s27 = sld [smem:[#allocation16_spill]]  ;;  %s3268_s1 = sld [smem:[#allocation17_spill]] }
 0xa6b   : > { %p3270_p13 = scmp.ge.s32.totalorder %s2611_s30, 2 }
 0xa70   : > { %s1950_s23 = sand.u32 1, %s3267_s27   ;;  %p3269_p2 = scmp.ne.s32.totalorder %s3268_s1, 0 }
 0xa71   : > { %s1951_s4 = scalar_lea.sflag [#allocation5], %s1950_s23 }
 0xa72   : > { %p2343_p6 = pnand %p3270_p13, %p3269_p2 }
 0xa74   : > { %2590 = dma.done.wait (!%p2343_p6), %s1951_s4, 128  }
 0xa75   : > { %2592 = vsyncadd (!%p2343_p6), %s1951_s4, 4294967168  ;;  %s1960_s0 = scalar_lea.sflag [#allocation11], %s1950_s23 }
 0xa76   : > { %2594 = dma.done.wait (!%p2343_p6), %s1960_s0, 512  }
 0xa77   : > { %2596 = vsyncadd (!%p2343_p6), %s1960_s0, 4294966784  ;;  %p36_p0 = scmp.ge.s32.totalorder %s2835_s18, 4   ;;  %s3271_s27 = smov %s2603_s28 }
 0xa78   : > { %s3272_s28 = smov %s2607_s29  ;;  %s3273_s29 = smov %s2851_s26 }
 0xa79   : > { %s3274_s30 = smov %s2835_s18  ;;  %38 = sbr.rel (!%p36_p0) target bundleno = 21 (0x15), region = 161 }
 0xa80   :  { %1965 = vsyncpa [#allocation4], 1 }
 0xa81   :  { %1967 = vsyncpa [#allocation4 + $0x1], 1 }
 0xa82   :  { %1968 = vsyncpa [#allocation7], 1 }
 0xa83   :  { %1969 = vsyncpa [#allocation5], 1 }
 0xa84   :  { %1971 = vsyncpa [#allocation5 + $0x1], 1 }
 0xa85   :  { %1972 = vsyncpa [#allocation11], 1 }
 0xa86   :  { %1974 = vsyncpa [#allocation11 + $0x1], 1 }

</bundles_post_ra>
